<compile_context>
chip_gen: v6e
topology: v6e:2x2x1
jax: 0.10.0
libtpu: 0.0.40
codegen_flags: <defaults>
</compile_context>

<pallas_src>
import jax
import jax.numpy as jnp
from jax import lax
from jax.experimental import pallas as pl
from jax.experimental.pallas import tpu as pltpu

IN_FEATURES = 196608   # as declared in the PyTorch module
OUT_FEATURES = 10
TK = 49152             # K-tile: 196608 / 49152 = 4 grid steps, multiple of 128


def linear_kernel(x_ref, w_ref, b_ref, o_ref):
    k = pl.program_id(0)

    @pl.when(k == 0)
    def _init():
        # Start the resident output block at the (broadcast) bias.
        o_ref[...] = jnp.broadcast_to(b_ref[...], o_ref.shape).astype(o_ref.dtype)

    # (B, TK) x (N, TK) contracted over the lane dim -> (B, N), f32 on the MXU.
    o_ref[...] += lax.dot_general(
        x_ref[...],
        w_ref[...],
        dimension_numbers=(((1,), (1,)), ((), ())),
        preferred_element_type=jnp.float32,
    ).astype(o_ref.dtype)


def linear_forward(x, w, b):
    """y = x @ w.T + b   (PyTorch nn.Linear forward). w is (N, K), b is (N,)."""
    B, K = x.shape
    N, K2 = w.shape
    assert K == K2 and K % TK == 0
    b2 = b.reshape(1, N)  # (1, N) for in-kernel broadcast add

    grid_spec = pltpu.PrefetchScalarGridSpec(
        num_scalar_prefetch=0,
        grid=(K // TK,),
        in_specs=[
            pl.BlockSpec((B, TK), lambda k: (0, k)),   # x tile, streamed over K
            pl.BlockSpec((N, TK), lambda k: (0, k)),   # w tile (native layout)
            pl.BlockSpec((1, N), lambda k: (0, 0)),    # bias, resident
        ],
        out_specs=pl.BlockSpec((B, N), lambda k: (0, 0)),  # resident accumulator
    )

    cost = pl.CostEstimate(
        flops=2 * B * N * K,
        transcendentals=0,
        bytes_accessed=(B * K + N * K + N + B * N) * 4,
    )

    return pl.pallas_call(
        linear_kernel,
        out_shape=jax.ShapeDtypeStruct((B, N), x.dtype),
        grid_spec=grid_spec,
        compiler_params=pltpu.CompilerParams(
            dimension_semantics=("arbitrary",),        # K is a reduction axis
            vmem_limit_bytes=32 * 1024 * 1024,         # headroom incl. v5e default
        ),
        cost_estimate=cost,
    )(x, w, b2)


if __name__ == "__main__":
    key = jax.random.PRNGKey(0)
    kx, kw, kb = jax.random.split(key, 3)

    batch = 2
    # Deterministic synthetic params (PyTorch-style shapes: W (out,in), b (out,))
    bound = 1.0 / (IN_FEATURES ** 0.5)
    w = jax.random.uniform(
        kw, (OUT_FEATURES, IN_FEATURES), jnp.float32, -bound, bound
    )
    b = jax.random.uniform(kb, (OUT_FEATURES,), jnp.float32, -bound, bound)
    x = jax.random.normal(kx, (batch, IN_FEATURES), jnp.float32)

    y = linear_forward(x, w, b)
    y = jax.block_until_ready(y)

    # Reference check against plain-JAX linear.
    y_ref = x @ w.T + b
    assert y.shape == (batch, OUT_FEATURES)
    assert jnp.allclose(y, y_ref, atol=2e-3, rtol=2e-3)

    print("KERNEL_OK")
</pallas_src>

<mosaic_0001>
module attributes {stable_mosaic.version = 11 : i64} {
  func.func @linear_kernel(%arg0: i32, %arg1: memref<2x49152xf32, #tpu.memory_space<vmem>>, %arg2: memref<10x49152xf32, #tpu.memory_space<vmem>>, %arg3: memref<1x10xf32, #tpu.memory_space<vmem>>, %arg4: memref<2x10xf32, #tpu.memory_space<vmem>>) attributes {dimension_semantics = [#tpu.dimension_semantics<arbitrary>], iteration_bounds = array<i64: 4>, scalar_prefetch = 0 : i64, scratch_operands = 0 : i64, tpu.core_type = #tpu.core_type<tc>, window_params = [{transform_indices = @transform_0, window_bounds = array<i64: 2, 49152>}, {transform_indices = @transform_1, window_bounds = array<i64: 10, 49152>}, {pipeline_mode = #tpu.pipeline_mode<synchronous>, transform_indices = @transform_2, window_bounds = array<i64: 1, 10>}, {pipeline_mode = #tpu.pipeline_mode<synchronous>, transform_indices = @transform_3, window_bounds = array<i64: 2, 10>}]} {
    %c0_i32 = arith.constant 0 : i32
    %0 = arith.cmpi eq, %arg0, %c0_i32 : i32
    %1 = arith.extui %0 : i1 to i32
    %c0_i32_0 = arith.constant 0 : i32
    %2 = arith.cmpi ne, %1, %c0_i32_0 : i32
    scf.if %2 {
      %c0_8 = arith.constant 0 : index
      %c0_9 = arith.constant 0 : index
      %9 = vector.load %arg3[%c0_8, %c0_9] : memref<1x10xf32, #tpu.memory_space<vmem>>, vector<1x10xf32>
      %10 = vector.shape_cast %9 : vector<1x10xf32> to vector<1x10xf32>
      %11 = vector.broadcast %10 : vector<1x10xf32> to vector<2x10xf32>
      %c0_10 = arith.constant 0 : index
      %c0_11 = arith.constant 0 : index
      %12 = vector.load %arg4[%c0_10, %c0_11] : memref<2x10xf32, #tpu.memory_space<vmem>>, vector<2x10xf32>
      tpu.vector_store %arg4[%c0_10, %c0_11], %11 {strides = array<i32>} : memref<2x10xf32, #tpu.memory_space<vmem>>, vector<2x10xf32>,
    } else {
    }
    %c0 = arith.constant 0 : index
    %c0_1 = arith.constant 0 : index
    %3 = vector.load %arg4[%c0, %c0_1] : memref<2x10xf32, #tpu.memory_space<vmem>>, vector<2x10xf32>
    %c0_2 = arith.constant 0 : index
    %c0_3 = arith.constant 0 : index
    %4 = vector.load %arg1[%c0_2, %c0_3] : memref<2x49152xf32, #tpu.memory_space<vmem>>, vector<2x49152xf32>
    %c0_4 = arith.constant 0 : index
    %c0_5 = arith.constant 0 : index
    %5 = vector.load %arg2[%c0_4, %c0_5] : memref<10x49152xf32, #tpu.memory_space<vmem>>, vector<10x49152xf32>
    %cst = arith.constant dense<0.000000e+00> : vector<2x10xf32>
    %6 = tpu.matmul %4, %5, %cst {dimension_numbers = #tpu.dot_dimension_numbers<[1], [1], [0], [0], [0, 0, 1, 0], [], []>} : vector<2x49152xf32>, vector<10x49152xf32>, vector<2x10xf32> -> vector<2x10xf32>
    %7 = arith.addf %3, %6 : vector<2x10xf32>
    %c0_6 = arith.constant 0 : index
    %c0_7 = arith.constant 0 : index
    %8 = vector.load %arg4[%c0_6, %c0_7] : memref<2x10xf32, #tpu.memory_space<vmem>>, vector<2x10xf32>
    tpu.vector_store %arg4[%c0_6, %c0_7], %7 {strides = array<i32>} : memref<2x10xf32, #tpu.memory_space<vmem>>, vector<2x10xf32>,
    return
  }
  func.func @transform_0(%arg0: i32) -> (i32, i32) {
    %c0_i32 = arith.constant 0 : i32
    %c0_i32_0 = arith.constant 0 : i32
    return %c0_i32, %arg0 : i32, i32
  }
  func.func @transform_1(%arg0: i32) -> (i32, i32) {
    %c0_i32 = arith.constant 0 : i32
    %c0_i32_0 = arith.constant 0 : i32
    return %c0_i32, %arg0 : i32, i32
  }
  func.func @transform_2(%arg0: i32) -> (i32, i32) {
    %c0_i32 = arith.constant 0 : i32
    %c0_i32_0 = arith.constant 0 : i32
    %c0_i32_1 = arith.constant 0 : i32
    return %c0_i32, %c0_i32_0 : i32, i32
  }
  func.func @transform_3(%arg0: i32) -> (i32, i32) {
    %c0_i32 = arith.constant 0 : i32
    %c0_i32_0 = arith.constant 0 : i32
    %c0_i32_1 = arith.constant 0 : i32
    return %c0_i32, %c0_i32_0 : i32, i32
  }
}

</mosaic_0001>

<bundles_post_ra>
// kernel: tpu_custom_call.1
= control target key start
LH: loop header
LB: loop body
LE: loop exit
PB: predicated region body
PF: predicated region fallthrough
CT: control target
= control target key end

     0   :  { %8 = vsyncpa [#allocation3], 0  ;;  %s18357_s0 = inlined_call_operand.hbm [shape: f32[2,196608], index: 0, kind: input, shape index: {}]   ;;  %s18358_s1 = inlined_call_operand.hbm [shape: f32[10,196608], index: 1, kind: input, shape index: {}]   ;;  %s18359_s2 = inlined_call_operand.hbm [shape: f32[1,10], index: 2, kind: input, shape index: {}]   ;;  %s18360_s3 = inlined_call_operand.hbm [shape: f32[2,10], index: 3, kind: output, shape index: {}]  }
   0x1   :  { %10 = vsyncpa [#allocation3 + $0x1], 0 }
   0x2   :  { %11 = vsyncpa [#allocation6], 0 }
   0x3   :  { %13 = vsyncpa [#allocation6 + $0x1], 0 }
   0x4   :  { %14 = vsyncpa [#allocation4], 0  ;;  %s17115_s12 = smov 0   ;;  %s17117_s13 = smov 0  }
   0x5   :  { %s17119_s14 = smov 0   ;;  %s17121_s15 = smov 0  }
   0x6 LB: > { %s17134_s16 = sadd.s32 4294967295, %s17085_s15   ;;  %s17137_s17 = sadd.s32 1, %s17085_s15   ;;  %s17085_s15 = sphi %s17121_s15, %s18376_s15   ;;  %s17081_s14 = sphi %s17119_s14, %s18375_s14   ;;  %s17077_s13 = sphi %s17117_s13, %s18374_s13   ;;  %s17073_s12 = sphi %s17115_s12, %s18373_s12  }
   0x7   : > { %s24_s18 = ssub.s32 %s17085_s15, %s17137_s17  ;;  %s27_s19 = sadd.s32 1, %s17081_s14 }
   0x8   : > { %p25_p0 = scmp.eq.s32.totalorder %s24_s18, 0  ;;  %p34_p1 = scmp.ne.s32.totalorder %s17081_s14, %s17077_s13 }
   0x9   : > { %p40_p2 = scmp.ne.s32.totalorder %s17077_s13, %s17073_s12  ;;  %p18361_p3 = scmp.eq.s32.totalorder %s17134_s16, 0 }
   0xa   : > { %s17147_s20 = scalar_select %p25_p0, %s17081_s14, %s27_s19  }
   0xb   : > { %p17151_p4 = por %p18361_p3, %p40_p2  ;;  %p16752_p5 = scmp.ge.s32.totalorder %s17085_s15, 1 }
   0xc   : > { %p119_p6 = scmp.lt.s32.totalorder %s17085_s15, 5  ;;  %s17087_s23 = smov [#allocation7]  }
   0xd   : > { %s18364_s21 = scalar_select %p17151_p4, 1, 0 }
   0xe   : > { %p17158_p8 = pnand %p16752_p5, %p119_p6  ;;  %s132_s24 = sshll.u32 %s17087_s23, 4  ;;  %s133_s24 = int_to_ptr.vmem [resolvable:$true] %s132_s24 }
   0xf   : > { %p35_p9 = scmp.eq.s32.totalorder %s17085_s15, 0  ;;  %p16795_p11 = scmp.lt.s32.totalorder %s17085_s15, 4 }
  0x10   : > { %s18365_s22 = scalar_select %p17158_p8, 1, 0 }
  0x11   : > { %p16783_p10 = pneg %p17158_p8  ;;  %p36_p12 = por %p35_p9, %p34_p1 }
  0x12   : > { %s17170_s25 = sand.u32 1, %s17081_s14   ;;  %s16765_s29 = smul.u32 12288, %s17085_s15 }
  0x13   : > { %p17174_p13 = pnand %p16783_p10, %p18361_p3  ;;  %s16767_s27 = smul.u32 768, %s17170_s25 }
  0x14   : > { %p17179_p0 = pnand %p16795_p11, %p36_p12  ;;  %s16944_s30 = scalar_lea.vmem %s133_s24, 16 }
  0x15   : > { %p16935_p2 = pneg %p17174_p13  ;;  %p16945_p5 = scmp.ne.s32.totalorder %s133_s24, %s16944_s30 }
  0x16   : > { %s16951_s4 = scalar_lea.vmem %s133_s24, 32  ;;  %p16952_p9 = scmp.lt.s32.totalorder %s133_s24, %s133_s24 }
  0x17   : > { %p16947_p1 = pnand %p16945_p5, %p16935_p2  ;;  %p16953_p7 = scmp.lt.s32.totalorder %s16951_s4, %s16944_s30 }
  0x19   : > { %p16948_p6 = pneg %p16947_p1  ;;  %p16954_p10 = por %p16953_p7, %p16952_p9 }
  0x1b   : > { %p16955_p3 = pnand %p16954_p10, %p16948_p6 }
  0x1d   : > { %16958 = shalt.err (!%p16955_p3)
}
  0x1e   : > { %16786 = dma.hbm_to_vmem [thread:$0]  (!%p17174_p13), %s18359_s2, 16, %s133_s24, [#allocation6]  }
  0x1f   : > { %s17194_s9 = scalar_lea.hbm %s18357_s0, %s16765_s29  ;;  %s147_s10 = scalar_lea.vmem [#allocation2], %s16767_s27 }
  0x20   : > { %s155_s11 = sshll.u32 %s147_s10, 4  ;;  %s16768_s12 = smul.u32 6144, %s17170_s25  ;;  %s156_s11 = int_to_ptr.vmem [resolvable:$true] %s155_s11 }
  0x21   : > { %s144_s18 = scalar_lea.sflag [#allocation3], %s17170_s25  ;;  %s16959_s19 = scalar_lea.hbm %s17194_s9, 12288 }
  0x22   : > { %p16960_p3 = scmp.ne.s32.totalorder %s17194_s9, %s16959_s19  ;;  %p16961_p7 = pneg %p17179_p0 }
  0x23   : > { %s16964_s26 = scalar_lea.hbm %s18357_s0, 49152  ;;  %p16965_p13 = scmp.lt.s32.totalorder %s17194_s9, %s18357_s0 }
  0x24   : > { %p16962_p11 = pnand %p16961_p7, %p16960_p3  ;;  %p16966_p2 = scmp.lt.s32.totalorder %s16964_s26, %s16959_s19 }
  0x26   : > { %p16963_p12 = pneg %p16962_p11  ;;  %p16967_p5 = por %p16966_p2, %p16965_p13 }
  0x28   : > { %p16968_p1 = pnand %p16967_p5, %p16963_p12 }
  0x2a   : > { %16971 = shalt.err (!%p16968_p1)
}
  0x2b   : > { %s16972_s25 = scalar_lea.vmem %s156_s11, 12288  ;;  %s17088_s27 = smov [#allocation2]  }
  0x2c   : > { %p16973_p6 = scmp.ne.s32.totalorder %s156_s11, %s16972_s25  ;;  %s16977_s4 = sshll.u32 %s17088_s27, 4  ;;  %s16978_s4 = int_to_ptr.vmem [resolvable:$false] %s16977_s4 }
  0x2d   : > { %s16979_s5 = scalar_lea.vmem %s16978_s4, 24576  ;;  %p16980_p3 = scmp.lt.s32.totalorder %s156_s11, %s16978_s4 }
  0x2e   : > { %p16975_p9 = pnand %p16973_p6, %p16961_p7  ;;  %p16981_p11 = scmp.lt.s32.totalorder %s16979_s5, %s16972_s25 }
  0x30   : > { %p16976_p10 = pneg %p16975_p9  ;;  %p16982_p4 = por %p16981_p11, %p16980_p3 }
  0x32   : > { %p16983_p8 = pnand %p16982_p4, %p16976_p10 }
  0x34   : > { %16986 = shalt.err (!%p16983_p8)
}
  0x35   : > { %16790 = dma.hbm_to_vmem [thread:$0]  (!%p17179_p0), %s17194_s9, 12288, %s156_s11, %s144_s18  }
  0x36   : > { %s162_s6 = sand.u32 1, %s17085_s15   ;;  %s166_s7 = scalar_lea.vmem [#allocation5], %s16768_s12 }
  0x37   : > { %s173_s8 = sshll.u32 %s166_s7, 4  ;;  %s16766_s10 = smul.u32 49152, %s17085_s15  ;;  %s17219_s8 = int_to_ptr.vmem [resolvable:$true] %s173_s8 }
  0x38   : > { %s17227_s26 = scalar_lea.sflag [#allocation6], %s162_s6  ;;  %s16992_s15 = scalar_lea.hbm %s18358_s1, 393216 }
  0x39   : > { %s17225_s24 = scalar_lea.hbm %s18358_s1, %s16766_s10 }
  0x3a   : > { %s16987_s29 = scalar_lea.hbm %s17225_s24, 98304  ;;  %p16993_p13 = scmp.lt.s32.totalorder %s17225_s24, %s18358_s1 }
  0x3b   : > { %p16988_p4 = scmp.ne.s32.totalorder %s17225_s24, %s16987_s29  ;;  %p16994_p2 = scmp.lt.s32.totalorder %s16992_s15, %s16987_s29 }
  0x3d   : > { %p16990_p8 = pnand %p16988_p4, %p16961_p7  ;;  %p16995_p5 = por %p16994_p2, %p16993_p13 }
  0x3f   : > { %p16991_p12 = pneg %p16990_p8 }
  0x41   : > { %p16996_p1 = pnand %p16995_p5, %p16991_p12 }
  0x43   : > { %16999 = shalt.err (!%p16996_p1)
}
  0x44   : > { %s17000_s30 = scalar_lea.vmem %s17219_s8, 98304  ;;  %s17089_s25 = smov [#allocation5]  }
  0x45   : > { %p17001_p6 = scmp.ne.s32.totalorder %s17219_s8, %s17000_s30  ;;  %s17005_s27 = sshll.u32 %s17089_s25, 4  ;;  %s17006_s27 = int_to_ptr.vmem [resolvable:$false] %s17005_s27 }
  0x46   : > { %s17007_s4 = scalar_lea.vmem %s17006_s27, 196608  ;;  %p17008_p3 = scmp.lt.s32.totalorder %s17219_s8, %s17006_s27 }
  0x47   : > { %p17003_p9 = pnand %p17001_p6, %p16961_p7  ;;  %p17009_p11 = scmp.lt.s32.totalorder %s17007_s4, %s17000_s30 }
  0x49   : > { %p17004_p10 = pneg %p17003_p9  ;;  %p17010_p4 = por %p17009_p11, %p17008_p3 }
  0x4b   : > { %p17011_p8 = pnand %p17010_p4, %p17004_p10 }
  0x4d   : > { %17014 = shalt.err (!%p17011_p8)
}
  0x4e   : > { %s17090_s5 = smov 196608   ;;  %s17091_s6 = smov 49152  }
  0x4f   : > { %s17092_s7 = smov 3072   ;;  %p18368_p7 = scmp.ne.s32.totalorder %s18365_s22, 0 }
  0x50   : > { %16793 = dma.hbm_to_vmem [thread:$0]  (!%p17179_p0), %s17225_s24, 98304, %s17219_s8, %s17227_s26, %s17090_s5, %s17091_s6, %s17092_s7  }
  0x51   : > { %185 = sbr.rel (%p18368_p7) target bundleno = 1080 (0x438), region = 32  ;;  %s187_s10 = sand.u32 (!%p18368_p7), 1, %s17077_s13  }
  0x52   : > { %s16769_s19 = smul.u32 (!%p18368_p7), 768, %s187_s10  ;;  %s188_s23 = scalar_lea.sflag (!%p18368_p7), [#allocation3], %s187_s10 }
  0x53   : > { %p18369_p12 = scmp.ne.s32.totalorder (!%p18368_p7), %s18364_s21, 0 }
  0x54   : > { %s17255_s29 = scalar_lea.vmem (!%p18368_p7), [#allocation2], %s16769_s19 }
  0x56   : > { %17056 = dma.done.wait (%p18369_p12), %s188_s23, 12288  }
  0x57   : > { %17058 = vsyncadd (%p18369_p12), %s188_s23, 4294955008  ;;  %s196_s9 = sand.u32 1, %s17134_s16   ;;  %s16770_s28 = smul.u32 6144, %s187_s10 }
  0x58   : > { %s197_s8 = scalar_lea.sflag [#allocation6], %s196_s9 }
  0x59   : > { %s17262_s24 = scalar_lea.vmem [#allocation5], %s16770_s28 }
  0x5a   : > { %17060 = dma.done.wait (%p18369_p12), %s197_s8, 98304  }
  0x5b   : > { %17062 = vsyncadd (%p18369_p12), %s197_s8, 4294868992  ;;  %p18370_p0 = scmp.eq.s32.totalorder %s17134_s16, 0 }
  0x5d   : > { %17064 = dma.done.wait (%p18370_p0), [#allocation6], 16   ;;  %p18371_p13 = pmov %p18370_p0 }
  0x5e   : > { %p18372_p2 = scmp.ne.s32.totalorder %s17134_s16, 0 }
  0x5f   : > { %17066 = vsyncadd (%p18371_p13), [#allocation6], 4294967280 }
  0x60   : > { %232 = sbr.rel (%p18372_p2) target bundleno = 103 (0x67), region = 48 }
  0x65   : > { %v16760_v0 = vld [vmem:[#allocation7] ss:$0 sm:$0xff]  ;;  %vm240_vm0 = vcmask 74752  }
  0x66   : > { %241 = vst.msk [vmem:[#allocation8] sm:$0x3] %vm240_vm0, %v16760_v0 }
  0x67 PF: > { %v724_v1 = vld [vmem:[%s17262_s24 + $0xc08] sm:$0x3]  ;;  %v726_v2 = vld [vmem:[%s17262_s24 + $0xc18] sm:$0x3]  ;;  %v723_v3 = vld [vmem:[%s17262_s24 + $0xc00] sm:$0x3]  ;;  %v1207_v4 = vlaneseq }
  0x68   : > { %3247 = vmatprep.subr.mxu0 %v724_v1  ;;  %3317 = vmatprep.subr.mxu1 %v726_v2  ;;  %v725_v5 = vld [vmem:[%s17262_s24 + $0xc10] sm:$0x3]  ;;  %v340_v6 = vld [vmem:[%s17262_s24 + $0x8] sm:$0xff]  ;;  %v342_v7 = vld [vmem:[%s17262_s24 + $0x18] sm:$0xff]  ;;  %v17093_v9 = vmov 1983009808  }
  0x69   : > { %3248 = vmatpush1.xpose.msra.mxu0 %v723_v3  ;;  %3318 = vmatpush1.xpose.msra.mxu1 %v725_v5  ;;  %v243_v8 = vld [vmem:[%s17255_s29] sm:$0xff]  ;;  %v1205_v10 = vunpack.c.l.s4 %v17093_v9  ;;  %v1208_v11 = vshrl.u32 %v1207_v4, 7  ;;  %v341_v13 = vld [vmem:[%s17262_s24 + $0x10] sm:$0xff]  ;;  %v728_v16 = vld [vmem:[%s17262_s24 + $0xc28] sm:$0x3]  ;;  %s17094_s21 = smov [#allocation8]  }
  0x6a   : > { %3249 = vmatprep.subr.mxu0 %v340_v6  ;;  %3319 = vmatprep.subr.mxu1 %v342_v7  ;;  %v339_v12 = vld [vmem:[%s17262_s24] sm:$0xff]  ;;  %v1203_v15 = vcombine.high %v243_v8, %v243_v8  ;;  %v730_v17 = vld [vmem:[%s17262_s24 + $0xc38] sm:$0x3]  ;;  %v244_v18 = vld [vmem:[%s17255_s29 + $0x8] sm:$0xff]  ;;  %s16669_s22 = sshll.u32 %s17094_s21, 4  ;;  %vm16660_vm1 = vcmask 74752   ;;  %s16670_s22 = int_to_ptr.vmem [resolvable:$true] %s16669_s22 }
  0x6b   : > { %v1206_v14 = vunpack.c.0.s8 %v1205_v10  ;;  %v1220_v20 = vcombine.high %v244_v18, %v244_v18  ;;  %v245_v25 = vld [vmem:[%s17255_s29 + $0x10] sm:$0xff]  ;;  %v727_v28 = vld [vmem:[%s17262_s24 + $0xc20] sm:$0x3]  ;;  %v344_v30 = vld [vmem:[%s17262_s24 + $0x28] sm:$0xff]  ;;  %p16797_p5 = scmp.eq.s32.totalorder %s17134_s16, 3  ;;  %s17015_s26 = scalar_lea.vmem %s16670_s22, 32 }
  0x6c   : > { %v729_v29 = vld [vmem:[%s17262_s24 + $0xc30] sm:$0x3]  ;;  %v346_v31 = vld [vmem:[%s17262_s24 + $0x38] sm:$0xff]  ;;  %v1237_v34 = vcombine.high %v245_v25, %v245_v25  ;;  %v343_v35 = vld [vmem:[%s17262_s24 + $0x20] sm:$0xff]  ;;  %p17016_p1 = scmp.ne.s32.totalorder %s16670_s22, %s17015_s26  ;;  %p17022_p10 = scmp.lt.s32.totalorder %s16670_s22, %s16670_s22 }
  0x6d   : > { %3250 = vmatpush1.xpose.msra.mxu0 %v339_v12  ;;  %3320 = vmatpush1.xpose.msra.mxu1 %v341_v13  ;;  %v17286_v19 = vsub.s32 %v1206_v14, %v1208_v11  ;;  %v345_v36 = vld [vmem:[%s17262_s24 + $0x30] sm:$0xff]  ;;  %v732_v37 = vld [vmem:[%s17262_s24 + $0xc48] sm:$0x3]  ;;  %v734_v38 = vld [vmem:[%s17262_s24 + $0xc58] sm:$0x3]  ;;  %p17023_p3 = scmp.lt.s32.totalorder %s17015_s26, %s17015_s26 }
  0x6e   : > { %3387 = vmatprep.subr.mxu0 %v728_v16  ;;  %3457 = vmatprep.subr.mxu1 %v730_v17  ;;  %v246_v41 = vld [vmem:[%s17255_s29 + $0x18] sm:$0xff]  ;;  %v731_v42 = vld [vmem:[%s17262_s24 + $0xc40] sm:$0x3]  ;;  %v733_v43 = vld [vmem:[%s17262_s24 + $0xc50] sm:$0x3]  ;;  %p17017_p6 = pnand %p17016_p1, %p16797_p5 }
  0x6f   : > { %v1210_v21 = vrot.slane %v243_v8, %v17286_v19  ;;  %v1217_v22 = vrot.slane %v1203_v15, %v17286_v19  ;;  %v1227_v23 = vrot.slane %v244_v18, %v17286_v19  ;;  %v1234_v24 = vrot.slane %v1220_v20, %v17286_v19  ;;  %v348_v44 = vld [vmem:[%s17262_s24 + $0x48] sm:$0xff]  ;;  %v350_v45 = vld [vmem:[%s17262_s24 + $0x58] sm:$0xff]  ;;  %v347_v49 = vld [vmem:[%s17262_s24 + $0x40] sm:$0xff]  ;;  %p17024_p11 = por %p17023_p3, %p17022_p10 }
  0x70   : > { %v1244_v39 = vrot.slane %v245_v25, %v17286_v19  ;;  %v1251_v40 = vrot.slane %v1237_v34, %v17286_v19  ;;  %v1254_v48 = vcombine.high %v246_v41, %v246_v41  ;;  %v349_v50 = vld [vmem:[%s17262_s24 + $0x50] sm:$0xff]  ;;  %v736_v51 = vld [vmem:[%s17262_s24 + $0xc68] sm:$0x3]  ;;  %v738_v52 = vld [vmem:[%s17262_s24 + $0xc78] sm:$0x3]  ;;  %v1261_v53 = vrot.slane %v246_v41, %v17286_v19  ;;  %p17018_p9 = pneg %p17017_p6 }
  0x71   : > { %v1218_v26 = vcombine.high %v1210_v21, %v1210_v21  ;;  %v1219_v27 = vcombine.high %v1217_v22, %v1217_v22  ;;  %v1235_v32 = vcombine.high %v1227_v23, %v1227_v23  ;;  %v1236_v33 = vcombine.high %v1234_v24, %v1234_v24  ;;  %v247_v55 = vld [vmem:[%s17255_s29 + $0x20] sm:$0xff]  ;;  %v737_v57 = vld [vmem:[%s17262_s24 + $0xc70] sm:$0x3]  ;;  %v352_v58 = vld [vmem:[%s17262_s24 + $0x68] sm:$0xff] }
  0x72   : > { %v1252_v46 = vcombine.high %v1244_v39, %v1244_v39  ;;  %v1253_v47 = vcombine.high %v1251_v40, %v1251_v40  ;;  %v1268_v54 = vrot.slane %v1254_v48, %v17286_v19  ;;  %v735_v56 = vld [vmem:[%s17262_s24 + $0xc60] sm:$0x3]  ;;  %v354_v59 = vld [vmem:[%s17262_s24 + $0x78] sm:$0xff]  ;;  %v1269_v60 = vcombine.high %v1261_v53, %v1261_v53  ;;  %v353_v0 = vld [vmem:[%s17262_s24 + $0x70] sm:$0xff]  ;;  %p17025_p4 = pnand %p17024_p11, %p17018_p9 }
  0x73   : > { %3283 = vmatprep.mubr.f32.mxu0 %v1218_v26  ;;  %3353 = vmatprep.mubr.f32.mxu1 %v1219_v27  ;;  %v1271_v62 = vcombine.high %v247_v55, %v247_v55  ;;  %v351_v63 = vld [vmem:[%s17262_s24 + $0x60] sm:$0xff]  ;;  %v740_v1 = vld [vmem:[%s17262_s24 + $0xc88] sm:$0x3]  ;;  %v742_v2 = vld [vmem:[%s17262_s24 + $0xc98] sm:$0x3]  ;;  %v1278_v3 = vrot.slane %v247_v55, %v17286_v19 }
  0x74   : > { %3284 = vmatmul.mubr.f32.vlgmr.msra.gmra.mxu0 %v1210_v21  ;;  %3354 = vmatmul.mubr.f32.vlgmr.msra.gmra.mxu1 %v1217_v22  ;;  %v1270_v61 = vcombine.high %v1268_v54, %v1268_v54  ;;  %v248_v5 = vld [vmem:[%s17255_s29 + $0x28] sm:$0xff]  ;;  %v739_v6 = vld [vmem:[%s17262_s24 + $0xc80] sm:$0x3]  ;;  %v741_v7 = vld [vmem:[%s17262_s24 + $0xc90] sm:$0x3] }
  0x75   : > { %3388 = vmatpush1.xpose.msra.mxu0 %v727_v28  ;;  %3458 = vmatpush1.xpose.msra.mxu1 %v729_v29  ;;  %v1285_v4 = vrot.slane %v1271_v62, %v17286_v19  ;;  %v356_v8 = vld [vmem:[%s17262_s24 + $0x88] sm:$0xff]  ;;  %v358_v9 = vld [vmem:[%s17262_s24 + $0x98] sm:$0xff]  ;;  %v1286_v10 = vcombine.high %v1278_v3, %v1278_v3  ;;  %v1288_v12 = vcombine.high %v248_v5, %v248_v5  ;;  %v355_v13 = vld [vmem:[%s17262_s24 + $0x80] sm:$0xff] }
  0x76   : > { %3389 = vmatprep.subr.mxu0 %v344_v30  ;;  %3459 = vmatprep.subr.mxu1 %v346_v31  ;;  %v357_v14 = vld [vmem:[%s17262_s24 + $0x90] sm:$0xff]  ;;  %v744_v15 = vld [vmem:[%s17262_s24 + $0xca8] sm:$0x3]  ;;  %v746_v16 = vld [vmem:[%s17262_s24 + $0xcb8] sm:$0x3]  ;;  %v1295_v17 = vrot.slane %v248_v5, %v17286_v19 }
  0x77   : > { %3423 = vmatprep.mubr.f32.mxu0 %v1235_v32  ;;  %3493 = vmatprep.mubr.f32.mxu1 %v1236_v33  ;;  %v1287_v11 = vcombine.high %v1285_v4, %v1285_v4  ;;  %v1302_v18 = vrot.slane %v1288_v12, %v17286_v19  ;;  %v249_v20 = vld [vmem:[%s17255_s29 + $0x30] sm:$0xff]  ;;  %v743_v21 = vld [vmem:[%s17262_s24 + $0xca0] sm:$0x3]  ;;  %v748_v30 = vld [vmem:[%s17262_s24 + $0xcc8] sm:$0x3] }
  0x78   : > { %v745_v22 = vld [vmem:[%s17262_s24 + $0xcb0] sm:$0x3]  ;;  %v1303_v25 = vcombine.high %v1295_v17, %v1295_v17  ;;  %v1305_v27 = vcombine.high %v249_v20, %v249_v20  ;;  %v359_v28 = vld [vmem:[%s17262_s24 + $0xa0] sm:$0xff]  ;;  %v750_v31 = vld [vmem:[%s17262_s24 + $0xcd8] sm:$0x3]  ;;  %v1312_v32 = vrot.slane %v249_v20, %v17286_v19 }
  0x79   : > { %3390 = vmatpush1.xpose.msra.mxu0 %v343_v35  ;;  %3460 = vmatpush1.xpose.msra.mxu1 %v345_v36  ;;  %v1304_v26 = vcombine.high %v1302_v18, %v1302_v18  ;;  %v361_v29 = vld [vmem:[%s17262_s24 + $0xb0] sm:$0xff]  ;;  %v250_v34 = vld [vmem:[%s17255_s29 + $0x38] sm:$0xff]  ;;  %v747_v35 = vld [vmem:[%s17262_s24 + $0xcc0] sm:$0x3] }
  0x7a   : > { %3527 = vmatprep.subr.mxu0 %v732_v37  ;;  %3597 = vmatprep.subr.mxu1 %v734_v38  ;;  %v1319_v33 = vrot.slane %v1305_v27, %v17286_v19  ;;  %v749_v36 = vld [vmem:[%s17262_s24 + $0xcd0] sm:$0x3]  ;;  %v364_v37 = vld [vmem:[%s17262_s24 + $0xc8] sm:$0xff]  ;;  %v366_v38 = vld [vmem:[%s17262_s24 + $0xd8] sm:$0xff]  ;;  %v1322_v41 = vcombine.high %v250_v34, %v250_v34 }
  0x7b   : > { %v251_v48 = vld [vmem:[%s17255_s29 + $0x40] sm:$0xff]  ;;  %v252_v62 = vld [vmem:[%s17255_s29 + $0x48] sm:$0xff]  ;;  %v253_v12 = vld [vmem:[%s17255_s29 + $0x50] sm:$0xff] }
  0x7c   : > { %3424 = vmatmul.mubr.f32.vlgmr.msra.gmra.mxu0 %v1227_v23  ;;  %3494 = vmatmul.mubr.f32.vlgmr.msra.gmra.mxu1 %v1234_v24  ;;  %v360_v23 = vld [vmem:[%s17262_s24 + $0xa8] sm:$0xff]  ;;  %v362_v24 = vld [vmem:[%s17262_s24 + $0xb8] sm:$0xff]  ;;  %v1339_v55 = vcombine.high %v251_v48, %v251_v48  ;;  %v1356_v5 = vcombine.high %v252_v62, %v252_v62  ;;  %v1373_v20 = vcombine.high %v253_v12, %v253_v12 }
  0x7d   : > { %3528 = vmatpush1.xpose.msra.mxu0 %v731_v42  ;;  %3598 = vmatpush1.xpose.msra.mxu1 %v733_v43  ;;  %v363_v42 = vld [vmem:[%s17262_s24 + $0xc0] sm:$0xff]  ;;  %v365_v43 = vld [vmem:[%s17262_s24 + $0xd0] sm:$0xff]  ;;  %v254_v27 = vld [vmem:[%s17255_s29 + $0x58] sm:$0xff] }
  0x7e   : > { %3529 = vmatprep.subr.mxu0 %v348_v44  ;;  %3599 = vmatprep.subr.mxu1 %v350_v45  ;;  %v752_v44 = vld [vmem:[%s17262_s24 + $0xce8] sm:$0x3]  ;;  %v754_v45 = vld [vmem:[%s17262_s24 + $0xcf8] sm:$0x3] }
  0x7f   : > { %3563 = vmatprep.mubr.f32.mxu0 %v1252_v46  ;;  %3633 = vmatprep.mubr.f32.mxu1 %v1253_v47  ;;  %v1329_v46 = vrot.slane %v250_v34, %v17286_v19  ;;  %v1336_v47 = vrot.slane %v1322_v41, %v17286_v19  ;;  %v1390_v34 = vcombine.high %v254_v27, %v254_v27  ;;  %v255_v41 = vld [vmem:[%s17255_s29 + $0x60] sm:$0xff] }
  0x81   : > { %3530 = vmatpush1.xpose.msra.mxu0 %v347_v49  ;;  %3600 = vmatpush1.xpose.msra.mxu1 %v349_v50  ;;  %v751_v49 = vld [vmem:[%s17262_s24 + $0xce0] sm:$0x3]  ;;  %v753_v50 = vld [vmem:[%s17262_s24 + $0xcf0] sm:$0x3] }
  0x82   : > { %3667 = vmatprep.subr.mxu0 %v736_v51  ;;  %3737 = vmatprep.subr.mxu1 %v738_v52  ;;  %v368_v51 = vld [vmem:[%s17262_s24 + $0xe8] sm:$0xff]  ;;  %v370_v52 = vld [vmem:[%s17262_s24 + $0xf8] sm:$0xff] }
  0x84   : > { %3564 = vmatmul.mubr.f32.vlgmr.msra.gmra.mxu0 %v1244_v39  ;;  %3634 = vmatmul.mubr.f32.vlgmr.msra.gmra.mxu1 %v1251_v40  ;;  %v1320_v39 = vcombine.high %v1312_v32, %v1312_v32  ;;  %v1321_v40 = vcombine.high %v1319_v33, %v1319_v33 }
  0x85   : > { %3668 = vmatpush1.xpose.msra.mxu0 %v735_v56  ;;  %3738 = vmatpush1.xpose.msra.mxu1 %v737_v57  ;;  %v367_v56 = vld [vmem:[%s17262_s24 + $0xe0] sm:$0xff]  ;;  %v369_v57 = vld [vmem:[%s17262_s24 + $0xf0] sm:$0xff] }
  0x86   : > { %3669 = vmatprep.subr.mxu0 %v352_v58  ;;  %3739 = vmatprep.subr.mxu1 %v354_v59  ;;  %v756_v58 = vld [vmem:[%s17262_s24 + $0xd08] sm:$0x3]  ;;  %v758_v59 = vld [vmem:[%s17262_s24 + $0xd18] sm:$0x3] }
  0x87   : > { %3703 = vmatprep.mubr.f32.mxu0 %v1269_v60  ;;  %3773 = vmatprep.mubr.f32.mxu1 %v1270_v61  ;;  %v1346_v60 = vrot.slane %v251_v48, %v17286_v19  ;;  %v1353_v61 = vrot.slane %v1339_v55, %v17286_v19  ;;  %v1407_v48 = vcombine.high %v255_v41, %v255_v41  ;;  %v256_v55 = vld [vmem:[%s17255_s29 + $0x68] sm:$0xff] }
  0x89   : > { %3670 = vmatpush1.xpose.msra.mxu0 %v351_v63  ;;  %3740 = vmatpush1.xpose.msra.mxu1 %v353_v0  ;;  %v755_v63 = vld [vmem:[%s17262_s24 + $0xd00] sm:$0x3]  ;;  %v757_v0 = vld [vmem:[%s17262_s24 + $0xd10] sm:$0x3] }
  0x8a   : > { %3807 = vmatprep.subr.mxu0 %v740_v1  ;;  %3877 = vmatprep.subr.mxu1 %v742_v2  ;;  %v372_v1 = vld [vmem:[%s17262_s24 + $0x108] sm:$0xff]  ;;  %v374_v2 = vld [vmem:[%s17262_s24 + $0x118] sm:$0xff] }
  0x8c   : > { %3704 = vmatmul.mubr.f32.vlgmr.msra.gmra.mxu0 %v1261_v53  ;;  %3774 = vmatmul.mubr.f32.vlgmr.msra.gmra.mxu1 %v1268_v54  ;;  %v1337_v53 = vcombine.high %v1329_v46, %v1329_v46  ;;  %v1338_v54 = vcombine.high %v1336_v47, %v1336_v47 }
  0x8d   : > { %3808 = vmatpush1.xpose.msra.mxu0 %v739_v6  ;;  %3878 = vmatpush1.xpose.msra.mxu1 %v741_v7  ;;  %v371_v6 = vld [vmem:[%s17262_s24 + $0x100] sm:$0xff]  ;;  %v373_v7 = vld [vmem:[%s17262_s24 + $0x110] sm:$0xff] }
  0x8e   : > { %3809 = vmatprep.subr.mxu0 %v356_v8  ;;  %3879 = vmatprep.subr.mxu1 %v358_v9  ;;  %v760_v8 = vld [vmem:[%s17262_s24 + $0xd28] sm:$0x3]  ;;  %v762_v9 = vld [vmem:[%s17262_s24 + $0xd38] sm:$0x3] }
  0x8f   : > { %3843 = vmatprep.mubr.f32.mxu0 %v1286_v10  ;;  %3913 = vmatprep.mubr.f32.mxu1 %v1287_v11  ;;  %v1363_v10 = vrot.slane %v252_v62, %v17286_v19  ;;  %v1370_v11 = vrot.slane %v1356_v5, %v17286_v19  ;;  %v1424_v62 = vcombine.high %v256_v55, %v256_v55  ;;  %v257_v5 = vld [vmem:[%s17255_s29 + $0x70] sm:$0xff] }
  0x91   : > { %3810 = vmatpush1.xpose.msra.mxu0 %v355_v13  ;;  %3880 = vmatpush1.xpose.msra.mxu1 %v357_v14  ;;  %v759_v13 = vld [vmem:[%s17262_s24 + $0xd20] sm:$0x3]  ;;  %v761_v14 = vld [vmem:[%s17262_s24 + $0xd30] sm:$0x3] }
  0x92   : > { %3947 = vmatprep.subr.mxu0 %v744_v15  ;;  %4017 = vmatprep.subr.mxu1 %v746_v16  ;;  %v376_v15 = vld [vmem:[%s17262_s24 + $0x128] sm:$0xff]  ;;  %v378_v16 = vld [vmem:[%s17262_s24 + $0x138] sm:$0xff] }
  0x94   : > { %3844 = vmatmul.mubr.f32.vlgmr.msra.gmra.mxu0 %v1278_v3  ;;  %3914 = vmatmul.mubr.f32.vlgmr.msra.gmra.mxu1 %v1285_v4  ;;  %v1354_v3 = vcombine.high %v1346_v60, %v1346_v60  ;;  %v1355_v4 = vcombine.high %v1353_v61, %v1353_v61 }
  0x95   : > { %3948 = vmatpush1.xpose.msra.mxu0 %v743_v21  ;;  %4018 = vmatpush1.xpose.msra.mxu1 %v745_v22  ;;  %v375_v21 = vld [vmem:[%s17262_s24 + $0x120] sm:$0xff]  ;;  %v377_v22 = vld [vmem:[%s17262_s24 + $0x130] sm:$0xff] }
  0x96   : > { %3949 = vmatprep.subr.mxu0 %v360_v23  ;;  %4019 = vmatprep.subr.mxu1 %v362_v24  ;;  %v764_v23 = vld [vmem:[%s17262_s24 + $0xd48] sm:$0x3]  ;;  %v766_v24 = vld [vmem:[%s17262_s24 + $0xd58] sm:$0x3] }
  0x97   : > { %3983 = vmatprep.mubr.f32.mxu0 %v1303_v25  ;;  %4053 = vmatprep.mubr.f32.mxu1 %v1304_v26  ;;  %v1380_v25 = vrot.slane %v253_v12, %v17286_v19  ;;  %v1387_v26 = vrot.slane %v1373_v20, %v17286_v19  ;;  %v1441_v12 = vcombine.high %v257_v5, %v257_v5  ;;  %v258_v20 = vld [vmem:[%s17255_s29 + $0x78] sm:$0xff] }
  0x99   : > { %3950 = vmatpush1.xpose.msra.mxu0 %v359_v28  ;;  %4020 = vmatpush1.xpose.msra.mxu1 %v361_v29  ;;  %v763_v28 = vld [vmem:[%s17262_s24 + $0xd40] sm:$0x3]  ;;  %v765_v29 = vld [vmem:[%s17262_s24 + $0xd50] sm:$0x3] }
  0x9a   : > { %4087 = vmatprep.subr.mxu0 %v748_v30  ;;  %4157 = vmatprep.subr.mxu1 %v750_v31  ;;  %v380_v30 = vld [vmem:[%s17262_s24 + $0x148] sm:$0xff]  ;;  %v382_v31 = vld [vmem:[%s17262_s24 + $0x158] sm:$0xff] }
  0x9c   : > { %3984 = vmatmul.mubr.f32.vlgmr.msra.gmra.mxu0 %v1295_v17  ;;  %4054 = vmatmul.mubr.f32.vlgmr.msra.gmra.mxu1 %v1302_v18  ;;  %v1371_v17 = vcombine.high %v1363_v10, %v1363_v10  ;;  %v1372_v18 = vcombine.high %v1370_v11, %v1370_v11 }
  0x9d   : > { %4088 = vmatpush1.xpose.msra.mxu0 %v747_v35  ;;  %4158 = vmatpush1.xpose.msra.mxu1 %v749_v36  ;;  %v379_v35 = vld [vmem:[%s17262_s24 + $0x140] sm:$0xff]  ;;  %v381_v36 = vld [vmem:[%s17262_s24 + $0x150] sm:$0xff] }
  0x9e   : > { %4089 = vmatprep.subr.mxu0 %v364_v37  ;;  %4159 = vmatprep.subr.mxu1 %v366_v38  ;;  %v768_v37 = vld [vmem:[%s17262_s24 + $0xd68] sm:$0x3]  ;;  %v770_v38 = vld [vmem:[%s17262_s24 + $0xd78] sm:$0x3] }
  0x9f   : > { %4123 = vmatprep.mubr.f32.mxu0 %v1320_v39  ;;  %4193 = vmatprep.mubr.f32.mxu1 %v1321_v40  ;;  %v1397_v39 = vrot.slane %v254_v27, %v17286_v19  ;;  %v1404_v40 = vrot.slane %v1390_v34, %v17286_v19  ;;  %v1458_v27 = vcombine.high %v258_v20, %v258_v20  ;;  %v259_v34 = vld [vmem:[%s17255_s29 + $0x80] sm:$0xff] }
  0xa1   : > { %4090 = vmatpush1.xpose.msra.mxu0 %v363_v42  ;;  %4160 = vmatpush1.xpose.msra.mxu1 %v365_v43  ;;  %v767_v42 = vld [vmem:[%s17262_s24 + $0xd60] sm:$0x3]  ;;  %v769_v43 = vld [vmem:[%s17262_s24 + $0xd70] sm:$0x3] }
  0xa2   : > { %4227 = vmatprep.subr.mxu0 %v752_v44  ;;  %4297 = vmatprep.subr.mxu1 %v754_v45  ;;  %v384_v44 = vld [vmem:[%s17262_s24 + $0x168] sm:$0xff]  ;;  %v386_v45 = vld [vmem:[%s17262_s24 + $0x178] sm:$0xff] }
  0xa4   : > { %4124 = vmatmul.mubr.f32.vlgmr.msra.gmra.mxu0 %v1312_v32  ;;  %4194 = vmatmul.mubr.f32.vlgmr.msra.gmra.mxu1 %v1319_v33  ;;  %v1388_v32 = vcombine.high %v1380_v25, %v1380_v25  ;;  %v1389_v33 = vcombine.high %v1387_v26, %v1387_v26 }
  0xa5   : > { %4228 = vmatpush1.xpose.msra.mxu0 %v751_v49  ;;  %4298 = vmatpush1.xpose.msra.mxu1 %v753_v50  ;;  %v383_v49 = vld [vmem:[%s17262_s24 + $0x160] sm:$0xff]  ;;  %v385_v50 = vld [vmem:[%s17262_s24 + $0x170] sm:$0xff] }
  0xa6   : > { %4229 = vmatprep.subr.mxu0 %v368_v51  ;;  %4299 = vmatprep.subr.mxu1 %v370_v52  ;;  %v772_v51 = vld [vmem:[%s17262_s24 + $0xd88] sm:$0x3]  ;;  %v774_v52 = vld [vmem:[%s17262_s24 + $0xd98] sm:$0x3] }
  0xa7   : > { %4263 = vmatprep.mubr.f32.mxu0 %v1337_v53  ;;  %4333 = vmatprep.mubr.f32.mxu1 %v1338_v54  ;;  %v1414_v53 = vrot.slane %v255_v41, %v17286_v19  ;;  %v1421_v54 = vrot.slane %v1407_v48, %v17286_v19  ;;  %v1475_v41 = vcombine.high %v259_v34, %v259_v34  ;;  %v260_v48 = vld [vmem:[%s17255_s29 + $0x88] sm:$0xff] }
  0xa9   : > { %4230 = vmatpush1.xpose.msra.mxu0 %v367_v56  ;;  %4300 = vmatpush1.xpose.msra.mxu1 %v369_v57  ;;  %v771_v56 = vld [vmem:[%s17262_s24 + $0xd80] sm:$0x3]  ;;  %v773_v57 = vld [vmem:[%s17262_s24 + $0xd90] sm:$0x3] }
  0xaa   : > { %4367 = vmatprep.subr.mxu0 %v756_v58  ;;  %4437 = vmatprep.subr.mxu1 %v758_v59  ;;  %v388_v58 = vld [vmem:[%s17262_s24 + $0x188] sm:$0xff]  ;;  %v390_v59 = vld [vmem:[%s17262_s24 + $0x198] sm:$0xff] }
  0xac   : > { %4264 = vmatmul.mubr.f32.vlgmr.msra.gmra.mxu0 %v1329_v46  ;;  %4334 = vmatmul.mubr.f32.vlgmr.msra.gmra.mxu1 %v1336_v47  ;;  %v1405_v46 = vcombine.high %v1397_v39, %v1397_v39  ;;  %v1406_v47 = vcombine.high %v1404_v40, %v1404_v40 }
  0xad   : > { %4368 = vmatpush1.xpose.msra.mxu0 %v755_v63  ;;  %4438 = vmatpush1.xpose.msra.mxu1 %v757_v0  ;;  %v387_v63 = vld [vmem:[%s17262_s24 + $0x180] sm:$0xff]  ;;  %v389_v0 = vld [vmem:[%s17262_s24 + $0x190] sm:$0xff] }
  0xae   : > { %4369 = vmatprep.subr.mxu0 %v372_v1  ;;  %4439 = vmatprep.subr.mxu1 %v374_v2  ;;  %v776_v1 = vld [vmem:[%s17262_s24 + $0xda8] sm:$0x3]  ;;  %v778_v2 = vld [vmem:[%s17262_s24 + $0xdb8] sm:$0x3] }
  0xaf   : > { %4403 = vmatprep.mubr.f32.mxu0 %v1354_v3  ;;  %4473 = vmatprep.mubr.f32.mxu1 %v1355_v4  ;;  %v1431_v3 = vrot.slane %v256_v55, %v17286_v19  ;;  %v1438_v4 = vrot.slane %v1424_v62, %v17286_v19  ;;  %v1492_v55 = vcombine.high %v260_v48, %v260_v48  ;;  %v261_v62 = vld [vmem:[%s17255_s29 + $0x90] sm:$0xff] }
  0xb1   : > { %4370 = vmatpush1.xpose.msra.mxu0 %v371_v6  ;;  %4440 = vmatpush1.xpose.msra.mxu1 %v373_v7  ;;  %v775_v6 = vld [vmem:[%s17262_s24 + $0xda0] sm:$0x3]  ;;  %v777_v7 = vld [vmem:[%s17262_s24 + $0xdb0] sm:$0x3] }
  0xb2   : > { %4507 = vmatprep.subr.mxu0 %v760_v8  ;;  %4577 = vmatprep.subr.mxu1 %v762_v9  ;;  %v392_v8 = vld [vmem:[%s17262_s24 + $0x1a8] sm:$0xff]  ;;  %v394_v9 = vld [vmem:[%s17262_s24 + $0x1b8] sm:$0xff] }
  0xb4   : > { %4404 = vmatmul.mubr.f32.vlgmr.msra.gmra.mxu0 %v1346_v60  ;;  %4474 = vmatmul.mubr.f32.vlgmr.msra.gmra.mxu1 %v1353_v61  ;;  %v1422_v60 = vcombine.high %v1414_v53, %v1414_v53  ;;  %v1423_v61 = vcombine.high %v1421_v54, %v1421_v54 }
  0xb5   : > { %4508 = vmatpush1.xpose.msra.mxu0 %v759_v13  ;;  %4578 = vmatpush1.xpose.msra.mxu1 %v761_v14  ;;  %v391_v13 = vld [vmem:[%s17262_s24 + $0x1a0] sm:$0xff]  ;;  %v393_v14 = vld [vmem:[%s17262_s24 + $0x1b0] sm:$0xff] }
  0xb6   : > { %4509 = vmatprep.subr.mxu0 %v376_v15  ;;  %4579 = vmatprep.subr.mxu1 %v378_v16  ;;  %v780_v15 = vld [vmem:[%s17262_s24 + $0xdc8] sm:$0x3]  ;;  %v782_v16 = vld [vmem:[%s17262_s24 + $0xdd8] sm:$0x3] }
  0xb7   : > { %4543 = vmatprep.mubr.f32.mxu0 %v1371_v17  ;;  %4613 = vmatprep.mubr.f32.mxu1 %v1372_v18  ;;  %v1448_v17 = vrot.slane %v257_v5, %v17286_v19  ;;  %v1455_v18 = vrot.slane %v1441_v12, %v17286_v19  ;;  %v1509_v5 = vcombine.high %v261_v62, %v261_v62  ;;  %v262_v12 = vld [vmem:[%s17255_s29 + $0x98] sm:$0xff] }
  0xb9   : > { %4510 = vmatpush1.xpose.msra.mxu0 %v375_v21  ;;  %4580 = vmatpush1.xpose.msra.mxu1 %v377_v22  ;;  %v779_v21 = vld [vmem:[%s17262_s24 + $0xdc0] sm:$0x3]  ;;  %v781_v22 = vld [vmem:[%s17262_s24 + $0xdd0] sm:$0x3] }
  0xba   : > { %4647 = vmatprep.subr.mxu0 %v764_v23  ;;  %4717 = vmatprep.subr.mxu1 %v766_v24  ;;  %v396_v23 = vld [vmem:[%s17262_s24 + $0x1c8] sm:$0xff]  ;;  %v398_v24 = vld [vmem:[%s17262_s24 + $0x1d8] sm:$0xff] }
  0xbc   : > { %4544 = vmatmul.mubr.f32.vlgmr.msra.gmra.mxu0 %v1363_v10  ;;  %4614 = vmatmul.mubr.f32.vlgmr.msra.gmra.mxu1 %v1370_v11  ;;  %v1439_v10 = vcombine.high %v1431_v3, %v1431_v3  ;;  %v1440_v11 = vcombine.high %v1438_v4, %v1438_v4 }
  0xbd   : > { %4648 = vmatpush1.xpose.msra.mxu0 %v763_v28  ;;  %4718 = vmatpush1.xpose.msra.mxu1 %v765_v29  ;;  %v395_v28 = vld [vmem:[%s17262_s24 + $0x1c0] sm:$0xff]  ;;  %v397_v29 = vld [vmem:[%s17262_s24 + $0x1d0] sm:$0xff] }
  0xbe   : > { %4649 = vmatprep.subr.mxu0 %v380_v30  ;;  %4719 = vmatprep.subr.mxu1 %v382_v31  ;;  %v784_v30 = vld [vmem:[%s17262_s24 + $0xde8] sm:$0x3]  ;;  %v786_v31 = vld [vmem:[%s17262_s24 + $0xdf8] sm:$0x3] }
  0xbf   : > { %4683 = vmatprep.mubr.f32.mxu0 %v1388_v32  ;;  %4753 = vmatprep.mubr.f32.mxu1 %v1389_v33  ;;  %v1465_v32 = vrot.slane %v258_v20, %v17286_v19  ;;  %v1472_v33 = vrot.slane %v1458_v27, %v17286_v19  ;;  %v1526_v20 = vcombine.high %v262_v12, %v262_v12  ;;  %v263_v27 = vld [vmem:[%s17255_s29 + $0xa0] sm:$0xff] }
  0xc1   : > { %4650 = vmatpush1.xpose.msra.mxu0 %v379_v35  ;;  %4720 = vmatpush1.xpose.msra.mxu1 %v381_v36  ;;  %v783_v35 = vld [vmem:[%s17262_s24 + $0xde0] sm:$0x3]  ;;  %v785_v36 = vld [vmem:[%s17262_s24 + $0xdf0] sm:$0x3] }
  0xc2   : > { %4787 = vmatprep.subr.mxu0 %v768_v37  ;;  %4857 = vmatprep.subr.mxu1 %v770_v38  ;;  %v400_v37 = vld [vmem:[%s17262_s24 + $0x1e8] sm:$0xff]  ;;  %v402_v38 = vld [vmem:[%s17262_s24 + $0x1f8] sm:$0xff] }
  0xc4   : > { %4684 = vmatmul.mubr.f32.vlgmr.msra.gmra.mxu0 %v1380_v25  ;;  %4754 = vmatmul.mubr.f32.vlgmr.msra.gmra.mxu1 %v1387_v26  ;;  %v1456_v25 = vcombine.high %v1448_v17, %v1448_v17  ;;  %v1457_v26 = vcombine.high %v1455_v18, %v1455_v18 }
  0xc5   : > { %4788 = vmatpush1.xpose.msra.mxu0 %v767_v42  ;;  %4858 = vmatpush1.xpose.msra.mxu1 %v769_v43  ;;  %v399_v42 = vld [vmem:[%s17262_s24 + $0x1e0] sm:$0xff]  ;;  %v401_v43 = vld [vmem:[%s17262_s24 + $0x1f0] sm:$0xff] }
  0xc6   : > { %4789 = vmatprep.subr.mxu0 %v384_v44  ;;  %4859 = vmatprep.subr.mxu1 %v386_v45  ;;  %v788_v44 = vld [vmem:[%s17262_s24 + $0xe08] sm:$0x3]  ;;  %v790_v45 = vld [vmem:[%s17262_s24 + $0xe18] sm:$0x3] }
  0xc7   : > { %4823 = vmatprep.mubr.f32.mxu0 %v1405_v46  ;;  %4893 = vmatprep.mubr.f32.mxu1 %v1406_v47  ;;  %v1482_v46 = vrot.slane %v259_v34, %v17286_v19  ;;  %v1489_v47 = vrot.slane %v1475_v41, %v17286_v19  ;;  %v1543_v34 = vcombine.high %v263_v27, %v263_v27  ;;  %v264_v41 = vld [vmem:[%s17255_s29 + $0xa8] sm:$0xff] }
  0xc9   : > { %4790 = vmatpush1.xpose.msra.mxu0 %v383_v49  ;;  %4860 = vmatpush1.xpose.msra.mxu1 %v385_v50  ;;  %v787_v49 = vld [vmem:[%s17262_s24 + $0xe00] sm:$0x3]  ;;  %v789_v50 = vld [vmem:[%s17262_s24 + $0xe10] sm:$0x3] }
  0xca   : > { %4927 = vmatprep.subr.mxu0 %v772_v51  ;;  %4997 = vmatprep.subr.mxu1 %v774_v52  ;;  %v404_v51 = vld [vmem:[%s17262_s24 + $0x208] sm:$0xff]  ;;  %v406_v52 = vld [vmem:[%s17262_s24 + $0x218] sm:$0xff] }
  0xcc   : > { %4824 = vmatmul.mubr.f32.vlgmr.msra.gmra.mxu0 %v1397_v39  ;;  %4894 = vmatmul.mubr.f32.vlgmr.msra.gmra.mxu1 %v1404_v40  ;;  %v1473_v39 = vcombine.high %v1465_v32, %v1465_v32  ;;  %v1474_v40 = vcombine.high %v1472_v33, %v1472_v33 }
  0xcd   : > { %4928 = vmatpush1.xpose.msra.mxu0 %v771_v56  ;;  %4998 = vmatpush1.xpose.msra.mxu1 %v773_v57  ;;  %v403_v56 = vld [vmem:[%s17262_s24 + $0x200] sm:$0xff]  ;;  %v405_v57 = vld [vmem:[%s17262_s24 + $0x210] sm:$0xff] }
  0xce   : > { %4929 = vmatprep.subr.mxu0 %v388_v58  ;;  %4999 = vmatprep.subr.mxu1 %v390_v59  ;;  %v792_v58 = vld [vmem:[%s17262_s24 + $0xe28] sm:$0x3]  ;;  %v794_v59 = vld [vmem:[%s17262_s24 + $0xe38] sm:$0x3] }
  0xcf   : > { %4963 = vmatprep.mubr.f32.mxu0 %v1422_v60  ;;  %5033 = vmatprep.mubr.f32.mxu1 %v1423_v61  ;;  %v1499_v60 = vrot.slane %v260_v48, %v17286_v19  ;;  %v1506_v61 = vrot.slane %v1492_v55, %v17286_v19  ;;  %v1560_v48 = vcombine.high %v264_v41, %v264_v41  ;;  %v265_v55 = vld [vmem:[%s17255_s29 + $0xb0] sm:$0xff] }
  0xd1   : > { %4930 = vmatpush1.xpose.msra.mxu0 %v387_v63  ;;  %5000 = vmatpush1.xpose.msra.mxu1 %v389_v0  ;;  %v791_v63 = vld [vmem:[%s17262_s24 + $0xe20] sm:$0x3]  ;;  %v793_v0 = vld [vmem:[%s17262_s24 + $0xe30] sm:$0x3] }
  0xd2   : > { %5067 = vmatprep.subr.mxu0 %v776_v1  ;;  %5137 = vmatprep.subr.mxu1 %v778_v2  ;;  %v408_v1 = vld [vmem:[%s17262_s24 + $0x228] sm:$0xff]  ;;  %v410_v2 = vld [vmem:[%s17262_s24 + $0x238] sm:$0xff] }
  0xd4   : > { %4964 = vmatmul.mubr.f32.vlgmr.msra.gmra.mxu0 %v1414_v53  ;;  %5034 = vmatmul.mubr.f32.vlgmr.msra.gmra.mxu1 %v1421_v54  ;;  %v1490_v53 = vcombine.high %v1482_v46, %v1482_v46  ;;  %v1491_v54 = vcombine.high %v1489_v47, %v1489_v47 }
  0xd5   : > { %5068 = vmatpush1.xpose.msra.mxu0 %v775_v6  ;;  %5138 = vmatpush1.xpose.msra.mxu1 %v777_v7  ;;  %v407_v6 = vld [vmem:[%s17262_s24 + $0x220] sm:$0xff]  ;;  %v409_v7 = vld [vmem:[%s17262_s24 + $0x230] sm:$0xff] }
  0xd6   : > { %5069 = vmatprep.subr.mxu0 %v392_v8  ;;  %5139 = vmatprep.subr.mxu1 %v394_v9  ;;  %v796_v8 = vld [vmem:[%s17262_s24 + $0xe48] sm:$0x3]  ;;  %v798_v9 = vld [vmem:[%s17262_s24 + $0xe58] sm:$0x3] }
  0xd7   : > { %5103 = vmatprep.mubr.f32.mxu0 %v1439_v10  ;;  %5173 = vmatprep.mubr.f32.mxu1 %v1440_v11  ;;  %v1516_v10 = vrot.slane %v261_v62, %v17286_v19  ;;  %v1523_v11 = vrot.slane %v1509_v5, %v17286_v19  ;;  %v1577_v62 = vcombine.high %v265_v55, %v265_v55  ;;  %v266_v5 = vld [vmem:[%s17255_s29 + $0xb8] sm:$0xff] }
  0xd9   : > { %5070 = vmatpush1.xpose.msra.mxu0 %v391_v13  ;;  %5140 = vmatpush1.xpose.msra.mxu1 %v393_v14  ;;  %v795_v13 = vld [vmem:[%s17262_s24 + $0xe40] sm:$0x3]  ;;  %v797_v14 = vld [vmem:[%s17262_s24 + $0xe50] sm:$0x3] }
  0xda   : > { %5207 = vmatprep.subr.mxu0 %v780_v15  ;;  %5277 = vmatprep.subr.mxu1 %v782_v16  ;;  %v412_v15 = vld [vmem:[%s17262_s24 + $0x248] sm:$0xff]  ;;  %v414_v16 = vld [vmem:[%s17262_s24 + $0x258] sm:$0xff] }
  0xdc   : > { %5104 = vmatmul.mubr.f32.vlgmr.msra.gmra.mxu0 %v1431_v3  ;;  %5174 = vmatmul.mubr.f32.vlgmr.msra.gmra.mxu1 %v1438_v4  ;;  %v1507_v3 = vcombine.high %v1499_v60, %v1499_v60  ;;  %v1508_v4 = vcombine.high %v1506_v61, %v1506_v61 }
  0xdd   : > { %5208 = vmatpush1.xpose.msra.mxu0 %v779_v21  ;;  %5278 = vmatpush1.xpose.msra.mxu1 %v781_v22  ;;  %v411_v21 = vld [vmem:[%s17262_s24 + $0x240] sm:$0xff]  ;;  %v413_v22 = vld [vmem:[%s17262_s24 + $0x250] sm:$0xff] }
  0xde   : > { %5209 = vmatprep.subr.mxu0 %v396_v23  ;;  %5279 = vmatprep.subr.mxu1 %v398_v24  ;;  %v800_v23 = vld [vmem:[%s17262_s24 + $0xe68] sm:$0x3]  ;;  %v802_v24 = vld [vmem:[%s17262_s24 + $0xe78] sm:$0x3] }
  0xdf   : > { %5243 = vmatprep.mubr.f32.mxu0 %v1456_v25  ;;  %5313 = vmatprep.mubr.f32.mxu1 %v1457_v26  ;;  %v1533_v25 = vrot.slane %v262_v12, %v17286_v19  ;;  %v1540_v26 = vrot.slane %v1526_v20, %v17286_v19  ;;  %v1594_v12 = vcombine.high %v266_v5, %v266_v5  ;;  %v267_v20 = vld [vmem:[%s17255_s29 + $0xc0] sm:$0xff] }
  0xe1   : > { %5210 = vmatpush1.xpose.msra.mxu0 %v395_v28  ;;  %5280 = vmatpush1.xpose.msra.mxu1 %v397_v29  ;;  %v799_v28 = vld [vmem:[%s17262_s24 + $0xe60] sm:$0x3]  ;;  %v801_v29 = vld [vmem:[%s17262_s24 + $0xe70] sm:$0x3] }
  0xe2   : > { %5347 = vmatprep.subr.mxu0 %v784_v30  ;;  %5417 = vmatprep.subr.mxu1 %v786_v31  ;;  %v416_v30 = vld [vmem:[%s17262_s24 + $0x268] sm:$0xff]  ;;  %v418_v31 = vld [vmem:[%s17262_s24 + $0x278] sm:$0xff] }
  0xe4   : > { %5244 = vmatmul.mubr.f32.vlgmr.msra.gmra.mxu0 %v1448_v17  ;;  %5314 = vmatmul.mubr.f32.vlgmr.msra.gmra.mxu1 %v1455_v18  ;;  %v1524_v17 = vcombine.high %v1516_v10, %v1516_v10  ;;  %v1525_v18 = vcombine.high %v1523_v11, %v1523_v11 }
  0xe5   : > { %5348 = vmatpush1.xpose.msra.mxu0 %v783_v35  ;;  %5418 = vmatpush1.xpose.msra.mxu1 %v785_v36  ;;  %v415_v35 = vld [vmem:[%s17262_s24 + $0x260] sm:$0xff]  ;;  %v417_v36 = vld [vmem:[%s17262_s24 + $0x270] sm:$0xff] }
  0xe6   : > { %5349 = vmatprep.subr.mxu0 %v400_v37  ;;  %5419 = vmatprep.subr.mxu1 %v402_v38  ;;  %v804_v37 = vld [vmem:[%s17262_s24 + $0xe88] sm:$0x3]  ;;  %v806_v38 = vld [vmem:[%s17262_s24 + $0xe98] sm:$0x3] }
  0xe7   : > { %5383 = vmatprep.mubr.f32.mxu0 %v1473_v39  ;;  %5453 = vmatprep.mubr.f32.mxu1 %v1474_v40  ;;  %v1550_v39 = vrot.slane %v263_v27, %v17286_v19  ;;  %v1557_v40 = vrot.slane %v1543_v34, %v17286_v19  ;;  %v1611_v27 = vcombine.high %v267_v20, %v267_v20  ;;  %v268_v34 = vld [vmem:[%s17255_s29 + $0xc8] sm:$0xff] }
  0xe9   : > { %5350 = vmatpush1.xpose.msra.mxu0 %v399_v42  ;;  %5420 = vmatpush1.xpose.msra.mxu1 %v401_v43  ;;  %v803_v42 = vld [vmem:[%s17262_s24 + $0xe80] sm:$0x3]  ;;  %v805_v43 = vld [vmem:[%s17262_s24 + $0xe90] sm:$0x3] }
  0xea   : > { %5487 = vmatprep.subr.mxu0 %v788_v44  ;;  %5557 = vmatprep.subr.mxu1 %v790_v45  ;;  %v420_v44 = vld [vmem:[%s17262_s24 + $0x288] sm:$0xff]  ;;  %v422_v45 = vld [vmem:[%s17262_s24 + $0x298] sm:$0xff] }
  0xec   : > { %5384 = vmatmul.mubr.f32.vlgmr.msra.gmra.mxu0 %v1465_v32  ;;  %5454 = vmatmul.mubr.f32.vlgmr.msra.gmra.mxu1 %v1472_v33  ;;  %v1541_v32 = vcombine.high %v1533_v25, %v1533_v25  ;;  %v1542_v33 = vcombine.high %v1540_v26, %v1540_v26 }
  0xed   : > { %5488 = vmatpush1.xpose.msra.mxu0 %v787_v49  ;;  %5558 = vmatpush1.xpose.msra.mxu1 %v789_v50  ;;  %v419_v49 = vld [vmem:[%s17262_s24 + $0x280] sm:$0xff]  ;;  %v421_v50 = vld [vmem:[%s17262_s24 + $0x290] sm:$0xff] }
  0xee   : > { %5489 = vmatprep.subr.mxu0 %v404_v51  ;;  %5559 = vmatprep.subr.mxu1 %v406_v52  ;;  %v808_v51 = vld [vmem:[%s17262_s24 + $0xea8] sm:$0x3]  ;;  %v810_v52 = vld [vmem:[%s17262_s24 + $0xeb8] sm:$0x3] }
  0xef   : > { %5523 = vmatprep.mubr.f32.mxu0 %v1490_v53  ;;  %5593 = vmatprep.mubr.f32.mxu1 %v1491_v54  ;;  %v1567_v53 = vrot.slane %v264_v41, %v17286_v19  ;;  %v1574_v54 = vrot.slane %v1560_v48, %v17286_v19  ;;  %v1628_v41 = vcombine.high %v268_v34, %v268_v34  ;;  %v269_v48 = vld [vmem:[%s17255_s29 + $0xd0] sm:$0xff] }
  0xf1   : > { %5490 = vmatpush1.xpose.msra.mxu0 %v403_v56  ;;  %5560 = vmatpush1.xpose.msra.mxu1 %v405_v57  ;;  %v807_v56 = vld [vmem:[%s17262_s24 + $0xea0] sm:$0x3]  ;;  %v809_v57 = vld [vmem:[%s17262_s24 + $0xeb0] sm:$0x3] }
  0xf2   : > { %5627 = vmatprep.subr.mxu0 %v792_v58  ;;  %5697 = vmatprep.subr.mxu1 %v794_v59  ;;  %v424_v58 = vld [vmem:[%s17262_s24 + $0x2a8] sm:$0xff]  ;;  %v426_v59 = vld [vmem:[%s17262_s24 + $0x2b8] sm:$0xff] }
  0xf4   : > { %5524 = vmatmul.mubr.f32.vlgmr.msra.gmra.mxu0 %v1482_v46  ;;  %5594 = vmatmul.mubr.f32.vlgmr.msra.gmra.mxu1 %v1489_v47  ;;  %v1558_v46 = vcombine.high %v1550_v39, %v1550_v39  ;;  %v1559_v47 = vcombine.high %v1557_v40, %v1557_v40 }
  0xf5   : > { %5628 = vmatpush1.xpose.msra.mxu0 %v791_v63  ;;  %5698 = vmatpush1.xpose.msra.mxu1 %v793_v0  ;;  %v423_v63 = vld [vmem:[%s17262_s24 + $0x2a0] sm:$0xff]  ;;  %v425_v0 = vld [vmem:[%s17262_s24 + $0x2b0] sm:$0xff] }
  0xf6   : > { %5629 = vmatprep.subr.mxu0 %v408_v1  ;;  %5699 = vmatprep.subr.mxu1 %v410_v2  ;;  %v812_v1 = vld [vmem:[%s17262_s24 + $0xec8] sm:$0x3]  ;;  %v814_v2 = vld [vmem:[%s17262_s24 + $0xed8] sm:$0x3] }
  0xf7   : > { %5663 = vmatprep.mubr.f32.mxu0 %v1507_v3  ;;  %5733 = vmatprep.mubr.f32.mxu1 %v1508_v4  ;;  %v1584_v3 = vrot.slane %v265_v55, %v17286_v19  ;;  %v1591_v4 = vrot.slane %v1577_v62, %v17286_v19  ;;  %v1645_v55 = vcombine.high %v269_v48, %v269_v48  ;;  %v441_v62 = vld [vmem:[%s17262_s24 + $0x330] sm:$0xff] }
  0xf9   : > { %5630 = vmatpush1.xpose.msra.mxu0 %v407_v6  ;;  %5700 = vmatpush1.xpose.msra.mxu1 %v409_v7  ;;  %v811_v6 = vld [vmem:[%s17262_s24 + $0xec0] sm:$0x3]  ;;  %v813_v7 = vld [vmem:[%s17262_s24 + $0xed0] sm:$0x3] }
  0xfa   : > { %5767 = vmatprep.subr.mxu0 %v796_v8  ;;  %5837 = vmatprep.subr.mxu1 %v798_v9  ;;  %v428_v8 = vld [vmem:[%s17262_s24 + $0x2c8] sm:$0xff]  ;;  %v430_v9 = vld [vmem:[%s17262_s24 + $0x2d8] sm:$0xff] }
  0xfc   : > { %5664 = vmatmul.mubr.f32.vlgmr.msra.gmra.mxu0 %v1499_v60  ;;  %5734 = vmatmul.mubr.f32.vlgmr.msra.gmra.mxu1 %v1506_v61  ;;  %v1575_v60 = vcombine.high %v1567_v53, %v1567_v53  ;;  %v1576_v61 = vcombine.high %v1574_v54, %v1574_v54 }
  0xfd   : > { %5768 = vmatpush1.xpose.msra.mxu0 %v795_v13  ;;  %5838 = vmatpush1.xpose.msra.mxu1 %v797_v14  ;;  %v427_v13 = vld [vmem:[%s17262_s24 + $0x2c0] sm:$0xff]  ;;  %v429_v14 = vld [vmem:[%s17262_s24 + $0x2d0] sm:$0xff] }
  0xfe   : > { %5769 = vmatprep.subr.mxu0 %v412_v15  ;;  %5839 = vmatprep.subr.mxu1 %v414_v16  ;;  %v816_v15 = vld [vmem:[%s17262_s24 + $0xee8] sm:$0x3]  ;;  %v818_v16 = vld [vmem:[%s17262_s24 + $0xef8] sm:$0x3] }
  0xff   : > { %5803 = vmatprep.mubr.f32.mxu0 %v1524_v17  ;;  %5873 = vmatprep.mubr.f32.mxu1 %v1525_v18  ;;  %v1601_v17 = vrot.slane %v266_v5, %v17286_v19  ;;  %v1608_v18 = vrot.slane %v1594_v12, %v17286_v19  ;;  %v829_v5 = vld [vmem:[%s17262_s24 + $0xf50] sm:$0x3] }
 0x101   : > { %5770 = vmatpush1.xpose.msra.mxu0 %v411_v21  ;;  %5840 = vmatpush1.xpose.msra.mxu1 %v413_v22  ;;  %v815_v21 = vld [vmem:[%s17262_s24 + $0xee0] sm:$0x3]  ;;  %v817_v22 = vld [vmem:[%s17262_s24 + $0xef0] sm:$0x3] }
 0x102   : > { %5907 = vmatprep.subr.mxu0 %v800_v23  ;;  %5977 = vmatprep.subr.mxu1 %v802_v24  ;;  %v432_v23 = vld [vmem:[%s17262_s24 + $0x2e8] sm:$0xff]  ;;  %v434_v24 = vld [vmem:[%s17262_s24 + $0x2f8] sm:$0xff] }
 0x104   : > { %5804 = vmatmul.mubr.f32.vlgmr.msra.gmra.mxu0 %v1516_v10  ;;  %5874 = vmatmul.mubr.f32.vlgmr.msra.gmra.mxu1 %v1523_v11  ;;  %v1592_v10 = vcombine.high %v1584_v3, %v1584_v3  ;;  %v1593_v11 = vcombine.high %v1591_v4, %v1591_v4 }
 0x105   : > { %5908 = vmatpush1.xpose.msra.mxu0 %v799_v28  ;;  %5978 = vmatpush1.xpose.msra.mxu1 %v801_v29  ;;  %v431_v28 = vld [vmem:[%s17262_s24 + $0x2e0] sm:$0xff]  ;;  %v433_v29 = vld [vmem:[%s17262_s24 + $0x2f0] sm:$0xff] }
 0x106   : > { %5909 = vmatprep.subr.mxu0 %v416_v30  ;;  %5979 = vmatprep.subr.mxu1 %v418_v31  ;;  %v820_v30 = vld [vmem:[%s17262_s24 + $0xf08] sm:$0x3]  ;;  %v822_v31 = vld [vmem:[%s17262_s24 + $0xf18] sm:$0x3] }
 0x107   : > { %5943 = vmatprep.mubr.f32.mxu0 %v1541_v32  ;;  %6013 = vmatprep.mubr.f32.mxu1 %v1542_v33  ;;  %v1618_v32 = vrot.slane %v267_v20, %v17286_v19  ;;  %v1625_v33 = vrot.slane %v1611_v27, %v17286_v19  ;;  %v832_v20 = vld [vmem:[%s17262_s24 + $0xf68] sm:$0x3] }
 0x108   : > { %v448_v27 = vld [vmem:[%s17262_s24 + $0x368] sm:$0xff] }
 0x109   : > { %5910 = vmatpush1.xpose.msra.mxu0 %v415_v35  ;;  %5980 = vmatpush1.xpose.msra.mxu1 %v417_v36  ;;  %v819_v35 = vld [vmem:[%s17262_s24 + $0xf00] sm:$0x3]  ;;  %v821_v36 = vld [vmem:[%s17262_s24 + $0xf10] sm:$0x3] }
 0x10a   : > { %6047 = vmatprep.subr.mxu0 %v804_v37  ;;  %6117 = vmatprep.subr.mxu1 %v806_v38  ;;  %v436_v37 = vld [vmem:[%s17262_s24 + $0x308] sm:$0xff]  ;;  %v438_v38 = vld [vmem:[%s17262_s24 + $0x318] sm:$0xff] }
 0x10c   : > { %5944 = vmatmul.mubr.f32.vlgmr.msra.gmra.mxu0 %v1533_v25  ;;  %6014 = vmatmul.mubr.f32.vlgmr.msra.gmra.mxu1 %v1540_v26  ;;  %v1609_v25 = vcombine.high %v1601_v17, %v1601_v17  ;;  %v1610_v26 = vcombine.high %v1608_v18, %v1608_v18 }
 0x10d   : > { %6048 = vmatpush1.xpose.msra.mxu0 %v803_v42  ;;  %6118 = vmatpush1.xpose.msra.mxu1 %v805_v43  ;;  %v435_v42 = vld [vmem:[%s17262_s24 + $0x300] sm:$0xff]  ;;  %v437_v43 = vld [vmem:[%s17262_s24 + $0x310] sm:$0xff] }
 0x10e   : > { %6049 = vmatprep.subr.mxu0 %v420_v44  ;;  %6119 = vmatprep.subr.mxu1 %v422_v45  ;;  %v824_v44 = vld [vmem:[%s17262_s24 + $0xf28] sm:$0x3]  ;;  %v826_v45 = vld [vmem:[%s17262_s24 + $0xf38] sm:$0x3] }
 0x10f   : > { %6083 = vmatprep.mubr.f32.mxu0 %v1558_v46  ;;  %6153 = vmatprep.mubr.f32.mxu1 %v1559_v47  ;;  %v1635_v46 = vrot.slane %v268_v34, %v17286_v19  ;;  %v1642_v47 = vrot.slane %v1628_v41, %v17286_v19  ;;  %v838_v41 = vld [vmem:[%s17262_s24 + $0xf98] sm:$0x3] }
 0x111   : > { %6050 = vmatpush1.xpose.msra.mxu0 %v419_v49  ;;  %6120 = vmatpush1.xpose.msra.mxu1 %v421_v50  ;;  %v823_v49 = vld [vmem:[%s17262_s24 + $0xf20] sm:$0x3]  ;;  %v825_v50 = vld [vmem:[%s17262_s24 + $0xf30] sm:$0x3] }
 0x112   : > { %6187 = vmatprep.subr.mxu0 %v808_v51  ;;  %6257 = vmatprep.subr.mxu1 %v810_v52  ;;  %v440_v51 = vld [vmem:[%s17262_s24 + $0x328] sm:$0xff]  ;;  %v442_v52 = vld [vmem:[%s17262_s24 + $0x338] sm:$0xff] }
 0x114   : > { %6084 = vmatmul.mubr.f32.vlgmr.msra.gmra.mxu0 %v1550_v39  ;;  %6154 = vmatmul.mubr.f32.vlgmr.msra.gmra.mxu1 %v1557_v40  ;;  %v1626_v39 = vcombine.high %v1618_v32, %v1618_v32  ;;  %v1627_v40 = vcombine.high %v1625_v33, %v1625_v33 }
 0x115   : > { %6188 = vmatpush1.xpose.msra.mxu0 %v807_v56  ;;  %6258 = vmatpush1.xpose.msra.mxu1 %v809_v57 }
 0x116   : > { %6189 = vmatprep.subr.mxu0 %v424_v58  ;;  %6259 = vmatprep.subr.mxu1 %v426_v59 }
 0x117   : > { %6223 = vmatprep.mubr.f32.mxu0 %v1575_v60  ;;  %6293 = vmatprep.mubr.f32.mxu1 %v1576_v61  ;;  %v439_v61 = vld [vmem:[%s17262_s24 + $0x320] sm:$0xff] }
 0x119   : > { %6190 = vmatpush1.xpose.msra.mxu0 %v423_v63  ;;  %6260 = vmatpush1.xpose.msra.mxu1 %v425_v0  ;;  %v828_v63 = vld [vmem:[%s17262_s24 + $0xf48] sm:$0x3]  ;;  %v830_v0 = vld [vmem:[%s17262_s24 + $0xf58] sm:$0x3] }
 0x11a   : > { %6327 = vmatprep.subr.mxu0 %v812_v1  ;;  %6397 = vmatprep.subr.mxu1 %v814_v2  ;;  %v1652_v1 = vrot.slane %v269_v48, %v17286_v19  ;;  %v1659_v2 = vrot.slane %v1645_v55, %v17286_v19  ;;  %v454_v48 = vld [vmem:[%s17262_s24 + $0x398] sm:$0xff] }
 0x11c   : > { %6224 = vmatmul.mubr.f32.vlgmr.msra.gmra.mxu0 %v1567_v53  ;;  %6294 = vmatmul.mubr.f32.vlgmr.msra.gmra.mxu1 %v1574_v54  ;;  %v1643_v53 = vcombine.high %v1635_v46, %v1635_v46  ;;  %v1644_v54 = vcombine.high %v1642_v47, %v1642_v47 }
 0x11d   : > { %6328 = vmatpush1.xpose.msra.mxu0 %v811_v6  ;;  %6398 = vmatpush1.xpose.msra.mxu1 %v813_v7  ;;  %v444_v6 = vld [vmem:[%s17262_s24 + $0x348] sm:$0xff]  ;;  %v446_v7 = vld [vmem:[%s17262_s24 + $0x358] sm:$0xff] }
 0x11e   : > { %6329 = vmatprep.subr.mxu0 %v428_v8  ;;  %6399 = vmatprep.subr.mxu1 %v430_v9  ;;  %v1660_v8 = vcombine.high %v1652_v1, %v1652_v1  ;;  %v1661_v9 = vcombine.high %v1659_v2, %v1659_v2 }
 0x11f   : > { %6363 = vmatprep.mubr.f32.mxu0 %v1592_v10  ;;  %6433 = vmatprep.mubr.f32.mxu1 %v1593_v11 }
 0x121   : > { %6330 = vmatpush1.xpose.msra.mxu0 %v427_v13  ;;  %6400 = vmatpush1.xpose.msra.mxu1 %v429_v14 }
 0x122   : > { %6467 = vmatprep.subr.mxu0 %v816_v15  ;;  %6537 = vmatprep.subr.mxu1 %v818_v16  ;;  %v443_v16 = vld [vmem:[%s17262_s24 + $0x340] sm:$0xff] }
 0x124   : > { %6364 = vmatmul.mubr.f32.vlgmr.msra.gmra.mxu0 %v1584_v3  ;;  %6434 = vmatmul.mubr.f32.vlgmr.msra.gmra.mxu1 %v1591_v4  ;;  %v270_v3 = vld [vmem:[%s17255_s29 + $0xd8] sm:$0xff]  ;;  %v827_v4 = vld [vmem:[%s17262_s24 + $0xf40] sm:$0x3] }
 0x125   : > { %6468 = vmatpush1.xpose.msra.mxu0 %v815_v21  ;;  %6538 = vmatpush1.xpose.msra.mxu1 %v817_v22  ;;  %v1662_v10 = vcombine.high %v270_v3, %v270_v3  ;;  %v834_v21 = vld [vmem:[%s17262_s24 + $0xf78] sm:$0x3]  ;;  %v1669_v22 = vrot.slane %v270_v3, %v17286_v19  ;;  %v456_v3 = vld [vmem:[%s17262_s24 + $0x3a8] sm:$0xff] }
 0x126   : > { %6469 = vmatprep.subr.mxu0 %v432_v23  ;;  %6539 = vmatprep.subr.mxu1 %v434_v24  ;;  %v271_v24 = vld [vmem:[%s17255_s29 + $0xe0] sm:$0xff] }
 0x127   : > { %6503 = vmatprep.mubr.f32.mxu0 %v1609_v25  ;;  %6573 = vmatprep.mubr.f32.mxu1 %v1610_v26  ;;  %v1676_v23 = vrot.slane %v1662_v10, %v17286_v19  ;;  %v831_v25 = vld [vmem:[%s17262_s24 + $0xf60] sm:$0x3]  ;;  %v833_v26 = vld [vmem:[%s17262_s24 + $0xf70] sm:$0x3] }
 0x129   : > { %6470 = vmatpush1.xpose.msra.mxu0 %v431_v28  ;;  %6540 = vmatpush1.xpose.msra.mxu1 %v433_v29  ;;  %v450_v28 = vld [vmem:[%s17262_s24 + $0x378] sm:$0xff]  ;;  %v1677_v29 = vcombine.high %v1669_v22, %v1669_v22 }
 0x12a   : > { %6607 = vmatprep.subr.mxu0 %v820_v30  ;;  %6677 = vmatprep.subr.mxu1 %v822_v31  ;;  %v1678_v30 = vcombine.high %v1676_v23, %v1676_v23  ;;  %v1679_v31 = vcombine.high %v271_v24, %v271_v24 }
 0x12c   : > { %6504 = vmatmul.mubr.f32.vlgmr.msra.gmra.mxu0 %v1601_v17  ;;  %6574 = vmatmul.mubr.f32.vlgmr.msra.gmra.mxu1 %v1608_v18  ;;  %v445_v17 = vld [vmem:[%s17262_s24 + $0x350] sm:$0xff] }
 0x12d   : > { %6608 = vmatpush1.xpose.msra.mxu0 %v819_v35  ;;  %6678 = vmatpush1.xpose.msra.mxu1 %v821_v36 }
 0x12e   : > { %6609 = vmatprep.subr.mxu0 %v436_v37  ;;  %6679 = vmatprep.subr.mxu1 %v438_v38  ;;  %v447_v37 = vld [vmem:[%s17262_s24 + $0x360] sm:$0xff]  ;;  %v449_v38 = vld [vmem:[%s17262_s24 + $0x370] sm:$0xff] }
 0x12f   : > { %6643 = vmatprep.mubr.f32.mxu0 %v1626_v39  ;;  %6713 = vmatprep.mubr.f32.mxu1 %v1627_v40  ;;  %v836_v40 = vld [vmem:[%s17262_s24 + $0xf88] sm:$0x3] }
 0x131   : > { %6610 = vmatpush1.xpose.msra.mxu0 %v435_v42  ;;  %6680 = vmatpush1.xpose.msra.mxu1 %v437_v43  ;;  %v1686_v42 = vrot.slane %v271_v24, %v17286_v19  ;;  %v1693_v43 = vrot.slane %v1679_v31, %v17286_v19  ;;  %v460_v24 = vld [vmem:[%s17262_s24 + $0x3c8] sm:$0xff] }
 0x132   : > { %6747 = vmatprep.subr.mxu0 %v824_v44  ;;  %6817 = vmatprep.subr.mxu1 %v826_v45  ;;  %v272_v44 = vld [vmem:[%s17255_s29 + $0xe8] sm:$0xff]  ;;  %v835_v45 = vld [vmem:[%s17262_s24 + $0xf80] sm:$0x3] }
 0x134   : > { %6644 = vmatmul.mubr.f32.vlgmr.msra.gmra.mxu0 %v1618_v32  ;;  %v3285_v56 = vpop.f32.mrf.mxu0  ;;  %v3355_v57 = vpop.f32.mrf.mxu1  ;;  %6714 = vmatmul.mubr.f32.vlgmr.msra.gmra.mxu1 %v1625_v33 }
 0x135   : > { %v3356_v58 = vadd.f32 %v3355_v57, %v3285_v56  ;;  %6748 = vmatpush1.xpose.msra.mxu0 %v823_v49  ;;  %6818 = vmatpush1.xpose.msra.mxu1 %v825_v50  ;;  %v1694_v49 = vcombine.high %v1686_v42, %v1686_v42  ;;  %v1695_v50 = vcombine.high %v1693_v43, %v1693_v43  ;;  %v451_v57 = vld [vmem:[%s17262_s24 + $0x380] sm:$0xff] }
 0x136   : > { %v3287_v59 = vpop.f32.mrf.mxu0  ;;  %v3357_v60 = vpop.f32.mrf.mxu1  ;;  %6749 = vmatprep.subr.mxu0 %v440_v51  ;;  %6819 = vmatprep.subr.mxu1 %v442_v52  ;;  %v1696_v51 = vcombine.high %v272_v44, %v272_v44 }
 0x137   : > { %6783 = vmatprep.mubr.f32.mxu0 %v1643_v53  ;;  %6853 = vmatprep.mubr.f32.mxu1 %v1644_v54  ;;  %v840_v60 = vld [vmem:[%s17262_s24 + $0xfa8] sm:$0x3] }
 0x139   : > { %6750 = vmatpush1.xpose.msra.mxu0 %v439_v61  ;;  %6820 = vmatpush1.xpose.msra.mxu1 %v441_v62  ;;  %v842_v61 = vld [vmem:[%s17262_s24 + $0xfb8] sm:$0x3]  ;;  %v1703_v62 = vrot.slane %v272_v44, %v17286_v19  ;;  %v464_v44 = vld [vmem:[%s17262_s24 + $0x3e8] sm:$0xff] }
 0x13a   : > { %6887 = vmatprep.subr.mxu0 %v828_v63  ;;  %6957 = vmatprep.subr.mxu1 %v830_v0  ;;  %v1710_v63 = vrot.slane %v1696_v51, %v17286_v19  ;;  %v273_v0 = vld [vmem:[%s17255_s29 + $0xf0] sm:$0xff] }
 0x13c   : > { %v3425_v11 = vpop.f32.mrf.mxu0  ;;  %6784 = vmatmul.mubr.f32.vlgmr.msra.gmra.mxu0 %v1635_v46  ;;  %v3495_v12 = vpop.f32.mrf.mxu1  ;;  %6854 = vmatmul.mubr.f32.vlgmr.msra.gmra.mxu1 %v1642_v47  ;;  %v837_v46 = vld [vmem:[%s17262_s24 + $0xf90] sm:$0x3]  ;;  %v452_v47 = vld [vmem:[%s17262_s24 + $0x388] sm:$0xff] }
 0x13d   : > { %v3426_v13 = vadd.f32 %v3425_v11, %v3356_v58  ;;  %6888 = vmatpush1.xpose.msra.mxu0 %v827_v4  ;;  %6958 = vmatpush1.xpose.msra.mxu1 %v829_v5  ;;  %v453_v58 = vld [vmem:[%s17262_s24 + $0x390] sm:$0xff]  ;;  %v458_v4 = vld [vmem:[%s17262_s24 + $0x3b8] sm:$0xff]  ;;  %v1711_v5 = vcombine.high %v1703_v62, %v1703_v62 }
 0x13e   : > { %v3427_v14 = vpop.f32.mrf.mxu0  ;;  %v3497_v15 = vpop.f32.mrf.mxu1  ;;  %6889 = vmatprep.subr.mxu0 %v444_v6  ;;  %6959 = vmatprep.subr.mxu1 %v446_v7  ;;  %v1712_v6 = vcombine.high %v1710_v63, %v1710_v63  ;;  %v1713_v7 = vcombine.high %v273_v0, %v273_v0 }
 0x13f   : > { %v3496_v18 = vadd.f32 %v3495_v12, %v3426_v13  ;;  %6923 = vmatprep.mubr.f32.mxu0 %v1660_v8  ;;  %6993 = vmatprep.mubr.f32.mxu1 %v1661_v9  ;;  %v455_v13 = vld [vmem:[%s17262_s24 + $0x3a0] sm:$0xff]  ;;  %v457_v14 = vld [vmem:[%s17262_s24 + $0x3b0] sm:$0xff] }
 0x141   : > { %6890 = vmatpush1.xpose.msra.mxu0 %v443_v16  ;;  %6960 = vmatpush1.xpose.msra.mxu1 %v445_v17  ;;  %v844_v16 = vld [vmem:[%s17262_s24 + $0xfc8] sm:$0x3]  ;;  %v846_v17 = vld [vmem:[%s17262_s24 + $0xfd8] sm:$0x3] }
 0x142   : > { %7027 = vmatprep.subr.mxu0 %v832_v20  ;;  %7097 = vmatprep.subr.mxu1 %v834_v21  ;;  %v1727_v20 = vrot.slane %v1713_v7, %v17286_v19  ;;  %v274_v21 = vld [vmem:[%s17255_s29 + $0xf8] sm:$0xff] }
 0x144   : > { %v3565_v32 = vpop.f32.mrf.mxu0  ;;  %6924 = vmatmul.mubr.f32.vlgmr.msra.gmra.mxu0 %v1652_v1  ;;  %v3635_v33 = vpop.f32.mrf.mxu1  ;;  %6994 = vmatmul.mubr.f32.vlgmr.msra.gmra.mxu1 %v1659_v2  ;;  %v839_v1 = vld [vmem:[%s17262_s24 + $0xfa0] sm:$0x3]  ;;  %v841_v2 = vld [vmem:[%s17262_s24 + $0xfb0] sm:$0x3] }
 0x145   : > { %v3566_v34 = vadd.f32 %v3565_v32, %v3496_v18  ;;  %7028 = vmatpush1.xpose.msra.mxu0 %v831_v25  ;;  %7098 = vmatpush1.xpose.msra.mxu1 %v833_v26  ;;  %v1720_v18 = vrot.slane %v273_v0, %v17286_v19  ;;  %v462_v25 = vld [vmem:[%s17262_s24 + $0x3d8] sm:$0xff]  ;;  %v468_v0 = vld [vmem:[%s17262_s24 + $0x408] sm:$0xff] }
 0x146   : > { %v3567_v35 = vpop.f32.mrf.mxu0  ;;  %v3637_v36 = vpop.f32.mrf.mxu1  ;;  %7029 = vmatprep.subr.mxu0 %v448_v27  ;;  %7099 = vmatprep.subr.mxu1 %v450_v28  ;;  %v1729_v27 = vcombine.high %v1727_v20, %v1727_v20  ;;  %v1730_v28 = vcombine.high %v274_v21, %v274_v21 }
 0x147   : > { %v3636_v39 = vadd.f32 %v3635_v33, %v3566_v34  ;;  %7063 = vmatprep.mubr.f32.mxu0 %v1677_v29  ;;  %7133 = vmatprep.mubr.f32.mxu1 %v1678_v30  ;;  %v1728_v26 = vcombine.high %v1720_v18, %v1720_v18  ;;  %v459_v34 = vld [vmem:[%s17262_s24 + $0x3c0] sm:$0xff]  ;;  %v461_v35 = vld [vmem:[%s17262_s24 + $0x3d0] sm:$0xff] }
 0x149   : > { %7030 = vmatpush1.xpose.msra.mxu0 %v447_v37  ;;  %7100 = vmatpush1.xpose.msra.mxu1 %v449_v38  ;;  %v848_v37 = vld [vmem:[%s17262_s24 + $0xfe8] sm:$0x3]  ;;  %v850_v38 = vld [vmem:[%s17262_s24 + $0xff8] sm:$0x3] }
 0x14a   : > { %7167 = vmatprep.subr.mxu0 %v836_v40  ;;  %7237 = vmatprep.subr.mxu1 %v838_v41  ;;  %v1744_v40 = vrot.slane %v1730_v28, %v17286_v19  ;;  %v275_v41 = vld [vmem:[%s17255_s29 + $0x100] sm:$0xff] }
 0x14c   : > { %v3705_v52 = vpop.f32.mrf.mxu0  ;;  %7064 = vmatmul.mubr.f32.vlgmr.msra.gmra.mxu0 %v1669_v22  ;;  %v3775_v53 = vpop.f32.mrf.mxu1  ;;  %7134 = vmatmul.mubr.f32.vlgmr.msra.gmra.mxu1 %v1676_v23  ;;  %v843_v22 = vld [vmem:[%s17262_s24 + $0xfc0] sm:$0x3]  ;;  %v845_v23 = vld [vmem:[%s17262_s24 + $0xfd0] sm:$0x3] }
 0x14d   : > { %v3706_v54 = vadd.f32 %v3705_v52, %v3636_v39  ;;  %7168 = vmatpush1.xpose.msra.mxu0 %v835_v45  ;;  %7238 = vmatpush1.xpose.msra.mxu1 %v837_v46  ;;  %v1737_v39 = vrot.slane %v274_v21, %v17286_v19  ;;  %v466_v45 = vld [vmem:[%s17262_s24 + $0x3f8] sm:$0xff]  ;;  %v472_v21 = vld [vmem:[%s17262_s24 + $0x428] sm:$0xff] }
 0x14e   : > { %v3707_v55 = vpop.f32.mrf.mxu0  ;;  %v3777_v56 = vpop.f32.mrf.mxu1  ;;  %7169 = vmatprep.subr.mxu0 %v452_v47  ;;  %7239 = vmatprep.subr.mxu1 %v454_v48  ;;  %v1746_v47 = vcombine.high %v1744_v40, %v1744_v40  ;;  %v1747_v48 = vcombine.high %v275_v41, %v275_v41 }
 0x14f   : > { %v3776_v59 = vadd.f32 %v3775_v53, %v3706_v54  ;;  %7203 = vmatprep.mubr.f32.mxu0 %v1694_v49  ;;  %7273 = vmatprep.mubr.f32.mxu1 %v1695_v50  ;;  %v1745_v46 = vcombine.high %v1737_v39, %v1737_v39  ;;  %v463_v54 = vld [vmem:[%s17262_s24 + $0x3e0] sm:$0xff]  ;;  %v465_v55 = vld [vmem:[%s17262_s24 + $0x3f0] sm:$0xff] }
 0x151   : > { %7170 = vmatpush1.xpose.msra.mxu0 %v451_v57  ;;  %7240 = vmatpush1.xpose.msra.mxu1 %v453_v58  ;;  %v852_v57 = vld [vmem:[%s17262_s24 + $0x1008] sm:$0x3]  ;;  %v854_v58 = vld [vmem:[%s17262_s24 + $0x1018] sm:$0x3] }
 0x152   : > { %7307 = vmatprep.subr.mxu0 %v840_v60  ;;  %7377 = vmatprep.subr.mxu1 %v842_v61  ;;  %v1761_v60 = vrot.slane %v1747_v48, %v17286_v19  ;;  %v276_v61 = vld [vmem:[%s17255_s29 + $0x108] sm:$0xff] }
 0x154   : > { %v3845_v8 = vpop.f32.mrf.mxu0  ;;  %7204 = vmatmul.mubr.f32.vlgmr.msra.gmra.mxu0 %v1686_v42  ;;  %v3915_v9 = vpop.f32.mrf.mxu1  ;;  %7274 = vmatmul.mubr.f32.vlgmr.msra.gmra.mxu1 %v1693_v43  ;;  %v847_v42 = vld [vmem:[%s17262_s24 + $0xfe0] sm:$0x3]  ;;  %v849_v43 = vld [vmem:[%s17262_s24 + $0xff0] sm:$0x3] }
 0x155   : > { %v3846_v10 = vadd.f32 %v3845_v8, %v3776_v59  ;;  %7308 = vmatpush1.xpose.msra.mxu0 %v839_v1  ;;  %7378 = vmatpush1.xpose.msra.mxu1 %v841_v2  ;;  %v1754_v59 = vrot.slane %v275_v41, %v17286_v19  ;;  %v470_v1 = vld [vmem:[%s17262_s24 + $0x418] sm:$0xff]  ;;  %v476_v41 = vld [vmem:[%s17262_s24 + $0x448] sm:$0xff] }
 0x156   : > { %v3847_v11 = vpop.f32.mrf.mxu0  ;;  %v3917_v12 = vpop.f32.mrf.mxu1  ;;  %7309 = vmatprep.subr.mxu0 %v456_v3  ;;  %7379 = vmatprep.subr.mxu1 %v458_v4  ;;  %v1763_v3 = vcombine.high %v1761_v60, %v1761_v60  ;;  %v1764_v4 = vcombine.high %v276_v61, %v276_v61 }
 0x157   : > { %v3916_v15 = vadd.f32 %v3915_v9, %v3846_v10  ;;  %7343 = vmatprep.mubr.f32.mxu0 %v1711_v5  ;;  %7413 = vmatprep.mubr.f32.mxu1 %v1712_v6  ;;  %v1762_v2 = vcombine.high %v1754_v59, %v1754_v59  ;;  %v467_v10 = vld [vmem:[%s17262_s24 + $0x400] sm:$0xff]  ;;  %v469_v11 = vld [vmem:[%s17262_s24 + $0x410] sm:$0xff] }
 0x159   : > { %7310 = vmatpush1.xpose.msra.mxu0 %v455_v13  ;;  %7380 = vmatpush1.xpose.msra.mxu1 %v457_v14  ;;  %v856_v13 = vld [vmem:[%s17262_s24 + $0x1028] sm:$0x3]  ;;  %v858_v14 = vld [vmem:[%s17262_s24 + $0x1038] sm:$0x3] }
 0x15a   : > { %7447 = vmatprep.subr.mxu0 %v844_v16  ;;  %7517 = vmatprep.subr.mxu1 %v846_v17  ;;  %v1778_v16 = vrot.slane %v1764_v4, %v17286_v19  ;;  %v277_v17 = vld [vmem:[%s17255_s29 + $0x110] sm:$0xff] }
 0x15c   : > { %v3985_v29 = vpop.f32.mrf.mxu0  ;;  %7344 = vmatmul.mubr.f32.vlgmr.msra.gmra.mxu0 %v1703_v62  ;;  %v4055_v30 = vpop.f32.mrf.mxu1  ;;  %7414 = vmatmul.mubr.f32.vlgmr.msra.gmra.mxu1 %v1710_v63  ;;  %v851_v62 = vld [vmem:[%s17262_s24 + $0x1000] sm:$0x3]  ;;  %v853_v63 = vld [vmem:[%s17262_s24 + $0x1010] sm:$0x3] }
 0x15d   : > { %v3986_v31 = vadd.f32 %v3985_v29, %v3916_v15  ;;  %7448 = vmatpush1.xpose.msra.mxu0 %v843_v22  ;;  %7518 = vmatpush1.xpose.msra.mxu1 %v845_v23  ;;  %v1771_v15 = vrot.slane %v276_v61, %v17286_v19  ;;  %v474_v22 = vld [vmem:[%s17262_s24 + $0x438] sm:$0xff]  ;;  %v480_v61 = vld [vmem:[%s17262_s24 + $0x468] sm:$0xff] }
 0x15e   : > { %v3987_v32 = vpop.f32.mrf.mxu0  ;;  %v4057_v33 = vpop.f32.mrf.mxu1  ;;  %7449 = vmatprep.subr.mxu0 %v460_v24  ;;  %7519 = vmatprep.subr.mxu1 %v462_v25  ;;  %v1780_v24 = vcombine.high %v1778_v16, %v1778_v16  ;;  %v1781_v25 = vcombine.high %v277_v17, %v277_v17 }
 0x15f   : > { %v4056_v36 = vadd.f32 %v4055_v30, %v3986_v31  ;;  %7483 = vmatprep.mubr.f32.mxu0 %v1728_v26  ;;  %7553 = vmatprep.mubr.f32.mxu1 %v1729_v27  ;;  %v1779_v23 = vcombine.high %v1771_v15, %v1771_v15  ;;  %v471_v31 = vld [vmem:[%s17262_s24 + $0x420] sm:$0xff]  ;;  %v473_v32 = vld [vmem:[%s17262_s24 + $0x430] sm:$0xff] }
 0x161   : > { %7450 = vmatpush1.xpose.msra.mxu0 %v459_v34  ;;  %7520 = vmatpush1.xpose.msra.mxu1 %v461_v35  ;;  %v860_v34 = vld [vmem:[%s17262_s24 + $0x1048] sm:$0x3]  ;;  %v862_v35 = vld [vmem:[%s17262_s24 + $0x1058] sm:$0x3] }
 0x162   : > { %7587 = vmatprep.subr.mxu0 %v848_v37  ;;  %7657 = vmatprep.subr.mxu1 %v850_v38  ;;  %v1795_v37 = vrot.slane %v1781_v25, %v17286_v19  ;;  %v278_v38 = vld [vmem:[%s17255_s29 + $0x118] sm:$0xff] }
 0x164   : > { %v4125_v49 = vpop.f32.mrf.mxu0  ;;  %7484 = vmatmul.mubr.f32.vlgmr.msra.gmra.mxu0 %v1720_v18  ;;  %v4195_v50 = vpop.f32.mrf.mxu1  ;;  %7554 = vmatmul.mubr.f32.vlgmr.msra.gmra.mxu1 %v1727_v20  ;;  %v855_v18 = vld [vmem:[%s17262_s24 + $0x1020] sm:$0x3]  ;;  %v857_v20 = vld [vmem:[%s17262_s24 + $0x1030] sm:$0x3] }
 0x165   : > { %v4126_v51 = vadd.f32 %v4125_v49, %v4056_v36  ;;  %7588 = vmatpush1.xpose.msra.mxu0 %v847_v42  ;;  %7658 = vmatpush1.xpose.msra.mxu1 %v849_v43  ;;  %v1788_v36 = vrot.slane %v277_v17, %v17286_v19  ;;  %v478_v42 = vld [vmem:[%s17262_s24 + $0x458] sm:$0xff]  ;;  %v484_v17 = vld [vmem:[%s17262_s24 + $0x488] sm:$0xff] }
 0x166   : > { %v4127_v52 = vpop.f32.mrf.mxu0  ;;  %v4197_v53 = vpop.f32.mrf.mxu1  ;;  %7589 = vmatprep.subr.mxu0 %v464_v44  ;;  %7659 = vmatprep.subr.mxu1 %v466_v45  ;;  %v1797_v44 = vcombine.high %v1795_v37, %v1795_v37  ;;  %v1798_v45 = vcombine.high %v278_v38, %v278_v38 }
 0x167   : > { %v4196_v56 = vadd.f32 %v4195_v50, %v4126_v51  ;;  %7623 = vmatprep.mubr.f32.mxu0 %v1745_v46  ;;  %7693 = vmatprep.mubr.f32.mxu1 %v1746_v47  ;;  %v1796_v43 = vcombine.high %v1788_v36, %v1788_v36  ;;  %v475_v51 = vld [vmem:[%s17262_s24 + $0x440] sm:$0xff]  ;;  %v477_v52 = vld [vmem:[%s17262_s24 + $0x450] sm:$0xff] }
 0x169   : > { %7590 = vmatpush1.xpose.msra.mxu0 %v463_v54  ;;  %7660 = vmatpush1.xpose.msra.mxu1 %v465_v55  ;;  %v864_v54 = vld [vmem:[%s17262_s24 + $0x1068] sm:$0x3]  ;;  %v866_v55 = vld [vmem:[%s17262_s24 + $0x1078] sm:$0x3] }
 0x16a   : > { %7727 = vmatprep.subr.mxu0 %v852_v57  ;;  %7797 = vmatprep.subr.mxu1 %v854_v58  ;;  %v1812_v57 = vrot.slane %v1798_v45, %v17286_v19  ;;  %v279_v58 = vld [vmem:[%s17255_s29 + $0x120] sm:$0xff] }
 0x16c   : > { %v4265_v5 = vpop.f32.mrf.mxu0  ;;  %7624 = vmatmul.mubr.f32.vlgmr.msra.gmra.mxu0 %v1737_v39  ;;  %v4335_v6 = vpop.f32.mrf.mxu1  ;;  %7694 = vmatmul.mubr.f32.vlgmr.msra.gmra.mxu1 %v1744_v40  ;;  %v859_v39 = vld [vmem:[%s17262_s24 + $0x1040] sm:$0x3]  ;;  %v861_v40 = vld [vmem:[%s17262_s24 + $0x1050] sm:$0x3] }
 0x16d   : > { %v4266_v7 = vadd.f32 %v4265_v5, %v4196_v56  ;;  %7728 = vmatpush1.xpose.msra.mxu0 %v851_v62  ;;  %7798 = vmatpush1.xpose.msra.mxu1 %v853_v63  ;;  %v1805_v56 = vrot.slane %v278_v38, %v17286_v19  ;;  %v482_v62 = vld [vmem:[%s17262_s24 + $0x478] sm:$0xff]  ;;  %v488_v38 = vld [vmem:[%s17262_s24 + $0x4a8] sm:$0xff] }
 0x16e   : > { %v4267_v8 = vpop.f32.mrf.mxu0  ;;  %v4337_v9 = vpop.f32.mrf.mxu1  ;;  %7729 = vmatprep.subr.mxu0 %v468_v0  ;;  %7799 = vmatprep.subr.mxu1 %v470_v1  ;;  %v1814_v0 = vcombine.high %v1812_v57, %v1812_v57  ;;  %v1815_v1 = vcombine.high %v279_v58, %v279_v58 }
 0x16f   : > { %v4336_v12 = vadd.f32 %v4335_v6, %v4266_v7  ;;  %7763 = vmatprep.mubr.f32.mxu0 %v1762_v2  ;;  %7833 = vmatprep.mubr.f32.mxu1 %v1763_v3  ;;  %v1813_v63 = vcombine.high %v1805_v56, %v1805_v56  ;;  %v479_v7 = vld [vmem:[%s17262_s24 + $0x460] sm:$0xff]  ;;  %v481_v8 = vld [vmem:[%s17262_s24 + $0x470] sm:$0xff] }
 0x171   : > { %7730 = vmatpush1.xpose.msra.mxu0 %v467_v10  ;;  %7800 = vmatpush1.xpose.msra.mxu1 %v469_v11  ;;  %v868_v10 = vld [vmem:[%s17262_s24 + $0x1088] sm:$0x3]  ;;  %v870_v11 = vld [vmem:[%s17262_s24 + $0x1098] sm:$0x3] }
 0x172   : > { %7867 = vmatprep.subr.mxu0 %v856_v13  ;;  %7937 = vmatprep.subr.mxu1 %v858_v14  ;;  %v1829_v13 = vrot.slane %v1815_v1, %v17286_v19  ;;  %v280_v14 = vld [vmem:[%s17255_s29 + $0x128] sm:$0xff] }
 0x174   : > { %v4405_v26 = vpop.f32.mrf.mxu0  ;;  %7764 = vmatmul.mubr.f32.vlgmr.msra.gmra.mxu0 %v1754_v59  ;;  %v4475_v27 = vpop.f32.mrf.mxu1  ;;  %7834 = vmatmul.mubr.f32.vlgmr.msra.gmra.mxu1 %v1761_v60  ;;  %v863_v59 = vld [vmem:[%s17262_s24 + $0x1060] sm:$0x3]  ;;  %v865_v60 = vld [vmem:[%s17262_s24 + $0x1070] sm:$0x3] }
 0x175   : > { %v4406_v28 = vadd.f32 %v4405_v26, %v4336_v12  ;;  %7868 = vmatpush1.xpose.msra.mxu0 %v855_v18  ;;  %7938 = vmatpush1.xpose.msra.mxu1 %v857_v20  ;;  %v1822_v12 = vrot.slane %v279_v58, %v17286_v19  ;;  %v486_v18 = vld [vmem:[%s17262_s24 + $0x498] sm:$0xff]  ;;  %v492_v58 = vld [vmem:[%s17262_s24 + $0x4c8] sm:$0xff] }
 0x176   : > { %v4407_v29 = vpop.f32.mrf.mxu0  ;;  %v4477_v30 = vpop.f32.mrf.mxu1  ;;  %7869 = vmatprep.subr.mxu0 %v472_v21  ;;  %7939 = vmatprep.subr.mxu1 %v474_v22  ;;  %v1831_v21 = vcombine.high %v1829_v13, %v1829_v13  ;;  %v1832_v22 = vcombine.high %v280_v14, %v280_v14 }
 0x177   : > { %v4476_v33 = vadd.f32 %v4475_v27, %v4406_v28  ;;  %7903 = vmatprep.mubr.f32.mxu0 %v1779_v23  ;;  %7973 = vmatprep.mubr.f32.mxu1 %v1780_v24  ;;  %v1830_v20 = vcombine.high %v1822_v12, %v1822_v12  ;;  %v483_v28 = vld [vmem:[%s17262_s24 + $0x480] sm:$0xff]  ;;  %v485_v29 = vld [vmem:[%s17262_s24 + $0x490] sm:$0xff] }
 0x179   : > { %7870 = vmatpush1.xpose.msra.mxu0 %v471_v31  ;;  %7940 = vmatpush1.xpose.msra.mxu1 %v473_v32  ;;  %v872_v31 = vld [vmem:[%s17262_s24 + $0x10a8] sm:$0x3]  ;;  %v874_v32 = vld [vmem:[%s17262_s24 + $0x10b8] sm:$0x3] }
 0x17a   : > { %8007 = vmatprep.subr.mxu0 %v860_v34  ;;  %8077 = vmatprep.subr.mxu1 %v862_v35  ;;  %v1846_v34 = vrot.slane %v1832_v22, %v17286_v19  ;;  %v281_v35 = vld [vmem:[%s17255_s29 + $0x130] sm:$0xff] }
 0x17c   : > { %v4545_v46 = vpop.f32.mrf.mxu0  ;;  %7904 = vmatmul.mubr.f32.vlgmr.msra.gmra.mxu0 %v1771_v15  ;;  %v4615_v47 = vpop.f32.mrf.mxu1  ;;  %7974 = vmatmul.mubr.f32.vlgmr.msra.gmra.mxu1 %v1778_v16  ;;  %v867_v15 = vld [vmem:[%s17262_s24 + $0x1080] sm:$0x3]  ;;  %v869_v16 = vld [vmem:[%s17262_s24 + $0x1090] sm:$0x3] }
 0x17d   : > { %v4546_v48 = vadd.f32 %v4545_v46, %v4476_v33  ;;  %8008 = vmatpush1.xpose.msra.mxu0 %v859_v39  ;;  %8078 = vmatpush1.xpose.msra.mxu1 %v861_v40  ;;  %v1839_v33 = vrot.slane %v280_v14, %v17286_v19  ;;  %v490_v39 = vld [vmem:[%s17262_s24 + $0x4b8] sm:$0xff]  ;;  %v496_v14 = vld [vmem:[%s17262_s24 + $0x4e8] sm:$0xff] }
 0x17e   : > { %v4547_v49 = vpop.f32.mrf.mxu0  ;;  %v4617_v50 = vpop.f32.mrf.mxu1  ;;  %8009 = vmatprep.subr.mxu0 %v476_v41  ;;  %8079 = vmatprep.subr.mxu1 %v478_v42  ;;  %v1848_v41 = vcombine.high %v1846_v34, %v1846_v34  ;;  %v1849_v42 = vcombine.high %v281_v35, %v281_v35 }
 0x17f   : > { %v4616_v53 = vadd.f32 %v4615_v47, %v4546_v48  ;;  %8043 = vmatprep.mubr.f32.mxu0 %v1796_v43  ;;  %8113 = vmatprep.mubr.f32.mxu1 %v1797_v44  ;;  %v1847_v40 = vcombine.high %v1839_v33, %v1839_v33  ;;  %v487_v48 = vld [vmem:[%s17262_s24 + $0x4a0] sm:$0xff]  ;;  %v489_v49 = vld [vmem:[%s17262_s24 + $0x4b0] sm:$0xff] }
 0x181   : > { %8010 = vmatpush1.xpose.msra.mxu0 %v475_v51  ;;  %8080 = vmatpush1.xpose.msra.mxu1 %v477_v52  ;;  %v876_v51 = vld [vmem:[%s17262_s24 + $0x10c8] sm:$0x3]  ;;  %v878_v52 = vld [vmem:[%s17262_s24 + $0x10d8] sm:$0x3] }
 0x182   : > { %8147 = vmatprep.subr.mxu0 %v864_v54  ;;  %8217 = vmatprep.subr.mxu1 %v866_v55  ;;  %v1863_v54 = vrot.slane %v1849_v42, %v17286_v19  ;;  %v282_v55 = vld [vmem:[%s17255_s29 + $0x138] sm:$0xff] }
 0x184   : > { %v4685_v2 = vpop.f32.mrf.mxu0  ;;  %8044 = vmatmul.mubr.f32.vlgmr.msra.gmra.mxu0 %v1788_v36  ;;  %v4755_v3 = vpop.f32.mrf.mxu1  ;;  %8114 = vmatmul.mubr.f32.vlgmr.msra.gmra.mxu1 %v1795_v37  ;;  %v871_v36 = vld [vmem:[%s17262_s24 + $0x10a0] sm:$0x3]  ;;  %v873_v37 = vld [vmem:[%s17262_s24 + $0x10b0] sm:$0x3] }
 0x185   : > { %v4686_v4 = vadd.f32 %v4685_v2, %v4616_v53  ;;  %8148 = vmatpush1.xpose.msra.mxu0 %v863_v59  ;;  %8218 = vmatpush1.xpose.msra.mxu1 %v865_v60  ;;  %v1856_v53 = vrot.slane %v281_v35, %v17286_v19  ;;  %v494_v59 = vld [vmem:[%s17262_s24 + $0x4d8] sm:$0xff]  ;;  %v500_v35 = vld [vmem:[%s17262_s24 + $0x508] sm:$0xff] }
 0x186   : > { %v4687_v5 = vpop.f32.mrf.mxu0  ;;  %v4757_v6 = vpop.f32.mrf.mxu1  ;;  %8149 = vmatprep.subr.mxu0 %v480_v61  ;;  %8219 = vmatprep.subr.mxu1 %v482_v62  ;;  %v1865_v61 = vcombine.high %v1863_v54, %v1863_v54  ;;  %v1866_v62 = vcombine.high %v282_v55, %v282_v55 }
 0x187   : > { %v4756_v9 = vadd.f32 %v4755_v3, %v4686_v4  ;;  %8183 = vmatprep.mubr.f32.mxu0 %v1813_v63  ;;  %8253 = vmatprep.mubr.f32.mxu1 %v1814_v0  ;;  %v1864_v60 = vcombine.high %v1856_v53, %v1856_v53  ;;  %v491_v4 = vld [vmem:[%s17262_s24 + $0x4c0] sm:$0xff]  ;;  %v493_v5 = vld [vmem:[%s17262_s24 + $0x4d0] sm:$0xff] }
 0x189   : > { %8150 = vmatpush1.xpose.msra.mxu0 %v479_v7  ;;  %8220 = vmatpush1.xpose.msra.mxu1 %v481_v8  ;;  %v880_v7 = vld [vmem:[%s17262_s24 + $0x10e8] sm:$0x3]  ;;  %v882_v8 = vld [vmem:[%s17262_s24 + $0x10f8] sm:$0x3] }
 0x18a   : > { %8287 = vmatprep.subr.mxu0 %v868_v10  ;;  %8357 = vmatprep.subr.mxu1 %v870_v11  ;;  %v1880_v10 = vrot.slane %v1866_v62, %v17286_v19  ;;  %v283_v11 = vld [vmem:[%s17255_s29 + $0x140] sm:$0xff] }
 0x18c   : > { %v4825_v23 = vpop.f32.mrf.mxu0  ;;  %8184 = vmatmul.mubr.f32.vlgmr.msra.gmra.mxu0 %v1805_v56  ;;  %v4895_v24 = vpop.f32.mrf.mxu1  ;;  %8254 = vmatmul.mubr.f32.vlgmr.msra.gmra.mxu1 %v1812_v57  ;;  %v875_v56 = vld [vmem:[%s17262_s24 + $0x10c0] sm:$0x3]  ;;  %v877_v57 = vld [vmem:[%s17262_s24 + $0x10d0] sm:$0x3] }
 0x18d   : > { %v4826_v25 = vadd.f32 %v4825_v23, %v4756_v9  ;;  %8288 = vmatpush1.xpose.msra.mxu0 %v867_v15  ;;  %8358 = vmatpush1.xpose.msra.mxu1 %v869_v16  ;;  %v1873_v9 = vrot.slane %v282_v55, %v17286_v19  ;;  %v498_v15 = vld [vmem:[%s17262_s24 + $0x4f8] sm:$0xff]  ;;  %v504_v55 = vld [vmem:[%s17262_s24 + $0x528] sm:$0xff] }
 0x18e   : > { %v4827_v26 = vpop.f32.mrf.mxu0  ;;  %v4897_v27 = vpop.f32.mrf.mxu1  ;;  %8289 = vmatprep.subr.mxu0 %v484_v17  ;;  %8359 = vmatprep.subr.mxu1 %v486_v18  ;;  %v1882_v17 = vcombine.high %v1880_v10, %v1880_v10  ;;  %v1883_v18 = vcombine.high %v283_v11, %v283_v11 }
 0x18f   : > { %v4896_v30 = vadd.f32 %v4895_v24, %v4826_v25  ;;  %8323 = vmatprep.mubr.f32.mxu0 %v1830_v20  ;;  %8393 = vmatprep.mubr.f32.mxu1 %v1831_v21  ;;  %v1881_v16 = vcombine.high %v1873_v9, %v1873_v9  ;;  %v495_v25 = vld [vmem:[%s17262_s24 + $0x4e0] sm:$0xff]  ;;  %v497_v26 = vld [vmem:[%s17262_s24 + $0x4f0] sm:$0xff] }
 0x191   : > { %8290 = vmatpush1.xpose.msra.mxu0 %v483_v28  ;;  %8360 = vmatpush1.xpose.msra.mxu1 %v485_v29  ;;  %v884_v28 = vld [vmem:[%s17262_s24 + $0x1108] sm:$0x3]  ;;  %v886_v29 = vld [vmem:[%s17262_s24 + $0x1118] sm:$0x3] }
 0x192   : > { %8427 = vmatprep.subr.mxu0 %v872_v31  ;;  %8497 = vmatprep.subr.mxu1 %v874_v32  ;;  %v1897_v31 = vrot.slane %v1883_v18, %v17286_v19  ;;  %v284_v32 = vld [vmem:[%s17255_s29 + $0x148] sm:$0xff] }
 0x194   : > { %v4965_v43 = vpop.f32.mrf.mxu0  ;;  %8324 = vmatmul.mubr.f32.vlgmr.msra.gmra.mxu0 %v1822_v12  ;;  %v5035_v44 = vpop.f32.mrf.mxu1  ;;  %8394 = vmatmul.mubr.f32.vlgmr.msra.gmra.mxu1 %v1829_v13  ;;  %v879_v12 = vld [vmem:[%s17262_s24 + $0x10e0] sm:$0x3]  ;;  %v881_v13 = vld [vmem:[%s17262_s24 + $0x10f0] sm:$0x3] }
 0x195   : > { %v4966_v45 = vadd.f32 %v4965_v43, %v4896_v30  ;;  %8428 = vmatpush1.xpose.msra.mxu0 %v871_v36  ;;  %8498 = vmatpush1.xpose.msra.mxu1 %v873_v37  ;;  %v1890_v30 = vrot.slane %v283_v11, %v17286_v19  ;;  %v502_v36 = vld [vmem:[%s17262_s24 + $0x518] sm:$0xff]  ;;  %v508_v11 = vld [vmem:[%s17262_s24 + $0x548] sm:$0xff] }
 0x196   : > { %v4967_v46 = vpop.f32.mrf.mxu0  ;;  %v5037_v47 = vpop.f32.mrf.mxu1  ;;  %8429 = vmatprep.subr.mxu0 %v488_v38  ;;  %8499 = vmatprep.subr.mxu1 %v490_v39  ;;  %v1899_v38 = vcombine.high %v1897_v31, %v1897_v31  ;;  %v1900_v39 = vcombine.high %v284_v32, %v284_v32 }
 0x197   : > { %v5036_v50 = vadd.f32 %v5035_v44, %v4966_v45  ;;  %8463 = vmatprep.mubr.f32.mxu0 %v1847_v40  ;;  %8533 = vmatprep.mubr.f32.mxu1 %v1848_v41  ;;  %v1898_v37 = vcombine.high %v1890_v30, %v1890_v30  ;;  %v499_v45 = vld [vmem:[%s17262_s24 + $0x500] sm:$0xff]  ;;  %v501_v46 = vld [vmem:[%s17262_s24 + $0x510] sm:$0xff] }
 0x199   : > { %8430 = vmatpush1.xpose.msra.mxu0 %v487_v48  ;;  %8500 = vmatpush1.xpose.msra.mxu1 %v489_v49  ;;  %v888_v48 = vld [vmem:[%s17262_s24 + $0x1128] sm:$0x3]  ;;  %v890_v49 = vld [vmem:[%s17262_s24 + $0x1138] sm:$0x3] }
 0x19a   : > { %8567 = vmatprep.subr.mxu0 %v876_v51  ;;  %8637 = vmatprep.subr.mxu1 %v878_v52  ;;  %v1914_v51 = vrot.slane %v1900_v39, %v17286_v19  ;;  %v285_v52 = vld [vmem:[%s17255_s29 + $0x150] sm:$0xff] }
 0x19c   : > { %v5105_v63 = vpop.f32.mrf.mxu0  ;;  %8464 = vmatmul.mubr.f32.vlgmr.msra.gmra.mxu0 %v1839_v33  ;;  %v5175_v0 = vpop.f32.mrf.mxu1  ;;  %8534 = vmatmul.mubr.f32.vlgmr.msra.gmra.mxu1 %v1846_v34  ;;  %v883_v33 = vld [vmem:[%s17262_s24 + $0x1100] sm:$0x3]  ;;  %v885_v34 = vld [vmem:[%s17262_s24 + $0x1110] sm:$0x3] }
 0x19d   : > { %v5106_v1 = vadd.f32 %v5105_v63, %v5036_v50  ;;  %8568 = vmatpush1.xpose.msra.mxu0 %v875_v56  ;;  %8638 = vmatpush1.xpose.msra.mxu1 %v877_v57  ;;  %v1907_v50 = vrot.slane %v284_v32, %v17286_v19  ;;  %v506_v56 = vld [vmem:[%s17262_s24 + $0x538] sm:$0xff]  ;;  %v512_v32 = vld [vmem:[%s17262_s24 + $0x568] sm:$0xff] }
 0x19e   : > { %v5107_v2 = vpop.f32.mrf.mxu0  ;;  %v5177_v3 = vpop.f32.mrf.mxu1  ;;  %8569 = vmatprep.subr.mxu0 %v492_v58  ;;  %8639 = vmatprep.subr.mxu1 %v494_v59  ;;  %v1916_v58 = vcombine.high %v1914_v51, %v1914_v51  ;;  %v1917_v59 = vcombine.high %v285_v52, %v285_v52 }
 0x19f   : > { %v5176_v6 = vadd.f32 %v5175_v0, %v5106_v1  ;;  %8603 = vmatprep.mubr.f32.mxu0 %v1864_v60  ;;  %8673 = vmatprep.mubr.f32.mxu1 %v1865_v61  ;;  %v1915_v57 = vcombine.high %v1907_v50, %v1907_v50  ;;  %v503_v1 = vld [vmem:[%s17262_s24 + $0x520] sm:$0xff]  ;;  %v505_v2 = vld [vmem:[%s17262_s24 + $0x530] sm:$0xff] }
 0x1a1   : > { %8570 = vmatpush1.xpose.msra.mxu0 %v491_v4  ;;  %8640 = vmatpush1.xpose.msra.mxu1 %v493_v5  ;;  %v892_v4 = vld [vmem:[%s17262_s24 + $0x1148] sm:$0x3]  ;;  %v894_v5 = vld [vmem:[%s17262_s24 + $0x1158] sm:$0x3] }
 0x1a2   : > { %8707 = vmatprep.subr.mxu0 %v880_v7  ;;  %8777 = vmatprep.subr.mxu1 %v882_v8  ;;  %v1931_v7 = vrot.slane %v1917_v59, %v17286_v19  ;;  %v286_v8 = vld [vmem:[%s17255_s29 + $0x158] sm:$0xff] }
 0x1a4   : > { %v5245_v20 = vpop.f32.mrf.mxu0  ;;  %8604 = vmatmul.mubr.f32.vlgmr.msra.gmra.mxu0 %v1856_v53  ;;  %v5315_v21 = vpop.f32.mrf.mxu1  ;;  %8674 = vmatmul.mubr.f32.vlgmr.msra.gmra.mxu1 %v1863_v54  ;;  %v887_v53 = vld [vmem:[%s17262_s24 + $0x1120] sm:$0x3]  ;;  %v889_v54 = vld [vmem:[%s17262_s24 + $0x1130] sm:$0x3] }
 0x1a5   : > { %v5246_v22 = vadd.f32 %v5245_v20, %v5176_v6  ;;  %8708 = vmatpush1.xpose.msra.mxu0 %v879_v12  ;;  %8778 = vmatpush1.xpose.msra.mxu1 %v881_v13  ;;  %v1924_v6 = vrot.slane %v285_v52, %v17286_v19  ;;  %v510_v12 = vld [vmem:[%s17262_s24 + $0x558] sm:$0xff]  ;;  %v516_v52 = vld [vmem:[%s17262_s24 + $0x588] sm:$0xff] }
 0x1a6   : > { %v5247_v23 = vpop.f32.mrf.mxu0  ;;  %v5317_v24 = vpop.f32.mrf.mxu1  ;;  %8709 = vmatprep.subr.mxu0 %v496_v14  ;;  %8779 = vmatprep.subr.mxu1 %v498_v15  ;;  %v1933_v14 = vcombine.high %v1931_v7, %v1931_v7  ;;  %v1934_v15 = vcombine.high %v286_v8, %v286_v8 }
 0x1a7   : > { %v5316_v27 = vadd.f32 %v5315_v21, %v5246_v22  ;;  %8743 = vmatprep.mubr.f32.mxu0 %v1881_v16  ;;  %8813 = vmatprep.mubr.f32.mxu1 %v1882_v17  ;;  %v1932_v13 = vcombine.high %v1924_v6, %v1924_v6  ;;  %v507_v22 = vld [vmem:[%s17262_s24 + $0x540] sm:$0xff]  ;;  %v509_v23 = vld [vmem:[%s17262_s24 + $0x550] sm:$0xff] }
 0x1a9   : > { %8710 = vmatpush1.xpose.msra.mxu0 %v495_v25  ;;  %8780 = vmatpush1.xpose.msra.mxu1 %v497_v26  ;;  %v896_v25 = vld [vmem:[%s17262_s24 + $0x1168] sm:$0x3]  ;;  %v898_v26 = vld [vmem:[%s17262_s24 + $0x1178] sm:$0x3] }
 0x1aa   : > { %8847 = vmatprep.subr.mxu0 %v884_v28  ;;  %8917 = vmatprep.subr.mxu1 %v886_v29  ;;  %v1948_v28 = vrot.slane %v1934_v15, %v17286_v19  ;;  %v287_v29 = vld [vmem:[%s17255_s29 + $0x160] sm:$0xff] }
 0x1ac   : > { %v5385_v40 = vpop.f32.mrf.mxu0  ;;  %8744 = vmatmul.mubr.f32.vlgmr.msra.gmra.mxu0 %v1873_v9  ;;  %v5455_v41 = vpop.f32.mrf.mxu1  ;;  %8814 = vmatmul.mubr.f32.vlgmr.msra.gmra.mxu1 %v1880_v10  ;;  %v891_v9 = vld [vmem:[%s17262_s24 + $0x1140] sm:$0x3]  ;;  %v893_v10 = vld [vmem:[%s17262_s24 + $0x1150] sm:$0x3] }
 0x1ad   : > { %v5386_v42 = vadd.f32 %v5385_v40, %v5316_v27  ;;  %8848 = vmatpush1.xpose.msra.mxu0 %v883_v33  ;;  %8918 = vmatpush1.xpose.msra.mxu1 %v885_v34  ;;  %v1941_v27 = vrot.slane %v286_v8, %v17286_v19  ;;  %v514_v33 = vld [vmem:[%s17262_s24 + $0x578] sm:$0xff]  ;;  %v520_v8 = vld [vmem:[%s17262_s24 + $0x5a8] sm:$0xff] }
 0x1ae   : > { %v5387_v43 = vpop.f32.mrf.mxu0  ;;  %v5457_v44 = vpop.f32.mrf.mxu1  ;;  %8849 = vmatprep.subr.mxu0 %v500_v35  ;;  %8919 = vmatprep.subr.mxu1 %v502_v36  ;;  %v1950_v35 = vcombine.high %v1948_v28, %v1948_v28  ;;  %v1951_v36 = vcombine.high %v287_v29, %v287_v29 }
 0x1af   : > { %v5456_v47 = vadd.f32 %v5455_v41, %v5386_v42  ;;  %8883 = vmatprep.mubr.f32.mxu0 %v1898_v37  ;;  %8953 = vmatprep.mubr.f32.mxu1 %v1899_v38  ;;  %v1949_v34 = vcombine.high %v1941_v27, %v1941_v27  ;;  %v511_v42 = vld [vmem:[%s17262_s24 + $0x560] sm:$0xff]  ;;  %v513_v43 = vld [vmem:[%s17262_s24 + $0x570] sm:$0xff] }
 0x1b1   : > { %8850 = vmatpush1.xpose.msra.mxu0 %v499_v45  ;;  %8920 = vmatpush1.xpose.msra.mxu1 %v501_v46  ;;  %v900_v45 = vld [vmem:[%s17262_s24 + $0x1188] sm:$0x3]  ;;  %v902_v46 = vld [vmem:[%s17262_s24 + $0x1198] sm:$0x3] }
 0x1b2   : > { %8987 = vmatprep.subr.mxu0 %v888_v48  ;;  %9057 = vmatprep.subr.mxu1 %v890_v49  ;;  %v1965_v48 = vrot.slane %v1951_v36, %v17286_v19  ;;  %v288_v49 = vld [vmem:[%s17255_s29 + $0x168] sm:$0xff] }
 0x1b4   : > { %v5525_v60 = vpop.f32.mrf.mxu0  ;;  %8884 = vmatmul.mubr.f32.vlgmr.msra.gmra.mxu0 %v1890_v30  ;;  %v5595_v61 = vpop.f32.mrf.mxu1  ;;  %8954 = vmatmul.mubr.f32.vlgmr.msra.gmra.mxu1 %v1897_v31  ;;  %v895_v30 = vld [vmem:[%s17262_s24 + $0x1160] sm:$0x3]  ;;  %v897_v31 = vld [vmem:[%s17262_s24 + $0x1170] sm:$0x3] }
 0x1b5   : > { %v5526_v62 = vadd.f32 %v5525_v60, %v5456_v47  ;;  %8988 = vmatpush1.xpose.msra.mxu0 %v887_v53  ;;  %9058 = vmatpush1.xpose.msra.mxu1 %v889_v54  ;;  %v1958_v47 = vrot.slane %v287_v29, %v17286_v19  ;;  %v518_v53 = vld [vmem:[%s17262_s24 + $0x598] sm:$0xff]  ;;  %v524_v29 = vld [vmem:[%s17262_s24 + $0x5c8] sm:$0xff] }
 0x1b6   : > { %v5527_v63 = vpop.f32.mrf.mxu0  ;;  %v5597_v0 = vpop.f32.mrf.mxu1  ;;  %8989 = vmatprep.subr.mxu0 %v504_v55  ;;  %9059 = vmatprep.subr.mxu1 %v506_v56  ;;  %v1967_v55 = vcombine.high %v1965_v48, %v1965_v48  ;;  %v1968_v56 = vcombine.high %v288_v49, %v288_v49 }
 0x1b7   : > { %v5596_v3 = vadd.f32 %v5595_v61, %v5526_v62  ;;  %9023 = vmatprep.mubr.f32.mxu0 %v1915_v57  ;;  %9093 = vmatprep.mubr.f32.mxu1 %v1916_v58  ;;  %v1966_v54 = vcombine.high %v1958_v47, %v1958_v47  ;;  %v515_v62 = vld [vmem:[%s17262_s24 + $0x580] sm:$0xff]  ;;  %v517_v63 = vld [vmem:[%s17262_s24 + $0x590] sm:$0xff] }
 0x1b9   : > { %8990 = vmatpush1.xpose.msra.mxu0 %v503_v1  ;;  %9060 = vmatpush1.xpose.msra.mxu1 %v505_v2  ;;  %v904_v1 = vld [vmem:[%s17262_s24 + $0x11a8] sm:$0x3]  ;;  %v906_v2 = vld [vmem:[%s17262_s24 + $0x11b8] sm:$0x3] }
 0x1ba   : > { %9127 = vmatprep.subr.mxu0 %v892_v4  ;;  %9197 = vmatprep.subr.mxu1 %v894_v5  ;;  %v1982_v4 = vrot.slane %v1968_v56, %v17286_v19  ;;  %v289_v5 = vld [vmem:[%s17255_s29 + $0x170] sm:$0xff] }
 0x1bc   : > { %v5665_v16 = vpop.f32.mrf.mxu0  ;;  %9024 = vmatmul.mubr.f32.vlgmr.msra.gmra.mxu0 %v1907_v50  ;;  %v5735_v17 = vpop.f32.mrf.mxu1  ;;  %9094 = vmatmul.mubr.f32.vlgmr.msra.gmra.mxu1 %v1914_v51  ;;  %v899_v50 = vld [vmem:[%s17262_s24 + $0x1180] sm:$0x3]  ;;  %v901_v51 = vld [vmem:[%s17262_s24 + $0x1190] sm:$0x3] }
 0x1bd   : > { %v5666_v18 = vadd.f32 %v5665_v16, %v5596_v3  ;;  %9128 = vmatpush1.xpose.msra.mxu0 %v891_v9  ;;  %9198 = vmatpush1.xpose.msra.mxu1 %v893_v10  ;;  %v1975_v3 = vrot.slane %v288_v49, %v17286_v19  ;;  %v522_v9 = vld [vmem:[%s17262_s24 + $0x5b8] sm:$0xff]  ;;  %v528_v49 = vld [vmem:[%s17262_s24 + $0x5e8] sm:$0xff] }
 0x1be   : > { %v5667_v20 = vpop.f32.mrf.mxu0  ;;  %v5737_v21 = vpop.f32.mrf.mxu1  ;;  %9129 = vmatprep.subr.mxu0 %v508_v11  ;;  %9199 = vmatprep.subr.mxu1 %v510_v12  ;;  %v1984_v11 = vcombine.high %v1982_v4, %v1982_v4  ;;  %v1985_v12 = vcombine.high %v289_v5, %v289_v5 }
 0x1bf   : > { %v5736_v24 = vadd.f32 %v5735_v17, %v5666_v18  ;;  %9163 = vmatprep.mubr.f32.mxu0 %v1932_v13  ;;  %9233 = vmatprep.mubr.f32.mxu1 %v1933_v14  ;;  %v1983_v10 = vcombine.high %v1975_v3, %v1975_v3  ;;  %v519_v18 = vld [vmem:[%s17262_s24 + $0x5a0] sm:$0xff]  ;;  %v521_v20 = vld [vmem:[%s17262_s24 + $0x5b0] sm:$0xff] }
 0x1c1   : > { %9130 = vmatpush1.xpose.msra.mxu0 %v507_v22  ;;  %9200 = vmatpush1.xpose.msra.mxu1 %v509_v23  ;;  %v908_v22 = vld [vmem:[%s17262_s24 + $0x11c8] sm:$0x3]  ;;  %v910_v23 = vld [vmem:[%s17262_s24 + $0x11d8] sm:$0x3] }
 0x1c2   : > { %9267 = vmatprep.subr.mxu0 %v896_v25  ;;  %9337 = vmatprep.subr.mxu1 %v898_v26  ;;  %v1999_v25 = vrot.slane %v1985_v12, %v17286_v19  ;;  %v290_v26 = vld [vmem:[%s17255_s29 + $0x178] sm:$0xff] }
 0x1c4   : > { %v5805_v37 = vpop.f32.mrf.mxu0  ;;  %9164 = vmatmul.mubr.f32.vlgmr.msra.gmra.mxu0 %v1924_v6  ;;  %v5875_v38 = vpop.f32.mrf.mxu1  ;;  %9234 = vmatmul.mubr.f32.vlgmr.msra.gmra.mxu1 %v1931_v7  ;;  %v903_v6 = vld [vmem:[%s17262_s24 + $0x11a0] sm:$0x3]  ;;  %v905_v7 = vld [vmem:[%s17262_s24 + $0x11b0] sm:$0x3] }
 0x1c5   : > { %v5806_v39 = vadd.f32 %v5805_v37, %v5736_v24  ;;  %9268 = vmatpush1.xpose.msra.mxu0 %v895_v30  ;;  %9338 = vmatpush1.xpose.msra.mxu1 %v897_v31  ;;  %v1992_v24 = vrot.slane %v289_v5, %v17286_v19  ;;  %v526_v30 = vld [vmem:[%s17262_s24 + $0x5d8] sm:$0xff]  ;;  %v532_v5 = vld [vmem:[%s17262_s24 + $0x608] sm:$0xff] }
 0x1c6   : > { %v5807_v40 = vpop.f32.mrf.mxu0  ;;  %v5877_v41 = vpop.f32.mrf.mxu1  ;;  %9269 = vmatprep.subr.mxu0 %v512_v32  ;;  %9339 = vmatprep.subr.mxu1 %v514_v33  ;;  %v2001_v32 = vcombine.high %v1999_v25, %v1999_v25  ;;  %v2002_v33 = vcombine.high %v290_v26, %v290_v26 }
 0x1c7   : > { %v5876_v44 = vadd.f32 %v5875_v38, %v5806_v39  ;;  %9303 = vmatprep.mubr.f32.mxu0 %v1949_v34  ;;  %9373 = vmatprep.mubr.f32.mxu1 %v1950_v35  ;;  %v2000_v31 = vcombine.high %v1992_v24, %v1992_v24  ;;  %v523_v39 = vld [vmem:[%s17262_s24 + $0x5c0] sm:$0xff]  ;;  %v525_v40 = vld [vmem:[%s17262_s24 + $0x5d0] sm:$0xff] }
 0x1c9   : > { %9270 = vmatpush1.xpose.msra.mxu0 %v511_v42  ;;  %9340 = vmatpush1.xpose.msra.mxu1 %v513_v43  ;;  %v912_v42 = vld [vmem:[%s17262_s24 + $0x11e8] sm:$0x3]  ;;  %v914_v43 = vld [vmem:[%s17262_s24 + $0x11f8] sm:$0x3] }
 0x1ca   : > { %9407 = vmatprep.subr.mxu0 %v900_v45  ;;  %9477 = vmatprep.subr.mxu1 %v902_v46  ;;  %v2016_v45 = vrot.slane %v2002_v33, %v17286_v19  ;;  %v291_v46 = vld [vmem:[%s17255_s29 + $0x180] sm:$0xff] }
 0x1cc   : > { %v5945_v57 = vpop.f32.mrf.mxu0  ;;  %9304 = vmatmul.mubr.f32.vlgmr.msra.gmra.mxu0 %v1941_v27  ;;  %v6015_v58 = vpop.f32.mrf.mxu1  ;;  %9374 = vmatmul.mubr.f32.vlgmr.msra.gmra.mxu1 %v1948_v28  ;;  %v907_v27 = vld [vmem:[%s17262_s24 + $0x11c0] sm:$0x3]  ;;  %v909_v28 = vld [vmem:[%s17262_s24 + $0x11d0] sm:$0x3] }
 0x1cd   : > { %v5946_v59 = vadd.f32 %v5945_v57, %v5876_v44  ;;  %9408 = vmatpush1.xpose.msra.mxu0 %v899_v50  ;;  %9478 = vmatpush1.xpose.msra.mxu1 %v901_v51  ;;  %v2009_v44 = vrot.slane %v290_v26, %v17286_v19  ;;  %v530_v50 = vld [vmem:[%s17262_s24 + $0x5f8] sm:$0xff]  ;;  %v536_v26 = vld [vmem:[%s17262_s24 + $0x628] sm:$0xff] }
 0x1ce   : > { %v5947_v60 = vpop.f32.mrf.mxu0  ;;  %v6017_v61 = vpop.f32.mrf.mxu1  ;;  %9409 = vmatprep.subr.mxu0 %v516_v52  ;;  %9479 = vmatprep.subr.mxu1 %v518_v53  ;;  %v2018_v52 = vcombine.high %v2016_v45, %v2016_v45  ;;  %v2019_v53 = vcombine.high %v291_v46, %v291_v46 }
 0x1cf   : > { %v6016_v0 = vadd.f32 %v6015_v58, %v5946_v59  ;;  %9443 = vmatprep.mubr.f32.mxu0 %v1966_v54  ;;  %9513 = vmatprep.mubr.f32.mxu1 %v1967_v55  ;;  %v2017_v51 = vcombine.high %v2009_v44, %v2009_v44  ;;  %v527_v59 = vld [vmem:[%s17262_s24 + $0x5e0] sm:$0xff]  ;;  %v529_v60 = vld [vmem:[%s17262_s24 + $0x5f0] sm:$0xff] }
 0x1d1   : > { %9410 = vmatpush1.xpose.msra.mxu0 %v515_v62  ;;  %9480 = vmatpush1.xpose.msra.mxu1 %v517_v63  ;;  %v916_v62 = vld [vmem:[%s17262_s24 + $0x1208] sm:$0x3]  ;;  %v918_v63 = vld [vmem:[%s17262_s24 + $0x1218] sm:$0x3] }
 0x1d2   : > { %9547 = vmatprep.subr.mxu0 %v904_v1  ;;  %9617 = vmatprep.subr.mxu1 %v906_v2  ;;  %v2033_v1 = vrot.slane %v2019_v53, %v17286_v19  ;;  %v292_v2 = vld [vmem:[%s17255_s29 + $0x188] sm:$0xff] }
 0x1d4   : > { %v6085_v13 = vpop.f32.mrf.mxu0  ;;  %9444 = vmatmul.mubr.f32.vlgmr.msra.gmra.mxu0 %v1958_v47  ;;  %v6155_v14 = vpop.f32.mrf.mxu1  ;;  %9514 = vmatmul.mubr.f32.vlgmr.msra.gmra.mxu1 %v1965_v48  ;;  %v911_v47 = vld [vmem:[%s17262_s24 + $0x11e0] sm:$0x3]  ;;  %v913_v48 = vld [vmem:[%s17262_s24 + $0x11f0] sm:$0x3] }
 0x1d5   : > { %v6086_v15 = vadd.f32 %v6085_v13, %v6016_v0  ;;  %9548 = vmatpush1.xpose.msra.mxu0 %v903_v6  ;;  %9618 = vmatpush1.xpose.msra.mxu1 %v905_v7  ;;  %v2026_v0 = vrot.slane %v291_v46, %v17286_v19  ;;  %v534_v6 = vld [vmem:[%s17262_s24 + $0x618] sm:$0xff]  ;;  %v540_v46 = vld [vmem:[%s17262_s24 + $0x648] sm:$0xff] }
 0x1d6   : > { %v6087_v16 = vpop.f32.mrf.mxu0  ;;  %v6157_v17 = vpop.f32.mrf.mxu1  ;;  %9549 = vmatprep.subr.mxu0 %v520_v8  ;;  %9619 = vmatprep.subr.mxu1 %v522_v9  ;;  %v2035_v8 = vcombine.high %v2033_v1, %v2033_v1  ;;  %v2036_v9 = vcombine.high %v292_v2, %v292_v2 }
 0x1d7   : > { %v6156_v21 = vadd.f32 %v6155_v14, %v6086_v15  ;;  %9583 = vmatprep.mubr.f32.mxu0 %v1983_v10  ;;  %9653 = vmatprep.mubr.f32.mxu1 %v1984_v11  ;;  %v2034_v7 = vcombine.high %v2026_v0, %v2026_v0  ;;  %v531_v15 = vld [vmem:[%s17262_s24 + $0x600] sm:$0xff]  ;;  %v533_v16 = vld [vmem:[%s17262_s24 + $0x610] sm:$0xff] }
 0x1d9   : > { %9550 = vmatpush1.xpose.msra.mxu0 %v519_v18  ;;  %9620 = vmatpush1.xpose.msra.mxu1 %v521_v20  ;;  %v920_v18 = vld [vmem:[%s17262_s24 + $0x1228] sm:$0x3]  ;;  %v922_v20 = vld [vmem:[%s17262_s24 + $0x1238] sm:$0x3] }
 0x1da   : > { %9687 = vmatprep.subr.mxu0 %v908_v22  ;;  %9757 = vmatprep.subr.mxu1 %v910_v23  ;;  %v2050_v22 = vrot.slane %v2036_v9, %v17286_v19  ;;  %v293_v23 = vld [vmem:[%s17255_s29 + $0x190] sm:$0xff] }
 0x1dc   : > { %v6225_v34 = vpop.f32.mrf.mxu0  ;;  %9584 = vmatmul.mubr.f32.vlgmr.msra.gmra.mxu0 %v1975_v3  ;;  %v6295_v35 = vpop.f32.mrf.mxu1  ;;  %9654 = vmatmul.mubr.f32.vlgmr.msra.gmra.mxu1 %v1982_v4  ;;  %v915_v3 = vld [vmem:[%s17262_s24 + $0x1200] sm:$0x3]  ;;  %v917_v4 = vld [vmem:[%s17262_s24 + $0x1210] sm:$0x3] }
 0x1dd   : > { %v6226_v36 = vadd.f32 %v6225_v34, %v6156_v21  ;;  %9688 = vmatpush1.xpose.msra.mxu0 %v907_v27  ;;  %9758 = vmatpush1.xpose.msra.mxu1 %v909_v28  ;;  %v2043_v21 = vrot.slane %v292_v2, %v17286_v19  ;;  %v538_v27 = vld [vmem:[%s17262_s24 + $0x638] sm:$0xff]  ;;  %v544_v2 = vld [vmem:[%s17262_s24 + $0x668] sm:$0xff] }
 0x1de   : > { %v6227_v37 = vpop.f32.mrf.mxu0  ;;  %v6297_v38 = vpop.f32.mrf.mxu1  ;;  %9689 = vmatprep.subr.mxu0 %v524_v29  ;;  %9759 = vmatprep.subr.mxu1 %v526_v30  ;;  %v2052_v29 = vcombine.high %v2050_v22, %v2050_v22  ;;  %v2053_v30 = vcombine.high %v293_v23, %v293_v23 }
 0x1df   : > { %v6296_v41 = vadd.f32 %v6295_v35, %v6226_v36  ;;  %9723 = vmatprep.mubr.f32.mxu0 %v2000_v31  ;;  %9793 = vmatprep.mubr.f32.mxu1 %v2001_v32  ;;  %v2051_v28 = vcombine.high %v2043_v21, %v2043_v21  ;;  %v535_v36 = vld [vmem:[%s17262_s24 + $0x620] sm:$0xff]  ;;  %v537_v37 = vld [vmem:[%s17262_s24 + $0x630] sm:$0xff] }
 0x1e1   : > { %9690 = vmatpush1.xpose.msra.mxu0 %v523_v39  ;;  %9760 = vmatpush1.xpose.msra.mxu1 %v525_v40  ;;  %v924_v39 = vld [vmem:[%s17262_s24 + $0x1248] sm:$0x3]  ;;  %v926_v40 = vld [vmem:[%s17262_s24 + $0x1258] sm:$0x3] }
 0x1e2   : > { %9827 = vmatprep.subr.mxu0 %v912_v42  ;;  %9897 = vmatprep.subr.mxu1 %v914_v43  ;;  %v2067_v42 = vrot.slane %v2053_v30, %v17286_v19  ;;  %v294_v43 = vld [vmem:[%s17255_s29 + $0x198] sm:$0xff] }
 0x1e4   : > { %v6365_v54 = vpop.f32.mrf.mxu0  ;;  %9724 = vmatmul.mubr.f32.vlgmr.msra.gmra.mxu0 %v1992_v24  ;;  %v6435_v55 = vpop.f32.mrf.mxu1  ;;  %9794 = vmatmul.mubr.f32.vlgmr.msra.gmra.mxu1 %v1999_v25  ;;  %v919_v24 = vld [vmem:[%s17262_s24 + $0x1220] sm:$0x3]  ;;  %v921_v25 = vld [vmem:[%s17262_s24 + $0x1230] sm:$0x3] }
 0x1e5   : > { %v6366_v56 = vadd.f32 %v6365_v54, %v6296_v41  ;;  %9828 = vmatpush1.xpose.msra.mxu0 %v911_v47  ;;  %9898 = vmatpush1.xpose.msra.mxu1 %v913_v48  ;;  %v2060_v41 = vrot.slane %v293_v23, %v17286_v19  ;;  %v542_v47 = vld [vmem:[%s17262_s24 + $0x658] sm:$0xff]  ;;  %v548_v23 = vld [vmem:[%s17262_s24 + $0x688] sm:$0xff] }
 0x1e6   : > { %v6367_v57 = vpop.f32.mrf.mxu0  ;;  %v6437_v58 = vpop.f32.mrf.mxu1  ;;  %9829 = vmatprep.subr.mxu0 %v528_v49  ;;  %9899 = vmatprep.subr.mxu1 %v530_v50  ;;  %v2069_v49 = vcombine.high %v2067_v42, %v2067_v42  ;;  %v2070_v50 = vcombine.high %v294_v43, %v294_v43 }
 0x1e7   : > { %v6436_v61 = vadd.f32 %v6435_v55, %v6366_v56  ;;  %9863 = vmatprep.mubr.f32.mxu0 %v2017_v51  ;;  %9933 = vmatprep.mubr.f32.mxu1 %v2018_v52  ;;  %v2068_v48 = vcombine.high %v2060_v41, %v2060_v41  ;;  %v539_v56 = vld [vmem:[%s17262_s24 + $0x640] sm:$0xff]  ;;  %v541_v57 = vld [vmem:[%s17262_s24 + $0x650] sm:$0xff] }
 0x1e9   : > { %9830 = vmatpush1.xpose.msra.mxu0 %v527_v59  ;;  %9900 = vmatpush1.xpose.msra.mxu1 %v529_v60  ;;  %v928_v59 = vld [vmem:[%s17262_s24 + $0x1268] sm:$0x3]  ;;  %v930_v60 = vld [vmem:[%s17262_s24 + $0x1278] sm:$0x3] }
 0x1ea   : > { %9967 = vmatprep.subr.mxu0 %v916_v62  ;;  %10037 = vmatprep.subr.mxu1 %v918_v63  ;;  %v2084_v62 = vrot.slane %v2070_v50, %v17286_v19  ;;  %v295_v63 = vld [vmem:[%s17255_s29 + $0x1a0] sm:$0xff] }
 0x1ec   : > { %v6505_v10 = vpop.f32.mrf.mxu0  ;;  %9864 = vmatmul.mubr.f32.vlgmr.msra.gmra.mxu0 %v2009_v44  ;;  %v6575_v11 = vpop.f32.mrf.mxu1  ;;  %9934 = vmatmul.mubr.f32.vlgmr.msra.gmra.mxu1 %v2016_v45  ;;  %v923_v44 = vld [vmem:[%s17262_s24 + $0x1240] sm:$0x3]  ;;  %v925_v45 = vld [vmem:[%s17262_s24 + $0x1250] sm:$0x3] }
 0x1ed   : > { %v6506_v12 = vadd.f32 %v6505_v10, %v6436_v61  ;;  %9968 = vmatpush1.xpose.msra.mxu0 %v915_v3  ;;  %10038 = vmatpush1.xpose.msra.mxu1 %v917_v4  ;;  %v2077_v61 = vrot.slane %v294_v43, %v17286_v19  ;;  %v546_v3 = vld [vmem:[%s17262_s24 + $0x678] sm:$0xff]  ;;  %v552_v43 = vld [vmem:[%s17262_s24 + $0x6a8] sm:$0xff] }
 0x1ee   : > { %v6507_v13 = vpop.f32.mrf.mxu0  ;;  %v6577_v14 = vpop.f32.mrf.mxu1  ;;  %9969 = vmatprep.subr.mxu0 %v532_v5  ;;  %10039 = vmatprep.subr.mxu1 %v534_v6  ;;  %v2086_v5 = vcombine.high %v2084_v62, %v2084_v62  ;;  %v2087_v6 = vcombine.high %v295_v63, %v295_v63 }
 0x1ef   : > { %v6576_v17 = vadd.f32 %v6575_v11, %v6506_v12  ;;  %10003 = vmatprep.mubr.f32.mxu0 %v2034_v7  ;;  %10073 = vmatprep.mubr.f32.mxu1 %v2035_v8  ;;  %v2085_v4 = vcombine.high %v2077_v61, %v2077_v61  ;;  %v543_v12 = vld [vmem:[%s17262_s24 + $0x660] sm:$0xff]  ;;  %v545_v13 = vld [vmem:[%s17262_s24 + $0x670] sm:$0xff] }
 0x1f1   : > { %9970 = vmatpush1.xpose.msra.mxu0 %v531_v15  ;;  %10040 = vmatpush1.xpose.msra.mxu1 %v533_v16  ;;  %v932_v15 = vld [vmem:[%s17262_s24 + $0x1288] sm:$0x3]  ;;  %v934_v16 = vld [vmem:[%s17262_s24 + $0x1298] sm:$0x3] }
 0x1f2   : > { %10107 = vmatprep.subr.mxu0 %v920_v18  ;;  %10177 = vmatprep.subr.mxu1 %v922_v20  ;;  %v2101_v18 = vrot.slane %v2087_v6, %v17286_v19  ;;  %v296_v20 = vld [vmem:[%s17255_s29 + $0x1a8] sm:$0xff] }
 0x1f4   : > { %v6645_v31 = vpop.f32.mrf.mxu0  ;;  %10004 = vmatmul.mubr.f32.vlgmr.msra.gmra.mxu0 %v2026_v0  ;;  %v6715_v32 = vpop.f32.mrf.mxu1  ;;  %10074 = vmatmul.mubr.f32.vlgmr.msra.gmra.mxu1 %v2033_v1  ;;  %v927_v0 = vld [vmem:[%s17262_s24 + $0x1260] sm:$0x3]  ;;  %v929_v1 = vld [vmem:[%s17262_s24 + $0x1270] sm:$0x3] }
 0x1f5   : > { %v6646_v33 = vadd.f32 %v6645_v31, %v6576_v17  ;;  %10108 = vmatpush1.xpose.msra.mxu0 %v919_v24  ;;  %10178 = vmatpush1.xpose.msra.mxu1 %v921_v25  ;;  %v2094_v17 = vrot.slane %v295_v63, %v17286_v19  ;;  %v550_v24 = vld [vmem:[%s17262_s24 + $0x698] sm:$0xff]  ;;  %v556_v63 = vld [vmem:[%s17262_s24 + $0x6c8] sm:$0xff] }
 0x1f6   : > { %v6647_v34 = vpop.f32.mrf.mxu0  ;;  %v6717_v35 = vpop.f32.mrf.mxu1  ;;  %10109 = vmatprep.subr.mxu0 %v536_v26  ;;  %10179 = vmatprep.subr.mxu1 %v538_v27  ;;  %v2103_v26 = vcombine.high %v2101_v18, %v2101_v18  ;;  %v2104_v27 = vcombine.high %v296_v20, %v296_v20 }
 0x1f7   : > { %v6716_v38 = vadd.f32 %v6715_v32, %v6646_v33  ;;  %10143 = vmatprep.mubr.f32.mxu0 %v2051_v28  ;;  %10213 = vmatprep.mubr.f32.mxu1 %v2052_v29  ;;  %v2102_v25 = vcombine.high %v2094_v17, %v2094_v17  ;;  %v547_v33 = vld [vmem:[%s17262_s24 + $0x680] sm:$0xff]  ;;  %v549_v34 = vld [vmem:[%s17262_s24 + $0x690] sm:$0xff] }
 0x1f9   : > { %10110 = vmatpush1.xpose.msra.mxu0 %v535_v36  ;;  %10180 = vmatpush1.xpose.msra.mxu1 %v537_v37  ;;  %v936_v36 = vld [vmem:[%s17262_s24 + $0x12a8] sm:$0x3]  ;;  %v938_v37 = vld [vmem:[%s17262_s24 + $0x12b8] sm:$0x3] }
 0x1fa   : > { %10247 = vmatprep.subr.mxu0 %v924_v39  ;;  %10317 = vmatprep.subr.mxu1 %v926_v40  ;;  %v2118_v39 = vrot.slane %v2104_v27, %v17286_v19  ;;  %v297_v40 = vld [vmem:[%s17255_s29 + $0x1b0] sm:$0xff] }
 0x1fc   : > { %v6785_v51 = vpop.f32.mrf.mxu0  ;;  %10144 = vmatmul.mubr.f32.vlgmr.msra.gmra.mxu0 %v2043_v21  ;;  %v6855_v52 = vpop.f32.mrf.mxu1  ;;  %10214 = vmatmul.mubr.f32.vlgmr.msra.gmra.mxu1 %v2050_v22  ;;  %v931_v21 = vld [vmem:[%s17262_s24 + $0x1280] sm:$0x3]  ;;  %v933_v22 = vld [vmem:[%s17262_s24 + $0x1290] sm:$0x3] }
 0x1fd   : > { %v6786_v53 = vadd.f32 %v6785_v51, %v6716_v38  ;;  %10248 = vmatpush1.xpose.msra.mxu0 %v923_v44  ;;  %10318 = vmatpush1.xpose.msra.mxu1 %v925_v45  ;;  %v2111_v38 = vrot.slane %v296_v20, %v17286_v19  ;;  %v554_v44 = vld [vmem:[%s17262_s24 + $0x6b8] sm:$0xff]  ;;  %v560_v20 = vld [vmem:[%s17262_s24 + $0x6e8] sm:$0xff] }
 0x1fe   : > { %v6787_v54 = vpop.f32.mrf.mxu0  ;;  %v6857_v55 = vpop.f32.mrf.mxu1  ;;  %10249 = vmatprep.subr.mxu0 %v540_v46  ;;  %10319 = vmatprep.subr.mxu1 %v542_v47  ;;  %v2120_v46 = vcombine.high %v2118_v39, %v2118_v39  ;;  %v2121_v47 = vcombine.high %v297_v40, %v297_v40 }
 0x1ff   : > { %v6856_v58 = vadd.f32 %v6855_v52, %v6786_v53  ;;  %10283 = vmatprep.mubr.f32.mxu0 %v2068_v48  ;;  %10353 = vmatprep.mubr.f32.mxu1 %v2069_v49  ;;  %v2119_v45 = vcombine.high %v2111_v38, %v2111_v38  ;;  %v551_v53 = vld [vmem:[%s17262_s24 + $0x6a0] sm:$0xff]  ;;  %v553_v54 = vld [vmem:[%s17262_s24 + $0x6b0] sm:$0xff] }
 0x201   : > { %10250 = vmatpush1.xpose.msra.mxu0 %v539_v56  ;;  %10320 = vmatpush1.xpose.msra.mxu1 %v541_v57  ;;  %v940_v56 = vld [vmem:[%s17262_s24 + $0x12c8] sm:$0x3]  ;;  %v942_v57 = vld [vmem:[%s17262_s24 + $0x12d8] sm:$0x3] }
 0x202   : > { %10387 = vmatprep.subr.mxu0 %v928_v59  ;;  %10457 = vmatprep.subr.mxu1 %v930_v60  ;;  %v2135_v59 = vrot.slane %v2121_v47, %v17286_v19  ;;  %v298_v60 = vld [vmem:[%s17255_s29 + $0x1b8] sm:$0xff] }
 0x204   : > { %v6925_v7 = vpop.f32.mrf.mxu0  ;;  %10284 = vmatmul.mubr.f32.vlgmr.msra.gmra.mxu0 %v2060_v41  ;;  %v6995_v8 = vpop.f32.mrf.mxu1  ;;  %10354 = vmatmul.mubr.f32.vlgmr.msra.gmra.mxu1 %v2067_v42  ;;  %v935_v41 = vld [vmem:[%s17262_s24 + $0x12a0] sm:$0x3]  ;;  %v937_v42 = vld [vmem:[%s17262_s24 + $0x12b0] sm:$0x3] }
 0x205   : > { %v6926_v9 = vadd.f32 %v6925_v7, %v6856_v58  ;;  %10388 = vmatpush1.xpose.msra.mxu0 %v927_v0  ;;  %10458 = vmatpush1.xpose.msra.mxu1 %v929_v1  ;;  %v2128_v58 = vrot.slane %v297_v40, %v17286_v19  ;;  %v558_v0 = vld [vmem:[%s17262_s24 + $0x6d8] sm:$0xff]  ;;  %v564_v40 = vld [vmem:[%s17262_s24 + $0x708] sm:$0xff] }
 0x206   : > { %v6927_v10 = vpop.f32.mrf.mxu0  ;;  %v6997_v11 = vpop.f32.mrf.mxu1  ;;  %10389 = vmatprep.subr.mxu0 %v544_v2  ;;  %10459 = vmatprep.subr.mxu1 %v546_v3  ;;  %v2137_v2 = vcombine.high %v2135_v59, %v2135_v59  ;;  %v2138_v3 = vcombine.high %v298_v60, %v298_v60 }
 0x207   : > { %v6996_v14 = vadd.f32 %v6995_v8, %v6926_v9  ;;  %10423 = vmatprep.mubr.f32.mxu0 %v2085_v4  ;;  %10493 = vmatprep.mubr.f32.mxu1 %v2086_v5  ;;  %v2136_v1 = vcombine.high %v2128_v58, %v2128_v58  ;;  %v555_v9 = vld [vmem:[%s17262_s24 + $0x6c0] sm:$0xff]  ;;  %v557_v10 = vld [vmem:[%s17262_s24 + $0x6d0] sm:$0xff] }
 0x209   : > { %10390 = vmatpush1.xpose.msra.mxu0 %v543_v12  ;;  %10460 = vmatpush1.xpose.msra.mxu1 %v545_v13  ;;  %v944_v12 = vld [vmem:[%s17262_s24 + $0x12e8] sm:$0x3]  ;;  %v946_v13 = vld [vmem:[%s17262_s24 + $0x12f8] sm:$0x3] }
 0x20a   : > { %10527 = vmatprep.subr.mxu0 %v932_v15  ;;  %10597 = vmatprep.subr.mxu1 %v934_v16  ;;  %v2152_v15 = vrot.slane %v2138_v3, %v17286_v19  ;;  %v299_v16 = vld [vmem:[%s17255_s29 + $0x1c0] sm:$0xff] }
 0x20c   : > { %v7065_v28 = vpop.f32.mrf.mxu0  ;;  %10424 = vmatmul.mubr.f32.vlgmr.msra.gmra.mxu0 %v2077_v61  ;;  %v7135_v29 = vpop.f32.mrf.mxu1  ;;  %10494 = vmatmul.mubr.f32.vlgmr.msra.gmra.mxu1 %v2084_v62  ;;  %v939_v61 = vld [vmem:[%s17262_s24 + $0x12c0] sm:$0x3]  ;;  %v941_v62 = vld [vmem:[%s17262_s24 + $0x12d0] sm:$0x3] }
 0x20d   : > { %v7066_v30 = vadd.f32 %v7065_v28, %v6996_v14  ;;  %10528 = vmatpush1.xpose.msra.mxu0 %v931_v21  ;;  %10598 = vmatpush1.xpose.msra.mxu1 %v933_v22  ;;  %v2145_v14 = vrot.slane %v298_v60, %v17286_v19  ;;  %v562_v21 = vld [vmem:[%s17262_s24 + $0x6f8] sm:$0xff]  ;;  %v568_v60 = vld [vmem:[%s17262_s24 + $0x728] sm:$0xff] }
 0x20e   : > { %v7067_v31 = vpop.f32.mrf.mxu0  ;;  %v7137_v32 = vpop.f32.mrf.mxu1  ;;  %10529 = vmatprep.subr.mxu0 %v548_v23  ;;  %10599 = vmatprep.subr.mxu1 %v550_v24  ;;  %v2154_v23 = vcombine.high %v2152_v15, %v2152_v15  ;;  %v2155_v24 = vcombine.high %v299_v16, %v299_v16 }
 0x20f   : > { %v7136_v35 = vadd.f32 %v7135_v29, %v7066_v30  ;;  %10563 = vmatprep.mubr.f32.mxu0 %v2102_v25  ;;  %10633 = vmatprep.mubr.f32.mxu1 %v2103_v26  ;;  %v2153_v22 = vcombine.high %v2145_v14, %v2145_v14  ;;  %v559_v30 = vld [vmem:[%s17262_s24 + $0x6e0] sm:$0xff]  ;;  %v561_v31 = vld [vmem:[%s17262_s24 + $0x6f0] sm:$0xff] }
 0x211   : > { %10530 = vmatpush1.xpose.msra.mxu0 %v547_v33  ;;  %10600 = vmatpush1.xpose.msra.mxu1 %v549_v34  ;;  %v948_v33 = vld [vmem:[%s17262_s24 + $0x1308] sm:$0x3]  ;;  %v950_v34 = vld [vmem:[%s17262_s24 + $0x1318] sm:$0x3] }
 0x212   : > { %10667 = vmatprep.subr.mxu0 %v936_v36  ;;  %10737 = vmatprep.subr.mxu1 %v938_v37  ;;  %v2169_v36 = vrot.slane %v2155_v24, %v17286_v19  ;;  %v300_v37 = vld [vmem:[%s17255_s29 + $0x1c8] sm:$0xff] }
 0x214   : > { %v7205_v48 = vpop.f32.mrf.mxu0  ;;  %10564 = vmatmul.mubr.f32.vlgmr.msra.gmra.mxu0 %v2094_v17  ;;  %v7275_v49 = vpop.f32.mrf.mxu1  ;;  %10634 = vmatmul.mubr.f32.vlgmr.msra.gmra.mxu1 %v2101_v18  ;;  %v943_v17 = vld [vmem:[%s17262_s24 + $0x12e0] sm:$0x3]  ;;  %v945_v18 = vld [vmem:[%s17262_s24 + $0x12f0] sm:$0x3] }
 0x215   : > { %v7206_v50 = vadd.f32 %v7205_v48, %v7136_v35  ;;  %10668 = vmatpush1.xpose.msra.mxu0 %v935_v41  ;;  %10738 = vmatpush1.xpose.msra.mxu1 %v937_v42  ;;  %v2162_v35 = vrot.slane %v299_v16, %v17286_v19  ;;  %v566_v41 = vld [vmem:[%s17262_s24 + $0x718] sm:$0xff]  ;;  %v572_v16 = vld [vmem:[%s17262_s24 + $0x748] sm:$0xff] }
 0x216   : > { %v7207_v51 = vpop.f32.mrf.mxu0  ;;  %v7277_v52 = vpop.f32.mrf.mxu1  ;;  %10669 = vmatprep.subr.mxu0 %v552_v43  ;;  %10739 = vmatprep.subr.mxu1 %v554_v44  ;;  %v2171_v43 = vcombine.high %v2169_v36, %v2169_v36  ;;  %v2172_v44 = vcombine.high %v300_v37, %v300_v37 }
 0x217   : > { %v7276_v55 = vadd.f32 %v7275_v49, %v7206_v50  ;;  %10703 = vmatprep.mubr.f32.mxu0 %v2119_v45  ;;  %10773 = vmatprep.mubr.f32.mxu1 %v2120_v46  ;;  %v2170_v42 = vcombine.high %v2162_v35, %v2162_v35  ;;  %v563_v50 = vld [vmem:[%s17262_s24 + $0x700] sm:$0xff]  ;;  %v565_v51 = vld [vmem:[%s17262_s24 + $0x710] sm:$0xff] }
 0x219   : > { %10670 = vmatpush1.xpose.msra.mxu0 %v551_v53  ;;  %10740 = vmatpush1.xpose.msra.mxu1 %v553_v54  ;;  %v952_v53 = vld [vmem:[%s17262_s24 + $0x1328] sm:$0x3]  ;;  %v954_v54 = vld [vmem:[%s17262_s24 + $0x1338] sm:$0x3] }
 0x21a   : > { %10807 = vmatprep.subr.mxu0 %v940_v56  ;;  %10877 = vmatprep.subr.mxu1 %v942_v57  ;;  %v2186_v56 = vrot.slane %v2172_v44, %v17286_v19  ;;  %v301_v57 = vld [vmem:[%s17255_s29 + $0x1d0] sm:$0xff] }
 0x21c   : > { %v7345_v4 = vpop.f32.mrf.mxu0  ;;  %10704 = vmatmul.mubr.f32.vlgmr.msra.gmra.mxu0 %v2111_v38  ;;  %v7415_v5 = vpop.f32.mrf.mxu1  ;;  %10774 = vmatmul.mubr.f32.vlgmr.msra.gmra.mxu1 %v2118_v39  ;;  %v947_v38 = vld [vmem:[%s17262_s24 + $0x1300] sm:$0x3]  ;;  %v949_v39 = vld [vmem:[%s17262_s24 + $0x1310] sm:$0x3] }
 0x21d   : > { %v7346_v6 = vadd.f32 %v7345_v4, %v7276_v55  ;;  %10808 = vmatpush1.xpose.msra.mxu0 %v939_v61  ;;  %10878 = vmatpush1.xpose.msra.mxu1 %v941_v62  ;;  %v2179_v55 = vrot.slane %v300_v37, %v17286_v19  ;;  %v570_v61 = vld [vmem:[%s17262_s24 + $0x738] sm:$0xff]  ;;  %v576_v37 = vld [vmem:[%s17262_s24 + $0x768] sm:$0xff] }
 0x21e   : > { %v7347_v7 = vpop.f32.mrf.mxu0  ;;  %v7417_v8 = vpop.f32.mrf.mxu1  ;;  %10809 = vmatprep.subr.mxu0 %v556_v63  ;;  %10879 = vmatprep.subr.mxu1 %v558_v0  ;;  %v2188_v63 = vcombine.high %v2186_v56, %v2186_v56  ;;  %v2189_v0 = vcombine.high %v301_v57, %v301_v57 }
 0x21f   : > { %v7416_v11 = vadd.f32 %v7415_v5, %v7346_v6  ;;  %10843 = vmatprep.mubr.f32.mxu0 %v2136_v1  ;;  %10913 = vmatprep.mubr.f32.mxu1 %v2137_v2  ;;  %v2187_v62 = vcombine.high %v2179_v55, %v2179_v55  ;;  %v567_v6 = vld [vmem:[%s17262_s24 + $0x720] sm:$0xff]  ;;  %v569_v7 = vld [vmem:[%s17262_s24 + $0x730] sm:$0xff] }
 0x221   : > { %10810 = vmatpush1.xpose.msra.mxu0 %v555_v9  ;;  %10880 = vmatpush1.xpose.msra.mxu1 %v557_v10  ;;  %v956_v9 = vld [vmem:[%s17262_s24 + $0x1348] sm:$0x3]  ;;  %v958_v10 = vld [vmem:[%s17262_s24 + $0x1358] sm:$0x3] }
 0x222   : > { %10947 = vmatprep.subr.mxu0 %v944_v12  ;;  %11017 = vmatprep.subr.mxu1 %v946_v13  ;;  %v2203_v12 = vrot.slane %v2189_v0, %v17286_v19  ;;  %v302_v13 = vld [vmem:[%s17255_s29 + $0x1d8] sm:$0xff] }
 0x224   : > { %v7485_v25 = vpop.f32.mrf.mxu0  ;;  %10844 = vmatmul.mubr.f32.vlgmr.msra.gmra.mxu0 %v2128_v58  ;;  %v7555_v26 = vpop.f32.mrf.mxu1  ;;  %10914 = vmatmul.mubr.f32.vlgmr.msra.gmra.mxu1 %v2135_v59  ;;  %v951_v58 = vld [vmem:[%s17262_s24 + $0x1320] sm:$0x3]  ;;  %v953_v59 = vld [vmem:[%s17262_s24 + $0x1330] sm:$0x3] }
 0x225   : > { %v7486_v27 = vadd.f32 %v7485_v25, %v7416_v11  ;;  %10948 = vmatpush1.xpose.msra.mxu0 %v943_v17  ;;  %11018 = vmatpush1.xpose.msra.mxu1 %v945_v18  ;;  %v2196_v11 = vrot.slane %v301_v57, %v17286_v19  ;;  %v574_v17 = vld [vmem:[%s17262_s24 + $0x758] sm:$0xff]  ;;  %v580_v57 = vld [vmem:[%s17262_s24 + $0x788] sm:$0xff] }
 0x226   : > { %v7487_v28 = vpop.f32.mrf.mxu0  ;;  %v7557_v29 = vpop.f32.mrf.mxu1  ;;  %10949 = vmatprep.subr.mxu0 %v560_v20  ;;  %11019 = vmatprep.subr.mxu1 %v562_v21  ;;  %v2205_v20 = vcombine.high %v2203_v12, %v2203_v12  ;;  %v2206_v21 = vcombine.high %v302_v13, %v302_v13 }
 0x227   : > { %v7556_v32 = vadd.f32 %v7555_v26, %v7486_v27  ;;  %10983 = vmatprep.mubr.f32.mxu0 %v2153_v22  ;;  %11053 = vmatprep.mubr.f32.mxu1 %v2154_v23  ;;  %v2204_v18 = vcombine.high %v2196_v11, %v2196_v11  ;;  %v571_v27 = vld [vmem:[%s17262_s24 + $0x740] sm:$0xff]  ;;  %v573_v28 = vld [vmem:[%s17262_s24 + $0x750] sm:$0xff] }
 0x229   : > { %10950 = vmatpush1.xpose.msra.mxu0 %v559_v30  ;;  %11020 = vmatpush1.xpose.msra.mxu1 %v561_v31  ;;  %v960_v30 = vld [vmem:[%s17262_s24 + $0x1368] sm:$0x3]  ;;  %v962_v31 = vld [vmem:[%s17262_s24 + $0x1378] sm:$0x3] }
 0x22a   : > { %11087 = vmatprep.subr.mxu0 %v948_v33  ;;  %11157 = vmatprep.subr.mxu1 %v950_v34  ;;  %v2220_v33 = vrot.slane %v2206_v21, %v17286_v19  ;;  %v303_v34 = vld [vmem:[%s17255_s29 + $0x1e0] sm:$0xff] }
 0x22c   : > { %v7625_v45 = vpop.f32.mrf.mxu0  ;;  %10984 = vmatmul.mubr.f32.vlgmr.msra.gmra.mxu0 %v2145_v14  ;;  %v7695_v46 = vpop.f32.mrf.mxu1  ;;  %11054 = vmatmul.mubr.f32.vlgmr.msra.gmra.mxu1 %v2152_v15  ;;  %v955_v14 = vld [vmem:[%s17262_s24 + $0x1340] sm:$0x3]  ;;  %v957_v15 = vld [vmem:[%s17262_s24 + $0x1350] sm:$0x3] }
 0x22d   : > { %v7626_v47 = vadd.f32 %v7625_v45, %v7556_v32  ;;  %11088 = vmatpush1.xpose.msra.mxu0 %v947_v38  ;;  %11158 = vmatpush1.xpose.msra.mxu1 %v949_v39  ;;  %v2213_v32 = vrot.slane %v302_v13, %v17286_v19  ;;  %v578_v38 = vld [vmem:[%s17262_s24 + $0x778] sm:$0xff]  ;;  %v584_v13 = vld [vmem:[%s17262_s24 + $0x7a8] sm:$0xff] }
 0x22e   : > { %v7627_v48 = vpop.f32.mrf.mxu0  ;;  %v7697_v49 = vpop.f32.mrf.mxu1  ;;  %11089 = vmatprep.subr.mxu0 %v564_v40  ;;  %11159 = vmatprep.subr.mxu1 %v566_v41  ;;  %v2222_v40 = vcombine.high %v2220_v33, %v2220_v33  ;;  %v2223_v41 = vcombine.high %v303_v34, %v303_v34 }
 0x22f   : > { %v7696_v52 = vadd.f32 %v7695_v46, %v7626_v47  ;;  %11123 = vmatprep.mubr.f32.mxu0 %v2170_v42  ;;  %11193 = vmatprep.mubr.f32.mxu1 %v2171_v43  ;;  %v2221_v39 = vcombine.high %v2213_v32, %v2213_v32  ;;  %v575_v47 = vld [vmem:[%s17262_s24 + $0x760] sm:$0xff]  ;;  %v577_v48 = vld [vmem:[%s17262_s24 + $0x770] sm:$0xff] }
 0x231   : > { %11090 = vmatpush1.xpose.msra.mxu0 %v563_v50  ;;  %11160 = vmatpush1.xpose.msra.mxu1 %v565_v51  ;;  %v964_v50 = vld [vmem:[%s17262_s24 + $0x1388] sm:$0x3]  ;;  %v966_v51 = vld [vmem:[%s17262_s24 + $0x1398] sm:$0x3] }
 0x232   : > { %11227 = vmatprep.subr.mxu0 %v952_v53  ;;  %11297 = vmatprep.subr.mxu1 %v954_v54  ;;  %v2237_v53 = vrot.slane %v2223_v41, %v17286_v19  ;;  %v304_v54 = vld [vmem:[%s17255_s29 + $0x1e8] sm:$0xff] }
 0x234   : > { %v7765_v1 = vpop.f32.mrf.mxu0  ;;  %11124 = vmatmul.mubr.f32.vlgmr.msra.gmra.mxu0 %v2162_v35  ;;  %v7835_v2 = vpop.f32.mrf.mxu1  ;;  %11194 = vmatmul.mubr.f32.vlgmr.msra.gmra.mxu1 %v2169_v36  ;;  %v959_v35 = vld [vmem:[%s17262_s24 + $0x1360] sm:$0x3]  ;;  %v961_v36 = vld [vmem:[%s17262_s24 + $0x1370] sm:$0x3] }
 0x235   : > { %v7766_v3 = vadd.f32 %v7765_v1, %v7696_v52  ;;  %11228 = vmatpush1.xpose.msra.mxu0 %v951_v58  ;;  %11298 = vmatpush1.xpose.msra.mxu1 %v953_v59  ;;  %v2230_v52 = vrot.slane %v303_v34, %v17286_v19  ;;  %v582_v58 = vld [vmem:[%s17262_s24 + $0x798] sm:$0xff]  ;;  %v588_v34 = vld [vmem:[%s17262_s24 + $0x7c8] sm:$0xff] }
 0x236   : > { %v7767_v4 = vpop.f32.mrf.mxu0  ;;  %v7837_v5 = vpop.f32.mrf.mxu1  ;;  %11229 = vmatprep.subr.mxu0 %v568_v60  ;;  %11299 = vmatprep.subr.mxu1 %v570_v61  ;;  %v2239_v60 = vcombine.high %v2237_v53, %v2237_v53  ;;  %v2240_v61 = vcombine.high %v304_v54, %v304_v54 }
 0x237   : > { %v7836_v8 = vadd.f32 %v7835_v2, %v7766_v3  ;;  %11263 = vmatprep.mubr.f32.mxu0 %v2187_v62  ;;  %11333 = vmatprep.mubr.f32.mxu1 %v2188_v63  ;;  %v2238_v59 = vcombine.high %v2230_v52, %v2230_v52  ;;  %v579_v3 = vld [vmem:[%s17262_s24 + $0x780] sm:$0xff]  ;;  %v581_v4 = vld [vmem:[%s17262_s24 + $0x790] sm:$0xff] }
 0x239   : > { %11230 = vmatpush1.xpose.msra.mxu0 %v567_v6  ;;  %11300 = vmatpush1.xpose.msra.mxu1 %v569_v7  ;;  %v968_v6 = vld [vmem:[%s17262_s24 + $0x13a8] sm:$0x3]  ;;  %v970_v7 = vld [vmem:[%s17262_s24 + $0x13b8] sm:$0x3] }
 0x23a   : > { %11367 = vmatprep.subr.mxu0 %v956_v9  ;;  %11437 = vmatprep.subr.mxu1 %v958_v10  ;;  %v2254_v9 = vrot.slane %v2240_v61, %v17286_v19  ;;  %v305_v10 = vld [vmem:[%s17255_s29 + $0x1f0] sm:$0xff] }
 0x23c   : > { %v7905_v22 = vpop.f32.mrf.mxu0  ;;  %11264 = vmatmul.mubr.f32.vlgmr.msra.gmra.mxu0 %v2179_v55  ;;  %v7975_v23 = vpop.f32.mrf.mxu1  ;;  %11334 = vmatmul.mubr.f32.vlgmr.msra.gmra.mxu1 %v2186_v56  ;;  %v963_v55 = vld [vmem:[%s17262_s24 + $0x1380] sm:$0x3]  ;;  %v965_v56 = vld [vmem:[%s17262_s24 + $0x1390] sm:$0x3] }
 0x23d   : > { %v7906_v24 = vadd.f32 %v7905_v22, %v7836_v8  ;;  %11368 = vmatpush1.xpose.msra.mxu0 %v955_v14  ;;  %11438 = vmatpush1.xpose.msra.mxu1 %v957_v15  ;;  %v2247_v8 = vrot.slane %v304_v54, %v17286_v19  ;;  %v586_v14 = vld [vmem:[%s17262_s24 + $0x7b8] sm:$0xff]  ;;  %v592_v54 = vld [vmem:[%s17262_s24 + $0x7e8] sm:$0xff] }
 0x23e   : > { %v7907_v25 = vpop.f32.mrf.mxu0  ;;  %v7977_v26 = vpop.f32.mrf.mxu1  ;;  %11369 = vmatprep.subr.mxu0 %v572_v16  ;;  %11439 = vmatprep.subr.mxu1 %v574_v17  ;;  %v2256_v16 = vcombine.high %v2254_v9, %v2254_v9  ;;  %v2257_v17 = vcombine.high %v305_v10, %v305_v10 }
 0x23f   : > { %v7976_v29 = vadd.f32 %v7975_v23, %v7906_v24  ;;  %11403 = vmatprep.mubr.f32.mxu0 %v2204_v18  ;;  %11473 = vmatprep.mubr.f32.mxu1 %v2205_v20  ;;  %v2255_v15 = vcombine.high %v2247_v8, %v2247_v8  ;;  %v583_v24 = vld [vmem:[%s17262_s24 + $0x7a0] sm:$0xff]  ;;  %v585_v25 = vld [vmem:[%s17262_s24 + $0x7b0] sm:$0xff] }
 0x241   : > { %11370 = vmatpush1.xpose.msra.mxu0 %v571_v27  ;;  %11440 = vmatpush1.xpose.msra.mxu1 %v573_v28  ;;  %v972_v27 = vld [vmem:[%s17262_s24 + $0x13c8] sm:$0x3]  ;;  %v974_v28 = vld [vmem:[%s17262_s24 + $0x13d8] sm:$0x3] }
 0x242   : > { %11507 = vmatprep.subr.mxu0 %v960_v30  ;;  %11577 = vmatprep.subr.mxu1 %v962_v31  ;;  %v2271_v30 = vrot.slane %v2257_v17, %v17286_v19  ;;  %v306_v31 = vld [vmem:[%s17255_s29 + $0x1f8] sm:$0xff] }
 0x244   : > { %v8045_v42 = vpop.f32.mrf.mxu0  ;;  %11404 = vmatmul.mubr.f32.vlgmr.msra.gmra.mxu0 %v2196_v11  ;;  %v8115_v43 = vpop.f32.mrf.mxu1  ;;  %11474 = vmatmul.mubr.f32.vlgmr.msra.gmra.mxu1 %v2203_v12  ;;  %v967_v11 = vld [vmem:[%s17262_s24 + $0x13a0] sm:$0x3]  ;;  %v969_v12 = vld [vmem:[%s17262_s24 + $0x13b0] sm:$0x3] }
 0x245   : > { %v8046_v44 = vadd.f32 %v8045_v42, %v7976_v29  ;;  %11508 = vmatpush1.xpose.msra.mxu0 %v959_v35  ;;  %11578 = vmatpush1.xpose.msra.mxu1 %v961_v36  ;;  %v2264_v29 = vrot.slane %v305_v10, %v17286_v19  ;;  %v590_v35 = vld [vmem:[%s17262_s24 + $0x7d8] sm:$0xff]  ;;  %v596_v10 = vld [vmem:[%s17262_s24 + $0x808] sm:$0xff] }
 0x246   : > { %v8047_v45 = vpop.f32.mrf.mxu0  ;;  %v8117_v46 = vpop.f32.mrf.mxu1  ;;  %11509 = vmatprep.subr.mxu0 %v576_v37  ;;  %11579 = vmatprep.subr.mxu1 %v578_v38  ;;  %v2273_v37 = vcombine.high %v2271_v30, %v2271_v30  ;;  %v2274_v38 = vcombine.high %v306_v31, %v306_v31 }
 0x247   : > { %v8116_v49 = vadd.f32 %v8115_v43, %v8046_v44  ;;  %11543 = vmatprep.mubr.f32.mxu0 %v2221_v39  ;;  %11613 = vmatprep.mubr.f32.mxu1 %v2222_v40  ;;  %v2272_v36 = vcombine.high %v2264_v29, %v2264_v29  ;;  %v587_v44 = vld [vmem:[%s17262_s24 + $0x7c0] sm:$0xff]  ;;  %v589_v45 = vld [vmem:[%s17262_s24 + $0x7d0] sm:$0xff] }
 0x249   : > { %11510 = vmatpush1.xpose.msra.mxu0 %v575_v47  ;;  %11580 = vmatpush1.xpose.msra.mxu1 %v577_v48  ;;  %v976_v47 = vld [vmem:[%s17262_s24 + $0x13e8] sm:$0x3]  ;;  %v978_v48 = vld [vmem:[%s17262_s24 + $0x13f8] sm:$0x3] }
 0x24a   : > { %11647 = vmatprep.subr.mxu0 %v964_v50  ;;  %11717 = vmatprep.subr.mxu1 %v966_v51  ;;  %v2288_v50 = vrot.slane %v2274_v38, %v17286_v19  ;;  %v307_v51 = vld [vmem:[%s17255_s29 + $0x200] sm:$0xff] }
 0x24c   : > { %v8185_v62 = vpop.f32.mrf.mxu0  ;;  %11544 = vmatmul.mubr.f32.vlgmr.msra.gmra.mxu0 %v2213_v32  ;;  %v8255_v63 = vpop.f32.mrf.mxu1  ;;  %11614 = vmatmul.mubr.f32.vlgmr.msra.gmra.mxu1 %v2220_v33  ;;  %v971_v32 = vld [vmem:[%s17262_s24 + $0x13c0] sm:$0x3]  ;;  %v973_v33 = vld [vmem:[%s17262_s24 + $0x13d0] sm:$0x3] }
 0x24d   : > { %v8186_v0 = vadd.f32 %v8185_v62, %v8116_v49  ;;  %11648 = vmatpush1.xpose.msra.mxu0 %v963_v55  ;;  %11718 = vmatpush1.xpose.msra.mxu1 %v965_v56  ;;  %v2281_v49 = vrot.slane %v306_v31, %v17286_v19  ;;  %v594_v55 = vld [vmem:[%s17262_s24 + $0x7f8] sm:$0xff]  ;;  %v600_v31 = vld [vmem:[%s17262_s24 + $0x828] sm:$0xff] }
 0x24e   : > { %v8187_v1 = vpop.f32.mrf.mxu0  ;;  %v8257_v2 = vpop.f32.mrf.mxu1  ;;  %11649 = vmatprep.subr.mxu0 %v580_v57  ;;  %11719 = vmatprep.subr.mxu1 %v582_v58  ;;  %v2290_v57 = vcombine.high %v2288_v50, %v2288_v50  ;;  %v2291_v58 = vcombine.high %v307_v51, %v307_v51 }
 0x24f   : > { %v8256_v5 = vadd.f32 %v8255_v63, %v8186_v0  ;;  %11683 = vmatprep.mubr.f32.mxu0 %v2238_v59  ;;  %11753 = vmatprep.mubr.f32.mxu1 %v2239_v60  ;;  %v2289_v56 = vcombine.high %v2281_v49, %v2281_v49  ;;  %v591_v0 = vld [vmem:[%s17262_s24 + $0x7e0] sm:$0xff]  ;;  %v593_v1 = vld [vmem:[%s17262_s24 + $0x7f0] sm:$0xff] }
 0x251   : > { %11650 = vmatpush1.xpose.msra.mxu0 %v579_v3  ;;  %11720 = vmatpush1.xpose.msra.mxu1 %v581_v4  ;;  %v980_v3 = vld [vmem:[%s17262_s24 + $0x1408] sm:$0x3]  ;;  %v982_v4 = vld [vmem:[%s17262_s24 + $0x1418] sm:$0x3] }
 0x252   : > { %11787 = vmatprep.subr.mxu0 %v968_v6  ;;  %11857 = vmatprep.subr.mxu1 %v970_v7  ;;  %v2305_v6 = vrot.slane %v2291_v58, %v17286_v19  ;;  %v308_v7 = vld [vmem:[%s17255_s29 + $0x208] sm:$0xff] }
 0x254   : > { %v8325_v18 = vpop.f32.mrf.mxu0  ;;  %11684 = vmatmul.mubr.f32.vlgmr.msra.gmra.mxu0 %v2230_v52  ;;  %v8395_v20 = vpop.f32.mrf.mxu1  ;;  %11754 = vmatmul.mubr.f32.vlgmr.msra.gmra.mxu1 %v2237_v53  ;;  %v975_v52 = vld [vmem:[%s17262_s24 + $0x13e0] sm:$0x3]  ;;  %v977_v53 = vld [vmem:[%s17262_s24 + $0x13f0] sm:$0x3] }
 0x255   : > { %v8326_v21 = vadd.f32 %v8325_v18, %v8256_v5  ;;  %11788 = vmatpush1.xpose.msra.mxu0 %v967_v11  ;;  %11858 = vmatpush1.xpose.msra.mxu1 %v969_v12  ;;  %v2298_v5 = vrot.slane %v307_v51, %v17286_v19  ;;  %v598_v11 = vld [vmem:[%s17262_s24 + $0x818] sm:$0xff]  ;;  %v604_v51 = vld [vmem:[%s17262_s24 + $0x848] sm:$0xff] }
 0x256   : > { %v8327_v22 = vpop.f32.mrf.mxu0  ;;  %v8397_v23 = vpop.f32.mrf.mxu1  ;;  %11789 = vmatprep.subr.mxu0 %v584_v13  ;;  %11859 = vmatprep.subr.mxu1 %v586_v14  ;;  %v2307_v13 = vcombine.high %v2305_v6, %v2305_v6  ;;  %v2308_v14 = vcombine.high %v308_v7, %v308_v7 }
 0x257   : > { %v8396_v26 = vadd.f32 %v8395_v20, %v8326_v21  ;;  %11823 = vmatprep.mubr.f32.mxu0 %v2255_v15  ;;  %11893 = vmatprep.mubr.f32.mxu1 %v2256_v16  ;;  %v2306_v12 = vcombine.high %v2298_v5, %v2298_v5  ;;  %v595_v21 = vld [vmem:[%s17262_s24 + $0x800] sm:$0xff]  ;;  %v597_v22 = vld [vmem:[%s17262_s24 + $0x810] sm:$0xff] }
 0x259   : > { %11790 = vmatpush1.xpose.msra.mxu0 %v583_v24  ;;  %11860 = vmatpush1.xpose.msra.mxu1 %v585_v25  ;;  %v984_v24 = vld [vmem:[%s17262_s24 + $0x1428] sm:$0x3]  ;;  %v986_v25 = vld [vmem:[%s17262_s24 + $0x1438] sm:$0x3] }
 0x25a   : > { %11927 = vmatprep.subr.mxu0 %v972_v27  ;;  %11997 = vmatprep.subr.mxu1 %v974_v28  ;;  %v2322_v27 = vrot.slane %v2308_v14, %v17286_v19  ;;  %v309_v28 = vld [vmem:[%s17255_s29 + $0x210] sm:$0xff] }
 0x25c   : > { %v8465_v39 = vpop.f32.mrf.mxu0  ;;  %11824 = vmatmul.mubr.f32.vlgmr.msra.gmra.mxu0 %v2247_v8  ;;  %v8535_v40 = vpop.f32.mrf.mxu1  ;;  %11894 = vmatmul.mubr.f32.vlgmr.msra.gmra.mxu1 %v2254_v9  ;;  %v979_v8 = vld [vmem:[%s17262_s24 + $0x1400] sm:$0x3]  ;;  %v981_v9 = vld [vmem:[%s17262_s24 + $0x1410] sm:$0x3] }
 0x25d   : > { %v8466_v41 = vadd.f32 %v8465_v39, %v8396_v26  ;;  %11928 = vmatpush1.xpose.msra.mxu0 %v971_v32  ;;  %11998 = vmatpush1.xpose.msra.mxu1 %v973_v33  ;;  %v2315_v26 = vrot.slane %v308_v7, %v17286_v19  ;;  %v602_v32 = vld [vmem:[%s17262_s24 + $0x838] sm:$0xff]  ;;  %v608_v7 = vld [vmem:[%s17262_s24 + $0x868] sm:$0xff] }
 0x25e   : > { %v8467_v42 = vpop.f32.mrf.mxu0  ;;  %v8537_v43 = vpop.f32.mrf.mxu1  ;;  %11929 = vmatprep.subr.mxu0 %v588_v34  ;;  %11999 = vmatprep.subr.mxu1 %v590_v35  ;;  %v2324_v34 = vcombine.high %v2322_v27, %v2322_v27  ;;  %v2325_v35 = vcombine.high %v309_v28, %v309_v28 }
 0x25f   : > { %v8536_v46 = vadd.f32 %v8535_v40, %v8466_v41  ;;  %11963 = vmatprep.mubr.f32.mxu0 %v2272_v36  ;;  %12033 = vmatprep.mubr.f32.mxu1 %v2273_v37  ;;  %v2323_v33 = vcombine.high %v2315_v26, %v2315_v26  ;;  %v599_v41 = vld [vmem:[%s17262_s24 + $0x820] sm:$0xff]  ;;  %v601_v42 = vld [vmem:[%s17262_s24 + $0x830] sm:$0xff] }
 0x261   : > { %11930 = vmatpush1.xpose.msra.mxu0 %v587_v44  ;;  %12000 = vmatpush1.xpose.msra.mxu1 %v589_v45  ;;  %v988_v44 = vld [vmem:[%s17262_s24 + $0x1448] sm:$0x3]  ;;  %v990_v45 = vld [vmem:[%s17262_s24 + $0x1458] sm:$0x3] }
 0x262   : > { %12067 = vmatprep.subr.mxu0 %v976_v47  ;;  %12137 = vmatprep.subr.mxu1 %v978_v48  ;;  %v2339_v47 = vrot.slane %v2325_v35, %v17286_v19  ;;  %v310_v48 = vld [vmem:[%s17255_s29 + $0x218] sm:$0xff] }
 0x264   : > { %v8605_v59 = vpop.f32.mrf.mxu0  ;;  %11964 = vmatmul.mubr.f32.vlgmr.msra.gmra.mxu0 %v2264_v29  ;;  %v8675_v60 = vpop.f32.mrf.mxu1  ;;  %12034 = vmatmul.mubr.f32.vlgmr.msra.gmra.mxu1 %v2271_v30  ;;  %v983_v29 = vld [vmem:[%s17262_s24 + $0x1420] sm:$0x3]  ;;  %v985_v30 = vld [vmem:[%s17262_s24 + $0x1430] sm:$0x3] }
 0x265   : > { %v8606_v61 = vadd.f32 %v8605_v59, %v8536_v46  ;;  %12068 = vmatpush1.xpose.msra.mxu0 %v975_v52  ;;  %12138 = vmatpush1.xpose.msra.mxu1 %v977_v53  ;;  %v2332_v46 = vrot.slane %v309_v28, %v17286_v19  ;;  %v606_v52 = vld [vmem:[%s17262_s24 + $0x858] sm:$0xff]  ;;  %v612_v28 = vld [vmem:[%s17262_s24 + $0x888] sm:$0xff] }
 0x266   : > { %v8607_v62 = vpop.f32.mrf.mxu0  ;;  %v8677_v63 = vpop.f32.mrf.mxu1  ;;  %12069 = vmatprep.subr.mxu0 %v592_v54  ;;  %12139 = vmatprep.subr.mxu1 %v594_v55  ;;  %v2341_v54 = vcombine.high %v2339_v47, %v2339_v47  ;;  %v2342_v55 = vcombine.high %v310_v48, %v310_v48 }
 0x267   : > { %v8676_v2 = vadd.f32 %v8675_v60, %v8606_v61  ;;  %12103 = vmatprep.mubr.f32.mxu0 %v2289_v56  ;;  %12173 = vmatprep.mubr.f32.mxu1 %v2290_v57  ;;  %v2340_v53 = vcombine.high %v2332_v46, %v2332_v46  ;;  %v603_v61 = vld [vmem:[%s17262_s24 + $0x840] sm:$0xff]  ;;  %v605_v62 = vld [vmem:[%s17262_s24 + $0x850] sm:$0xff] }
 0x269   : > { %12070 = vmatpush1.xpose.msra.mxu0 %v591_v0  ;;  %12140 = vmatpush1.xpose.msra.mxu1 %v593_v1  ;;  %v992_v0 = vld [vmem:[%s17262_s24 + $0x1468] sm:$0x3]  ;;  %v994_v1 = vld [vmem:[%s17262_s24 + $0x1478] sm:$0x3] }
 0x26a   : > { %12207 = vmatprep.subr.mxu0 %v980_v3  ;;  %12277 = vmatprep.subr.mxu1 %v982_v4  ;;  %v2356_v3 = vrot.slane %v2342_v55, %v17286_v19  ;;  %v311_v4 = vld [vmem:[%s17255_s29 + $0x220] sm:$0xff] }
 0x26c   : > { %v8745_v15 = vpop.f32.mrf.mxu0  ;;  %12104 = vmatmul.mubr.f32.vlgmr.msra.gmra.mxu0 %v2281_v49  ;;  %v8815_v16 = vpop.f32.mrf.mxu1  ;;  %12174 = vmatmul.mubr.f32.vlgmr.msra.gmra.mxu1 %v2288_v50  ;;  %v987_v49 = vld [vmem:[%s17262_s24 + $0x1440] sm:$0x3]  ;;  %v989_v50 = vld [vmem:[%s17262_s24 + $0x1450] sm:$0x3] }
 0x26d   : > { %v8746_v17 = vadd.f32 %v8745_v15, %v8676_v2  ;;  %12208 = vmatpush1.xpose.msra.mxu0 %v979_v8  ;;  %12278 = vmatpush1.xpose.msra.mxu1 %v981_v9  ;;  %v2349_v2 = vrot.slane %v310_v48, %v17286_v19  ;;  %v610_v8 = vld [vmem:[%s17262_s24 + $0x878] sm:$0xff]  ;;  %v616_v48 = vld [vmem:[%s17262_s24 + $0x8a8] sm:$0xff] }
 0x26e   : > { %v8747_v18 = vpop.f32.mrf.mxu0  ;;  %v8817_v20 = vpop.f32.mrf.mxu1  ;;  %12209 = vmatprep.subr.mxu0 %v596_v10  ;;  %12279 = vmatprep.subr.mxu1 %v598_v11  ;;  %v2358_v10 = vcombine.high %v2356_v3, %v2356_v3  ;;  %v2359_v11 = vcombine.high %v311_v4, %v311_v4 }
 0x26f   : > { %v8816_v23 = vadd.f32 %v8815_v16, %v8746_v17  ;;  %12243 = vmatprep.mubr.f32.mxu0 %v2306_v12  ;;  %12313 = vmatprep.mubr.f32.mxu1 %v2307_v13  ;;  %v2357_v9 = vcombine.high %v2349_v2, %v2349_v2  ;;  %v607_v17 = vld [vmem:[%s17262_s24 + $0x860] sm:$0xff]  ;;  %v609_v18 = vld [vmem:[%s17262_s24 + $0x870] sm:$0xff] }
 0x271   : > { %12210 = vmatpush1.xpose.msra.mxu0 %v595_v21  ;;  %12280 = vmatpush1.xpose.msra.mxu1 %v597_v22  ;;  %v996_v21 = vld [vmem:[%s17262_s24 + $0x1488] sm:$0x3]  ;;  %v998_v22 = vld [vmem:[%s17262_s24 + $0x1498] sm:$0x3] }
 0x272   : > { %12347 = vmatprep.subr.mxu0 %v984_v24  ;;  %12417 = vmatprep.subr.mxu1 %v986_v25  ;;  %v2373_v24 = vrot.slane %v2359_v11, %v17286_v19  ;;  %v312_v25 = vld [vmem:[%s17255_s29 + $0x228] sm:$0xff] }
 0x274   : > { %v8885_v36 = vpop.f32.mrf.mxu0  ;;  %12244 = vmatmul.mubr.f32.vlgmr.msra.gmra.mxu0 %v2298_v5  ;;  %v8955_v37 = vpop.f32.mrf.mxu1  ;;  %12314 = vmatmul.mubr.f32.vlgmr.msra.gmra.mxu1 %v2305_v6  ;;  %v991_v5 = vld [vmem:[%s17262_s24 + $0x1460] sm:$0x3]  ;;  %v993_v6 = vld [vmem:[%s17262_s24 + $0x1470] sm:$0x3] }
 0x275   : > { %v8886_v38 = vadd.f32 %v8885_v36, %v8816_v23  ;;  %12348 = vmatpush1.xpose.msra.mxu0 %v983_v29  ;;  %12418 = vmatpush1.xpose.msra.mxu1 %v985_v30  ;;  %v2366_v23 = vrot.slane %v311_v4, %v17286_v19  ;;  %v614_v29 = vld [vmem:[%s17262_s24 + $0x898] sm:$0xff]  ;;  %v620_v4 = vld [vmem:[%s17262_s24 + $0x8c8] sm:$0xff] }
 0x276   : > { %v8887_v39 = vpop.f32.mrf.mxu0  ;;  %v8957_v40 = vpop.f32.mrf.mxu1  ;;  %12349 = vmatprep.subr.mxu0 %v600_v31  ;;  %12419 = vmatprep.subr.mxu1 %v602_v32  ;;  %v2375_v31 = vcombine.high %v2373_v24, %v2373_v24  ;;  %v2376_v32 = vcombine.high %v312_v25, %v312_v25 }
 0x277   : > { %v8956_v43 = vadd.f32 %v8955_v37, %v8886_v38  ;;  %12383 = vmatprep.mubr.f32.mxu0 %v2323_v33  ;;  %12453 = vmatprep.mubr.f32.mxu1 %v2324_v34  ;;  %v2374_v30 = vcombine.high %v2366_v23, %v2366_v23  ;;  %v611_v38 = vld [vmem:[%s17262_s24 + $0x880] sm:$0xff]  ;;  %v613_v39 = vld [vmem:[%s17262_s24 + $0x890] sm:$0xff] }
 0x279   : > { %12350 = vmatpush1.xpose.msra.mxu0 %v599_v41  ;;  %12420 = vmatpush1.xpose.msra.mxu1 %v601_v42  ;;  %v1000_v41 = vld [vmem:[%s17262_s24 + $0x14a8] sm:$0x3]  ;;  %v1002_v42 = vld [vmem:[%s17262_s24 + $0x14b8] sm:$0x3] }
 0x27a   : > { %12487 = vmatprep.subr.mxu0 %v988_v44  ;;  %12557 = vmatprep.subr.mxu1 %v990_v45  ;;  %v2390_v44 = vrot.slane %v2376_v32, %v17286_v19  ;;  %v313_v45 = vld [vmem:[%s17255_s29 + $0x230] sm:$0xff] }
 0x27c   : > { %v9025_v56 = vpop.f32.mrf.mxu0  ;;  %12384 = vmatmul.mubr.f32.vlgmr.msra.gmra.mxu0 %v2315_v26  ;;  %v9095_v57 = vpop.f32.mrf.mxu1  ;;  %12454 = vmatmul.mubr.f32.vlgmr.msra.gmra.mxu1 %v2322_v27  ;;  %v995_v26 = vld [vmem:[%s17262_s24 + $0x1480] sm:$0x3]  ;;  %v997_v27 = vld [vmem:[%s17262_s24 + $0x1490] sm:$0x3] }
 0x27d   : > { %v9026_v58 = vadd.f32 %v9025_v56, %v8956_v43  ;;  %12488 = vmatpush1.xpose.msra.mxu0 %v987_v49  ;;  %12558 = vmatpush1.xpose.msra.mxu1 %v989_v50  ;;  %v2383_v43 = vrot.slane %v312_v25, %v17286_v19  ;;  %v618_v49 = vld [vmem:[%s17262_s24 + $0x8b8] sm:$0xff]  ;;  %v624_v25 = vld [vmem:[%s17262_s24 + $0x8e8] sm:$0xff] }
 0x27e   : > { %v9027_v59 = vpop.f32.mrf.mxu0  ;;  %v9097_v60 = vpop.f32.mrf.mxu1  ;;  %12489 = vmatprep.subr.mxu0 %v604_v51  ;;  %12559 = vmatprep.subr.mxu1 %v606_v52  ;;  %v2392_v51 = vcombine.high %v2390_v44, %v2390_v44  ;;  %v2393_v52 = vcombine.high %v313_v45, %v313_v45 }
 0x27f   : > { %v9096_v63 = vadd.f32 %v9095_v57, %v9026_v58  ;;  %12523 = vmatprep.mubr.f32.mxu0 %v2340_v53  ;;  %12593 = vmatprep.mubr.f32.mxu1 %v2341_v54  ;;  %v2391_v50 = vcombine.high %v2383_v43, %v2383_v43  ;;  %v615_v58 = vld [vmem:[%s17262_s24 + $0x8a0] sm:$0xff]  ;;  %v617_v59 = vld [vmem:[%s17262_s24 + $0x8b0] sm:$0xff] }
 0x281   : > { %12490 = vmatpush1.xpose.msra.mxu0 %v603_v61  ;;  %12560 = vmatpush1.xpose.msra.mxu1 %v605_v62  ;;  %v1004_v61 = vld [vmem:[%s17262_s24 + $0x14c8] sm:$0x3]  ;;  %v1006_v62 = vld [vmem:[%s17262_s24 + $0x14d8] sm:$0x3] }
 0x282   : > { %12627 = vmatprep.subr.mxu0 %v992_v0  ;;  %12697 = vmatprep.subr.mxu1 %v994_v1  ;;  %v2407_v0 = vrot.slane %v2393_v52, %v17286_v19  ;;  %v314_v1 = vld [vmem:[%s17255_s29 + $0x238] sm:$0xff] }
 0x284   : > { %v9165_v12 = vpop.f32.mrf.mxu0  ;;  %12524 = vmatmul.mubr.f32.vlgmr.msra.gmra.mxu0 %v2332_v46  ;;  %v9235_v13 = vpop.f32.mrf.mxu1  ;;  %12594 = vmatmul.mubr.f32.vlgmr.msra.gmra.mxu1 %v2339_v47  ;;  %v999_v46 = vld [vmem:[%s17262_s24 + $0x14a0] sm:$0x3]  ;;  %v1001_v47 = vld [vmem:[%s17262_s24 + $0x14b0] sm:$0x3] }
 0x285   : > { %v9166_v14 = vadd.f32 %v9165_v12, %v9096_v63  ;;  %12628 = vmatpush1.xpose.msra.mxu0 %v991_v5  ;;  %12698 = vmatpush1.xpose.msra.mxu1 %v993_v6  ;;  %v2400_v63 = vrot.slane %v313_v45, %v17286_v19  ;;  %v622_v5 = vld [vmem:[%s17262_s24 + $0x8d8] sm:$0xff]  ;;  %v628_v45 = vld [vmem:[%s17262_s24 + $0x908] sm:$0xff] }
 0x286   : > { %v9167_v15 = vpop.f32.mrf.mxu0  ;;  %v9237_v16 = vpop.f32.mrf.mxu1  ;;  %12629 = vmatprep.subr.mxu0 %v608_v7  ;;  %12699 = vmatprep.subr.mxu1 %v610_v8  ;;  %v2409_v7 = vcombine.high %v2407_v0, %v2407_v0  ;;  %v2410_v8 = vcombine.high %v314_v1, %v314_v1 }
 0x287   : > { %v9236_v20 = vadd.f32 %v9235_v13, %v9166_v14  ;;  %12663 = vmatprep.mubr.f32.mxu0 %v2357_v9  ;;  %12733 = vmatprep.mubr.f32.mxu1 %v2358_v10  ;;  %v2408_v6 = vcombine.high %v2400_v63, %v2400_v63  ;;  %v619_v14 = vld [vmem:[%s17262_s24 + $0x8c0] sm:$0xff]  ;;  %v621_v15 = vld [vmem:[%s17262_s24 + $0x8d0] sm:$0xff] }
 0x289   : > { %12630 = vmatpush1.xpose.msra.mxu0 %v607_v17  ;;  %12700 = vmatpush1.xpose.msra.mxu1 %v609_v18  ;;  %v1008_v17 = vld [vmem:[%s17262_s24 + $0x14e8] sm:$0x3]  ;;  %v1010_v18 = vld [vmem:[%s17262_s24 + $0x14f8] sm:$0x3] }
 0x28a   : > { %12767 = vmatprep.subr.mxu0 %v996_v21  ;;  %12837 = vmatprep.subr.mxu1 %v998_v22  ;;  %v2424_v21 = vrot.slane %v2410_v8, %v17286_v19  ;;  %v315_v22 = vld [vmem:[%s17255_s29 + $0x240] sm:$0xff] }
 0x28c   : > { %v9305_v33 = vpop.f32.mrf.mxu0  ;;  %12664 = vmatmul.mubr.f32.vlgmr.msra.gmra.mxu0 %v2349_v2  ;;  %v9375_v34 = vpop.f32.mrf.mxu1  ;;  %12734 = vmatmul.mubr.f32.vlgmr.msra.gmra.mxu1 %v2356_v3  ;;  %v1003_v2 = vld [vmem:[%s17262_s24 + $0x14c0] sm:$0x3]  ;;  %v1005_v3 = vld [vmem:[%s17262_s24 + $0x14d0] sm:$0x3] }
 0x28d   : > { %v9306_v35 = vadd.f32 %v9305_v33, %v9236_v20  ;;  %12768 = vmatpush1.xpose.msra.mxu0 %v995_v26  ;;  %12838 = vmatpush1.xpose.msra.mxu1 %v997_v27  ;;  %v2417_v20 = vrot.slane %v314_v1, %v17286_v19  ;;  %v626_v26 = vld [vmem:[%s17262_s24 + $0x8f8] sm:$0xff]  ;;  %v632_v1 = vld [vmem:[%s17262_s24 + $0x928] sm:$0xff] }
 0x28e   : > { %v9307_v36 = vpop.f32.mrf.mxu0  ;;  %v9377_v37 = vpop.f32.mrf.mxu1  ;;  %12769 = vmatprep.subr.mxu0 %v612_v28  ;;  %12839 = vmatprep.subr.mxu1 %v614_v29  ;;  %v2426_v28 = vcombine.high %v2424_v21, %v2424_v21  ;;  %v2427_v29 = vcombine.high %v315_v22, %v315_v22 }
 0x28f   : > { %v9376_v40 = vadd.f32 %v9375_v34, %v9306_v35  ;;  %12803 = vmatprep.mubr.f32.mxu0 %v2374_v30  ;;  %12873 = vmatprep.mubr.f32.mxu1 %v2375_v31  ;;  %v2425_v27 = vcombine.high %v2417_v20, %v2417_v20  ;;  %v623_v35 = vld [vmem:[%s17262_s24 + $0x8e0] sm:$0xff]  ;;  %v625_v36 = vld [vmem:[%s17262_s24 + $0x8f0] sm:$0xff] }
 0x291   : > { %12770 = vmatpush1.xpose.msra.mxu0 %v611_v38  ;;  %12840 = vmatpush1.xpose.msra.mxu1 %v613_v39  ;;  %v1012_v38 = vld [vmem:[%s17262_s24 + $0x1508] sm:$0x3]  ;;  %v1014_v39 = vld [vmem:[%s17262_s24 + $0x1518] sm:$0x3] }
 0x292   : > { %12907 = vmatprep.subr.mxu0 %v1000_v41  ;;  %12977 = vmatprep.subr.mxu1 %v1002_v42  ;;  %v2441_v41 = vrot.slane %v2427_v29, %v17286_v19  ;;  %v316_v42 = vld [vmem:[%s17255_s29 + $0x248] sm:$0xff] }
 0x294   : > { %v9445_v53 = vpop.f32.mrf.mxu0  ;;  %12804 = vmatmul.mubr.f32.vlgmr.msra.gmra.mxu0 %v2366_v23  ;;  %v9515_v54 = vpop.f32.mrf.mxu1  ;;  %12874 = vmatmul.mubr.f32.vlgmr.msra.gmra.mxu1 %v2373_v24  ;;  %v1007_v23 = vld [vmem:[%s17262_s24 + $0x14e0] sm:$0x3]  ;;  %v1009_v24 = vld [vmem:[%s17262_s24 + $0x14f0] sm:$0x3] }
 0x295   : > { %v9446_v55 = vadd.f32 %v9445_v53, %v9376_v40  ;;  %12908 = vmatpush1.xpose.msra.mxu0 %v999_v46  ;;  %12978 = vmatpush1.xpose.msra.mxu1 %v1001_v47  ;;  %v2434_v40 = vrot.slane %v315_v22, %v17286_v19  ;;  %v630_v46 = vld [vmem:[%s17262_s24 + $0x918] sm:$0xff]  ;;  %v636_v22 = vld [vmem:[%s17262_s24 + $0x948] sm:$0xff] }
 0x296   : > { %v9447_v56 = vpop.f32.mrf.mxu0  ;;  %v9517_v57 = vpop.f32.mrf.mxu1  ;;  %12909 = vmatprep.subr.mxu0 %v616_v48  ;;  %12979 = vmatprep.subr.mxu1 %v618_v49  ;;  %v2443_v48 = vcombine.high %v2441_v41, %v2441_v41  ;;  %v2444_v49 = vcombine.high %v316_v42, %v316_v42 }
 0x297   : > { %v9516_v60 = vadd.f32 %v9515_v54, %v9446_v55  ;;  %12943 = vmatprep.mubr.f32.mxu0 %v2391_v50  ;;  %13013 = vmatprep.mubr.f32.mxu1 %v2392_v51  ;;  %v2442_v47 = vcombine.high %v2434_v40, %v2434_v40  ;;  %v627_v55 = vld [vmem:[%s17262_s24 + $0x900] sm:$0xff]  ;;  %v629_v56 = vld [vmem:[%s17262_s24 + $0x910] sm:$0xff] }
 0x299   : > { %12910 = vmatpush1.xpose.msra.mxu0 %v615_v58  ;;  %12980 = vmatpush1.xpose.msra.mxu1 %v617_v59  ;;  %v1016_v58 = vld [vmem:[%s17262_s24 + $0x1528] sm:$0x3]  ;;  %v1018_v59 = vld [vmem:[%s17262_s24 + $0x1538] sm:$0x3] }
 0x29a   : > { %13047 = vmatprep.subr.mxu0 %v1004_v61  ;;  %13117 = vmatprep.subr.mxu1 %v1006_v62  ;;  %v2458_v61 = vrot.slane %v2444_v49, %v17286_v19  ;;  %v317_v62 = vld [vmem:[%s17255_s29 + $0x250] sm:$0xff] }
 0x29c   : > { %v9585_v9 = vpop.f32.mrf.mxu0  ;;  %12944 = vmatmul.mubr.f32.vlgmr.msra.gmra.mxu0 %v2383_v43  ;;  %v9655_v10 = vpop.f32.mrf.mxu1  ;;  %13014 = vmatmul.mubr.f32.vlgmr.msra.gmra.mxu1 %v2390_v44  ;;  %v1011_v43 = vld [vmem:[%s17262_s24 + $0x1500] sm:$0x3]  ;;  %v1013_v44 = vld [vmem:[%s17262_s24 + $0x1510] sm:$0x3] }
 0x29d   : > { %v9586_v11 = vadd.f32 %v9585_v9, %v9516_v60  ;;  %13048 = vmatpush1.xpose.msra.mxu0 %v1003_v2  ;;  %13118 = vmatpush1.xpose.msra.mxu1 %v1005_v3  ;;  %v2451_v60 = vrot.slane %v316_v42, %v17286_v19  ;;  %v634_v2 = vld [vmem:[%s17262_s24 + $0x938] sm:$0xff]  ;;  %v640_v42 = vld [vmem:[%s17262_s24 + $0x968] sm:$0xff] }
 0x29e   : > { %v9587_v12 = vpop.f32.mrf.mxu0  ;;  %v9657_v13 = vpop.f32.mrf.mxu1  ;;  %13049 = vmatprep.subr.mxu0 %v620_v4  ;;  %13119 = vmatprep.subr.mxu1 %v622_v5  ;;  %v2460_v4 = vcombine.high %v2458_v61, %v2458_v61  ;;  %v2461_v5 = vcombine.high %v317_v62, %v317_v62 }
 0x29f   : > { %v9656_v16 = vadd.f32 %v9655_v10, %v9586_v11  ;;  %13083 = vmatprep.mubr.f32.mxu0 %v2408_v6  ;;  %13153 = vmatprep.mubr.f32.mxu1 %v2409_v7  ;;  %v2459_v3 = vcombine.high %v2451_v60, %v2451_v60  ;;  %v631_v11 = vld [vmem:[%s17262_s24 + $0x920] sm:$0xff]  ;;  %v633_v12 = vld [vmem:[%s17262_s24 + $0x930] sm:$0xff] }
 0x2a1   : > { %13050 = vmatpush1.xpose.msra.mxu0 %v619_v14  ;;  %13120 = vmatpush1.xpose.msra.mxu1 %v621_v15  ;;  %v1020_v14 = vld [vmem:[%s17262_s24 + $0x1548] sm:$0x3]  ;;  %v1022_v15 = vld [vmem:[%s17262_s24 + $0x1558] sm:$0x3] }
 0x2a2   : > { %13187 = vmatprep.subr.mxu0 %v1008_v17  ;;  %13257 = vmatprep.subr.mxu1 %v1010_v18  ;;  %v2475_v17 = vrot.slane %v2461_v5, %v17286_v19  ;;  %v318_v18 = vld [vmem:[%s17255_s29 + $0x258] sm:$0xff] }
 0x2a4   : > { %v9725_v30 = vpop.f32.mrf.mxu0  ;;  %13084 = vmatmul.mubr.f32.vlgmr.msra.gmra.mxu0 %v2400_v63  ;;  %v9795_v31 = vpop.f32.mrf.mxu1  ;;  %13154 = vmatmul.mubr.f32.vlgmr.msra.gmra.mxu1 %v2407_v0  ;;  %v1015_v63 = vld [vmem:[%s17262_s24 + $0x1520] sm:$0x3]  ;;  %v1017_v0 = vld [vmem:[%s17262_s24 + $0x1530] sm:$0x3] }
 0x2a5   : > { %v9726_v32 = vadd.f32 %v9725_v30, %v9656_v16  ;;  %13188 = vmatpush1.xpose.msra.mxu0 %v1007_v23  ;;  %13258 = vmatpush1.xpose.msra.mxu1 %v1009_v24  ;;  %v2468_v16 = vrot.slane %v317_v62, %v17286_v19  ;;  %v638_v23 = vld [vmem:[%s17262_s24 + $0x958] sm:$0xff]  ;;  %v644_v62 = vld [vmem:[%s17262_s24 + $0x988] sm:$0xff] }
 0x2a6   : > { %v9727_v33 = vpop.f32.mrf.mxu0  ;;  %v9797_v34 = vpop.f32.mrf.mxu1  ;;  %13189 = vmatprep.subr.mxu0 %v624_v25  ;;  %13259 = vmatprep.subr.mxu1 %v626_v26  ;;  %v2477_v25 = vcombine.high %v2475_v17, %v2475_v17  ;;  %v2478_v26 = vcombine.high %v318_v18, %v318_v18 }
 0x2a7   : > { %v9796_v37 = vadd.f32 %v9795_v31, %v9726_v32  ;;  %13223 = vmatprep.mubr.f32.mxu0 %v2425_v27  ;;  %13293 = vmatprep.mubr.f32.mxu1 %v2426_v28  ;;  %v2476_v24 = vcombine.high %v2468_v16, %v2468_v16  ;;  %v635_v32 = vld [vmem:[%s17262_s24 + $0x940] sm:$0xff]  ;;  %v637_v33 = vld [vmem:[%s17262_s24 + $0x950] sm:$0xff] }
 0x2a9   : > { %13190 = vmatpush1.xpose.msra.mxu0 %v623_v35  ;;  %13260 = vmatpush1.xpose.msra.mxu1 %v625_v36  ;;  %v1024_v35 = vld [vmem:[%s17262_s24 + $0x1568] sm:$0x3]  ;;  %v1026_v36 = vld [vmem:[%s17262_s24 + $0x1578] sm:$0x3] }
 0x2aa   : > { %13327 = vmatprep.subr.mxu0 %v1012_v38  ;;  %13397 = vmatprep.subr.mxu1 %v1014_v39  ;;  %v2492_v38 = vrot.slane %v2478_v26, %v17286_v19  ;;  %v319_v39 = vld [vmem:[%s17255_s29 + $0x260] sm:$0xff] }
 0x2ac   : > { %v9865_v50 = vpop.f32.mrf.mxu0  ;;  %13224 = vmatmul.mubr.f32.vlgmr.msra.gmra.mxu0 %v2417_v20  ;;  %v9935_v51 = vpop.f32.mrf.mxu1  ;;  %13294 = vmatmul.mubr.f32.vlgmr.msra.gmra.mxu1 %v2424_v21  ;;  %v1019_v20 = vld [vmem:[%s17262_s24 + $0x1540] sm:$0x3]  ;;  %v1021_v21 = vld [vmem:[%s17262_s24 + $0x1550] sm:$0x3] }
 0x2ad   : > { %v9866_v52 = vadd.f32 %v9865_v50, %v9796_v37  ;;  %13328 = vmatpush1.xpose.msra.mxu0 %v1011_v43  ;;  %13398 = vmatpush1.xpose.msra.mxu1 %v1013_v44  ;;  %v2485_v37 = vrot.slane %v318_v18, %v17286_v19  ;;  %v642_v43 = vld [vmem:[%s17262_s24 + $0x978] sm:$0xff]  ;;  %v648_v18 = vld [vmem:[%s17262_s24 + $0x9a8] sm:$0xff] }
 0x2ae   : > { %v9867_v53 = vpop.f32.mrf.mxu0  ;;  %v9937_v54 = vpop.f32.mrf.mxu1  ;;  %13329 = vmatprep.subr.mxu0 %v628_v45  ;;  %13399 = vmatprep.subr.mxu1 %v630_v46  ;;  %v2494_v45 = vcombine.high %v2492_v38, %v2492_v38  ;;  %v2495_v46 = vcombine.high %v319_v39, %v319_v39 }
 0x2af   : > { %v9936_v57 = vadd.f32 %v9935_v51, %v9866_v52  ;;  %13363 = vmatprep.mubr.f32.mxu0 %v2442_v47  ;;  %13433 = vmatprep.mubr.f32.mxu1 %v2443_v48  ;;  %v2493_v44 = vcombine.high %v2485_v37, %v2485_v37  ;;  %v639_v52 = vld [vmem:[%s17262_s24 + $0x960] sm:$0xff]  ;;  %v641_v53 = vld [vmem:[%s17262_s24 + $0x970] sm:$0xff] }
 0x2b1   : > { %13330 = vmatpush1.xpose.msra.mxu0 %v627_v55  ;;  %13400 = vmatpush1.xpose.msra.mxu1 %v629_v56  ;;  %v1028_v55 = vld [vmem:[%s17262_s24 + $0x1588] sm:$0x3]  ;;  %v1030_v56 = vld [vmem:[%s17262_s24 + $0x1598] sm:$0x3] }
 0x2b2   : > { %13467 = vmatprep.subr.mxu0 %v1016_v58  ;;  %13537 = vmatprep.subr.mxu1 %v1018_v59  ;;  %v2509_v58 = vrot.slane %v2495_v46, %v17286_v19  ;;  %v320_v59 = vld [vmem:[%s17255_s29 + $0x268] sm:$0xff] }
 0x2b4   : > { %v10005_v6 = vpop.f32.mrf.mxu0  ;;  %13364 = vmatmul.mubr.f32.vlgmr.msra.gmra.mxu0 %v2434_v40  ;;  %v10075_v7 = vpop.f32.mrf.mxu1  ;;  %13434 = vmatmul.mubr.f32.vlgmr.msra.gmra.mxu1 %v2441_v41  ;;  %v1023_v40 = vld [vmem:[%s17262_s24 + $0x1560] sm:$0x3]  ;;  %v1025_v41 = vld [vmem:[%s17262_s24 + $0x1570] sm:$0x3] }
 0x2b5   : > { %v10006_v8 = vadd.f32 %v10005_v6, %v9936_v57  ;;  %13468 = vmatpush1.xpose.msra.mxu0 %v1015_v63  ;;  %13538 = vmatpush1.xpose.msra.mxu1 %v1017_v0  ;;  %v2502_v57 = vrot.slane %v319_v39, %v17286_v19  ;;  %v646_v63 = vld [vmem:[%s17262_s24 + $0x998] sm:$0xff]  ;;  %v652_v39 = vld [vmem:[%s17262_s24 + $0x9c8] sm:$0xff] }
 0x2b6   : > { %v10007_v9 = vpop.f32.mrf.mxu0  ;;  %v10077_v10 = vpop.f32.mrf.mxu1  ;;  %13469 = vmatprep.subr.mxu0 %v632_v1  ;;  %13539 = vmatprep.subr.mxu1 %v634_v2  ;;  %v2511_v1 = vcombine.high %v2509_v58, %v2509_v58  ;;  %v2512_v2 = vcombine.high %v320_v59, %v320_v59 }
 0x2b7   : > { %v10076_v13 = vadd.f32 %v10075_v7, %v10006_v8  ;;  %13503 = vmatprep.mubr.f32.mxu0 %v2459_v3  ;;  %13573 = vmatprep.mubr.f32.mxu1 %v2460_v4  ;;  %v2510_v0 = vcombine.high %v2502_v57, %v2502_v57  ;;  %v643_v8 = vld [vmem:[%s17262_s24 + $0x980] sm:$0xff]  ;;  %v645_v9 = vld [vmem:[%s17262_s24 + $0x990] sm:$0xff] }
 0x2b9   : > { %13470 = vmatpush1.xpose.msra.mxu0 %v631_v11  ;;  %13540 = vmatpush1.xpose.msra.mxu1 %v633_v12  ;;  %v1032_v11 = vld [vmem:[%s17262_s24 + $0x15a8] sm:$0x3]  ;;  %v1034_v12 = vld [vmem:[%s17262_s24 + $0x15b8] sm:$0x3] }
 0x2ba   : > { %13607 = vmatprep.subr.mxu0 %v1020_v14  ;;  %13677 = vmatprep.subr.mxu1 %v1022_v15  ;;  %v2526_v14 = vrot.slane %v2512_v2, %v17286_v19  ;;  %v321_v15 = vld [vmem:[%s17255_s29 + $0x270] sm:$0xff] }
 0x2bc   : > { %v10145_v27 = vpop.f32.mrf.mxu0  ;;  %13504 = vmatmul.mubr.f32.vlgmr.msra.gmra.mxu0 %v2451_v60  ;;  %v10215_v28 = vpop.f32.mrf.mxu1  ;;  %13574 = vmatmul.mubr.f32.vlgmr.msra.gmra.mxu1 %v2458_v61  ;;  %v1027_v60 = vld [vmem:[%s17262_s24 + $0x1580] sm:$0x3]  ;;  %v1029_v61 = vld [vmem:[%s17262_s24 + $0x1590] sm:$0x3] }
 0x2bd   : > { %v10146_v29 = vadd.f32 %v10145_v27, %v10076_v13  ;;  %13608 = vmatpush1.xpose.msra.mxu0 %v1019_v20  ;;  %13678 = vmatpush1.xpose.msra.mxu1 %v1021_v21  ;;  %v2519_v13 = vrot.slane %v320_v59, %v17286_v19  ;;  %v650_v20 = vld [vmem:[%s17262_s24 + $0x9b8] sm:$0xff]  ;;  %v656_v59 = vld [vmem:[%s17262_s24 + $0x9e8] sm:$0xff] }
 0x2be   : > { %v10147_v30 = vpop.f32.mrf.mxu0  ;;  %v10217_v31 = vpop.f32.mrf.mxu1  ;;  %13609 = vmatprep.subr.mxu0 %v636_v22  ;;  %13679 = vmatprep.subr.mxu1 %v638_v23  ;;  %v2528_v22 = vcombine.high %v2526_v14, %v2526_v14  ;;  %v2529_v23 = vcombine.high %v321_v15, %v321_v15 }
 0x2bf   : > { %v10216_v34 = vadd.f32 %v10215_v28, %v10146_v29  ;;  %13643 = vmatprep.mubr.f32.mxu0 %v2476_v24  ;;  %13713 = vmatprep.mubr.f32.mxu1 %v2477_v25  ;;  %v2527_v21 = vcombine.high %v2519_v13, %v2519_v13  ;;  %v647_v29 = vld [vmem:[%s17262_s24 + $0x9a0] sm:$0xff]  ;;  %v649_v30 = vld [vmem:[%s17262_s24 + $0x9b0] sm:$0xff] }
 0x2c1   : > { %13610 = vmatpush1.xpose.msra.mxu0 %v635_v32  ;;  %13680 = vmatpush1.xpose.msra.mxu1 %v637_v33  ;;  %v1036_v32 = vld [vmem:[%s17262_s24 + $0x15c8] sm:$0x3]  ;;  %v1038_v33 = vld [vmem:[%s17262_s24 + $0x15d8] sm:$0x3] }
 0x2c2   : > { %13747 = vmatprep.subr.mxu0 %v1024_v35  ;;  %13817 = vmatprep.subr.mxu1 %v1026_v36  ;;  %v2543_v35 = vrot.slane %v2529_v23, %v17286_v19  ;;  %v322_v36 = vld [vmem:[%s17255_s29 + $0x278] sm:$0xff] }
 0x2c4   : > { %v10285_v47 = vpop.f32.mrf.mxu0  ;;  %13644 = vmatmul.mubr.f32.vlgmr.msra.gmra.mxu0 %v2468_v16  ;;  %v10355_v48 = vpop.f32.mrf.mxu1  ;;  %13714 = vmatmul.mubr.f32.vlgmr.msra.gmra.mxu1 %v2475_v17  ;;  %v1031_v16 = vld [vmem:[%s17262_s24 + $0x15a0] sm:$0x3]  ;;  %v1033_v17 = vld [vmem:[%s17262_s24 + $0x15b0] sm:$0x3] }
 0x2c5   : > { %v10286_v49 = vadd.f32 %v10285_v47, %v10216_v34  ;;  %13748 = vmatpush1.xpose.msra.mxu0 %v1023_v40  ;;  %13818 = vmatpush1.xpose.msra.mxu1 %v1025_v41  ;;  %v2536_v34 = vrot.slane %v321_v15, %v17286_v19  ;;  %v654_v40 = vld [vmem:[%s17262_s24 + $0x9d8] sm:$0xff]  ;;  %v660_v15 = vld [vmem:[%s17262_s24 + $0xa08] sm:$0xff] }
 0x2c6   : > { %v10287_v50 = vpop.f32.mrf.mxu0  ;;  %v10357_v51 = vpop.f32.mrf.mxu1  ;;  %13749 = vmatprep.subr.mxu0 %v640_v42  ;;  %13819 = vmatprep.subr.mxu1 %v642_v43  ;;  %v2545_v42 = vcombine.high %v2543_v35, %v2543_v35  ;;  %v2546_v43 = vcombine.high %v322_v36, %v322_v36 }
 0x2c7   : > { %v10356_v54 = vadd.f32 %v10355_v48, %v10286_v49  ;;  %13783 = vmatprep.mubr.f32.mxu0 %v2493_v44  ;;  %13853 = vmatprep.mubr.f32.mxu1 %v2494_v45  ;;  %v2544_v41 = vcombine.high %v2536_v34, %v2536_v34  ;;  %v651_v49 = vld [vmem:[%s17262_s24 + $0x9c0] sm:$0xff]  ;;  %v653_v50 = vld [vmem:[%s17262_s24 + $0x9d0] sm:$0xff] }
 0x2c9   : > { %13750 = vmatpush1.xpose.msra.mxu0 %v639_v52  ;;  %13820 = vmatpush1.xpose.msra.mxu1 %v641_v53  ;;  %v1040_v52 = vld [vmem:[%s17262_s24 + $0x15e8] sm:$0x3]  ;;  %v1042_v53 = vld [vmem:[%s17262_s24 + $0x15f8] sm:$0x3] }
 0x2ca   : > { %13887 = vmatprep.subr.mxu0 %v1028_v55  ;;  %13957 = vmatprep.subr.mxu1 %v1030_v56  ;;  %v2560_v55 = vrot.slane %v2546_v43, %v17286_v19  ;;  %v323_v56 = vld [vmem:[%s17255_s29 + $0x280] sm:$0xff] }
 0x2cc   : > { %v10425_v3 = vpop.f32.mrf.mxu0  ;;  %13784 = vmatmul.mubr.f32.vlgmr.msra.gmra.mxu0 %v2485_v37  ;;  %v10495_v4 = vpop.f32.mrf.mxu1  ;;  %13854 = vmatmul.mubr.f32.vlgmr.msra.gmra.mxu1 %v2492_v38  ;;  %v1035_v37 = vld [vmem:[%s17262_s24 + $0x15c0] sm:$0x3]  ;;  %v1037_v38 = vld [vmem:[%s17262_s24 + $0x15d0] sm:$0x3] }
 0x2cd   : > { %v10426_v5 = vadd.f32 %v10425_v3, %v10356_v54  ;;  %13888 = vmatpush1.xpose.msra.mxu0 %v1027_v60  ;;  %13958 = vmatpush1.xpose.msra.mxu1 %v1029_v61  ;;  %v2553_v54 = vrot.slane %v322_v36, %v17286_v19  ;;  %v658_v60 = vld [vmem:[%s17262_s24 + $0x9f8] sm:$0xff]  ;;  %v664_v36 = vld [vmem:[%s17262_s24 + $0xa28] sm:$0xff] }
 0x2ce   : > { %v10427_v6 = vpop.f32.mrf.mxu0  ;;  %v10497_v7 = vpop.f32.mrf.mxu1  ;;  %13889 = vmatprep.subr.mxu0 %v644_v62  ;;  %13959 = vmatprep.subr.mxu1 %v646_v63  ;;  %v2562_v62 = vcombine.high %v2560_v55, %v2560_v55  ;;  %v2563_v63 = vcombine.high %v323_v56, %v323_v56 }
 0x2cf   : > { %v10496_v10 = vadd.f32 %v10495_v4, %v10426_v5  ;;  %13923 = vmatprep.mubr.f32.mxu0 %v2510_v0  ;;  %13993 = vmatprep.mubr.f32.mxu1 %v2511_v1  ;;  %v2561_v61 = vcombine.high %v2553_v54, %v2553_v54  ;;  %v655_v5 = vld [vmem:[%s17262_s24 + $0x9e0] sm:$0xff]  ;;  %v657_v6 = vld [vmem:[%s17262_s24 + $0x9f0] sm:$0xff] }
 0x2d1   : > { %13890 = vmatpush1.xpose.msra.mxu0 %v643_v8  ;;  %13960 = vmatpush1.xpose.msra.mxu1 %v645_v9  ;;  %v1044_v8 = vld [vmem:[%s17262_s24 + $0x1608] sm:$0x3]  ;;  %v1046_v9 = vld [vmem:[%s17262_s24 + $0x1618] sm:$0x3] }
 0x2d2   : > { %14027 = vmatprep.subr.mxu0 %v1032_v11  ;;  %14097 = vmatprep.subr.mxu1 %v1034_v12  ;;  %v2577_v11 = vrot.slane %v2563_v63, %v17286_v19  ;;  %v324_v12 = vld [vmem:[%s17255_s29 + $0x288] sm:$0xff] }
 0x2d4   : > { %v10565_v24 = vpop.f32.mrf.mxu0  ;;  %13924 = vmatmul.mubr.f32.vlgmr.msra.gmra.mxu0 %v2502_v57  ;;  %v10635_v25 = vpop.f32.mrf.mxu1  ;;  %13994 = vmatmul.mubr.f32.vlgmr.msra.gmra.mxu1 %v2509_v58  ;;  %v1039_v57 = vld [vmem:[%s17262_s24 + $0x15e0] sm:$0x3]  ;;  %v1041_v58 = vld [vmem:[%s17262_s24 + $0x15f0] sm:$0x3] }
 0x2d5   : > { %v10566_v26 = vadd.f32 %v10565_v24, %v10496_v10  ;;  %14028 = vmatpush1.xpose.msra.mxu0 %v1031_v16  ;;  %14098 = vmatpush1.xpose.msra.mxu1 %v1033_v17  ;;  %v2570_v10 = vrot.slane %v323_v56, %v17286_v19  ;;  %v662_v16 = vld [vmem:[%s17262_s24 + $0xa18] sm:$0xff]  ;;  %v668_v56 = vld [vmem:[%s17262_s24 + $0xa48] sm:$0xff] }
 0x2d6   : > { %v10567_v27 = vpop.f32.mrf.mxu0  ;;  %v10637_v28 = vpop.f32.mrf.mxu1  ;;  %14029 = vmatprep.subr.mxu0 %v648_v18  ;;  %14099 = vmatprep.subr.mxu1 %v650_v20  ;;  %v2579_v18 = vcombine.high %v2577_v11, %v2577_v11  ;;  %v2580_v20 = vcombine.high %v324_v12, %v324_v12 }
 0x2d7   : > { %v10636_v31 = vadd.f32 %v10635_v25, %v10566_v26  ;;  %14063 = vmatprep.mubr.f32.mxu0 %v2527_v21  ;;  %14133 = vmatprep.mubr.f32.mxu1 %v2528_v22  ;;  %v2578_v17 = vcombine.high %v2570_v10, %v2570_v10  ;;  %v659_v26 = vld [vmem:[%s17262_s24 + $0xa00] sm:$0xff]  ;;  %v661_v27 = vld [vmem:[%s17262_s24 + $0xa10] sm:$0xff] }
 0x2d9   : > { %14030 = vmatpush1.xpose.msra.mxu0 %v647_v29  ;;  %14100 = vmatpush1.xpose.msra.mxu1 %v649_v30  ;;  %v1048_v29 = vld [vmem:[%s17262_s24 + $0x1628] sm:$0x3]  ;;  %v1050_v30 = vld [vmem:[%s17262_s24 + $0x1638] sm:$0x3] }
 0x2da   : > { %14167 = vmatprep.subr.mxu0 %v1036_v32  ;;  %14237 = vmatprep.subr.mxu1 %v1038_v33  ;;  %v2594_v32 = vrot.slane %v2580_v20, %v17286_v19  ;;  %v325_v33 = vld [vmem:[%s17255_s29 + $0x290] sm:$0xff] }
 0x2dc   : > { %v10705_v44 = vpop.f32.mrf.mxu0  ;;  %14064 = vmatmul.mubr.f32.vlgmr.msra.gmra.mxu0 %v2519_v13  ;;  %v10775_v45 = vpop.f32.mrf.mxu1  ;;  %14134 = vmatmul.mubr.f32.vlgmr.msra.gmra.mxu1 %v2526_v14  ;;  %v1043_v13 = vld [vmem:[%s17262_s24 + $0x1600] sm:$0x3]  ;;  %v1045_v14 = vld [vmem:[%s17262_s24 + $0x1610] sm:$0x3] }
 0x2dd   : > { %v10706_v46 = vadd.f32 %v10705_v44, %v10636_v31  ;;  %14168 = vmatpush1.xpose.msra.mxu0 %v1035_v37  ;;  %14238 = vmatpush1.xpose.msra.mxu1 %v1037_v38  ;;  %v2587_v31 = vrot.slane %v324_v12, %v17286_v19  ;;  %v666_v37 = vld [vmem:[%s17262_s24 + $0xa38] sm:$0xff]  ;;  %v672_v12 = vld [vmem:[%s17262_s24 + $0xa68] sm:$0xff] }
 0x2de   : > { %v10707_v47 = vpop.f32.mrf.mxu0  ;;  %v10777_v48 = vpop.f32.mrf.mxu1  ;;  %14169 = vmatprep.subr.mxu0 %v652_v39  ;;  %14239 = vmatprep.subr.mxu1 %v654_v40  ;;  %v2596_v39 = vcombine.high %v2594_v32, %v2594_v32  ;;  %v2597_v40 = vcombine.high %v325_v33, %v325_v33 }
 0x2df   : > { %v10776_v51 = vadd.f32 %v10775_v45, %v10706_v46  ;;  %14203 = vmatprep.mubr.f32.mxu0 %v2544_v41  ;;  %14273 = vmatprep.mubr.f32.mxu1 %v2545_v42  ;;  %v2595_v38 = vcombine.high %v2587_v31, %v2587_v31  ;;  %v663_v46 = vld [vmem:[%s17262_s24 + $0xa20] sm:$0xff]  ;;  %v665_v47 = vld [vmem:[%s17262_s24 + $0xa30] sm:$0xff] }
 0x2e1   : > { %14170 = vmatpush1.xpose.msra.mxu0 %v651_v49  ;;  %14240 = vmatpush1.xpose.msra.mxu1 %v653_v50  ;;  %v1052_v49 = vld [vmem:[%s17262_s24 + $0x1648] sm:$0x3]  ;;  %v1054_v50 = vld [vmem:[%s17262_s24 + $0x1658] sm:$0x3] }
 0x2e2   : > { %14307 = vmatprep.subr.mxu0 %v1040_v52  ;;  %14377 = vmatprep.subr.mxu1 %v1042_v53  ;;  %v2611_v52 = vrot.slane %v2597_v40, %v17286_v19  ;;  %v326_v53 = vld [vmem:[%s17255_s29 + $0x298] sm:$0xff] }
 0x2e4   : > { %v10845_v0 = vpop.f32.mrf.mxu0  ;;  %14204 = vmatmul.mubr.f32.vlgmr.msra.gmra.mxu0 %v2536_v34  ;;  %v10915_v1 = vpop.f32.mrf.mxu1  ;;  %14274 = vmatmul.mubr.f32.vlgmr.msra.gmra.mxu1 %v2543_v35  ;;  %v1047_v34 = vld [vmem:[%s17262_s24 + $0x1620] sm:$0x3]  ;;  %v1049_v35 = vld [vmem:[%s17262_s24 + $0x1630] sm:$0x3] }
 0x2e5   : > { %v10846_v2 = vadd.f32 %v10845_v0, %v10776_v51  ;;  %14308 = vmatpush1.xpose.msra.mxu0 %v1039_v57  ;;  %14378 = vmatpush1.xpose.msra.mxu1 %v1041_v58  ;;  %v2604_v51 = vrot.slane %v325_v33, %v17286_v19  ;;  %v670_v57 = vld [vmem:[%s17262_s24 + $0xa58] sm:$0xff]  ;;  %v676_v33 = vld [vmem:[%s17262_s24 + $0xa88] sm:$0xff] }
 0x2e6   : > { %v10847_v3 = vpop.f32.mrf.mxu0  ;;  %v10917_v4 = vpop.f32.mrf.mxu1  ;;  %14309 = vmatprep.subr.mxu0 %v656_v59  ;;  %14379 = vmatprep.subr.mxu1 %v658_v60  ;;  %v2613_v59 = vcombine.high %v2611_v52, %v2611_v52  ;;  %v2614_v60 = vcombine.high %v326_v53, %v326_v53 }
 0x2e7   : > { %v10916_v7 = vadd.f32 %v10915_v1, %v10846_v2  ;;  %14343 = vmatprep.mubr.f32.mxu0 %v2561_v61  ;;  %14413 = vmatprep.mubr.f32.mxu1 %v2562_v62  ;;  %v2612_v58 = vcombine.high %v2604_v51, %v2604_v51  ;;  %v667_v2 = vld [vmem:[%s17262_s24 + $0xa40] sm:$0xff]  ;;  %v669_v3 = vld [vmem:[%s17262_s24 + $0xa50] sm:$0xff] }
 0x2e9   : > { %14310 = vmatpush1.xpose.msra.mxu0 %v655_v5  ;;  %14380 = vmatpush1.xpose.msra.mxu1 %v657_v6  ;;  %v1056_v5 = vld [vmem:[%s17262_s24 + $0x1668] sm:$0x3]  ;;  %v1058_v6 = vld [vmem:[%s17262_s24 + $0x1678] sm:$0x3] }
 0x2ea   : > { %14447 = vmatprep.subr.mxu0 %v1044_v8  ;;  %14517 = vmatprep.subr.mxu1 %v1046_v9  ;;  %v2628_v8 = vrot.slane %v2614_v60, %v17286_v19  ;;  %v327_v9 = vld [vmem:[%s17255_s29 + $0x2a0] sm:$0xff] }
 0x2ec   : > { %v10985_v21 = vpop.f32.mrf.mxu0  ;;  %14344 = vmatmul.mubr.f32.vlgmr.msra.gmra.mxu0 %v2553_v54  ;;  %v11055_v22 = vpop.f32.mrf.mxu1  ;;  %14414 = vmatmul.mubr.f32.vlgmr.msra.gmra.mxu1 %v2560_v55  ;;  %v1051_v54 = vld [vmem:[%s17262_s24 + $0x1640] sm:$0x3]  ;;  %v1053_v55 = vld [vmem:[%s17262_s24 + $0x1650] sm:$0x3] }
 0x2ed   : > { %v10986_v23 = vadd.f32 %v10985_v21, %v10916_v7  ;;  %14448 = vmatpush1.xpose.msra.mxu0 %v1043_v13  ;;  %14518 = vmatpush1.xpose.msra.mxu1 %v1045_v14  ;;  %v2621_v7 = vrot.slane %v326_v53, %v17286_v19  ;;  %v674_v13 = vld [vmem:[%s17262_s24 + $0xa78] sm:$0xff]  ;;  %v680_v53 = vld [vmem:[%s17262_s24 + $0xaa8] sm:$0xff] }
 0x2ee   : > { %v10987_v24 = vpop.f32.mrf.mxu0  ;;  %v11057_v25 = vpop.f32.mrf.mxu1  ;;  %14449 = vmatprep.subr.mxu0 %v660_v15  ;;  %14519 = vmatprep.subr.mxu1 %v662_v16  ;;  %v2630_v15 = vcombine.high %v2628_v8, %v2628_v8  ;;  %v2631_v16 = vcombine.high %v327_v9, %v327_v9 }
 0x2ef   : > { %v11056_v28 = vadd.f32 %v11055_v22, %v10986_v23  ;;  %14483 = vmatprep.mubr.f32.mxu0 %v2578_v17  ;;  %14553 = vmatprep.mubr.f32.mxu1 %v2579_v18  ;;  %v2629_v14 = vcombine.high %v2621_v7, %v2621_v7  ;;  %v671_v23 = vld [vmem:[%s17262_s24 + $0xa60] sm:$0xff]  ;;  %v673_v24 = vld [vmem:[%s17262_s24 + $0xa70] sm:$0xff] }
 0x2f1   : > { %14450 = vmatpush1.xpose.msra.mxu0 %v659_v26  ;;  %14520 = vmatpush1.xpose.msra.mxu1 %v661_v27  ;;  %v1060_v26 = vld [vmem:[%s17262_s24 + $0x1688] sm:$0x3]  ;;  %v1062_v27 = vld [vmem:[%s17262_s24 + $0x1698] sm:$0x3] }
 0x2f2   : > { %14587 = vmatprep.subr.mxu0 %v1048_v29  ;;  %14657 = vmatprep.subr.mxu1 %v1050_v30  ;;  %v2645_v29 = vrot.slane %v2631_v16, %v17286_v19  ;;  %v328_v30 = vld [vmem:[%s17255_s29 + $0x2a8] sm:$0xff] }
 0x2f4   : > { %v11125_v41 = vpop.f32.mrf.mxu0  ;;  %14484 = vmatmul.mubr.f32.vlgmr.msra.gmra.mxu0 %v2570_v10  ;;  %v11195_v42 = vpop.f32.mrf.mxu1  ;;  %14554 = vmatmul.mubr.f32.vlgmr.msra.gmra.mxu1 %v2577_v11  ;;  %v1055_v10 = vld [vmem:[%s17262_s24 + $0x1660] sm:$0x3]  ;;  %v1057_v11 = vld [vmem:[%s17262_s24 + $0x1670] sm:$0x3] }
 0x2f5   : > { %v11126_v43 = vadd.f32 %v11125_v41, %v11056_v28  ;;  %14588 = vmatpush1.xpose.msra.mxu0 %v1047_v34  ;;  %14658 = vmatpush1.xpose.msra.mxu1 %v1049_v35  ;;  %v2638_v28 = vrot.slane %v327_v9, %v17286_v19  ;;  %v678_v34 = vld [vmem:[%s17262_s24 + $0xa98] sm:$0xff]  ;;  %v684_v9 = vld [vmem:[%s17262_s24 + $0xac8] sm:$0xff] }
 0x2f6   : > { %v11127_v44 = vpop.f32.mrf.mxu0  ;;  %v11197_v45 = vpop.f32.mrf.mxu1  ;;  %14589 = vmatprep.subr.mxu0 %v664_v36  ;;  %14659 = vmatprep.subr.mxu1 %v666_v37  ;;  %v2647_v36 = vcombine.high %v2645_v29, %v2645_v29  ;;  %v2648_v37 = vcombine.high %v328_v30, %v328_v30 }
 0x2f7   : > { %v11196_v48 = vadd.f32 %v11195_v42, %v11126_v43  ;;  %14623 = vmatprep.mubr.f32.mxu0 %v2595_v38  ;;  %14693 = vmatprep.mubr.f32.mxu1 %v2596_v39  ;;  %v2646_v35 = vcombine.high %v2638_v28, %v2638_v28  ;;  %v675_v43 = vld [vmem:[%s17262_s24 + $0xa80] sm:$0xff]  ;;  %v677_v44 = vld [vmem:[%s17262_s24 + $0xa90] sm:$0xff] }
 0x2f9   : > { %14590 = vmatpush1.xpose.msra.mxu0 %v663_v46  ;;  %14660 = vmatpush1.xpose.msra.mxu1 %v665_v47  ;;  %v1064_v46 = vld [vmem:[%s17262_s24 + $0x16a8] sm:$0x3]  ;;  %v1066_v47 = vld [vmem:[%s17262_s24 + $0x16b8] sm:$0x3] }
 0x2fa   : > { %14727 = vmatprep.subr.mxu0 %v1052_v49  ;;  %14797 = vmatprep.subr.mxu1 %v1054_v50  ;;  %v2662_v49 = vrot.slane %v2648_v37, %v17286_v19  ;;  %v329_v50 = vld [vmem:[%s17255_s29 + $0x2b0] sm:$0xff] }
 0x2fc   : > { %v11265_v61 = vpop.f32.mrf.mxu0  ;;  %14624 = vmatmul.mubr.f32.vlgmr.msra.gmra.mxu0 %v2587_v31  ;;  %v11335_v62 = vpop.f32.mrf.mxu1  ;;  %14694 = vmatmul.mubr.f32.vlgmr.msra.gmra.mxu1 %v2594_v32  ;;  %v1059_v31 = vld [vmem:[%s17262_s24 + $0x1680] sm:$0x3]  ;;  %v1061_v32 = vld [vmem:[%s17262_s24 + $0x1690] sm:$0x3] }
 0x2fd   : > { %v11266_v63 = vadd.f32 %v11265_v61, %v11196_v48  ;;  %14728 = vmatpush1.xpose.msra.mxu0 %v1051_v54  ;;  %14798 = vmatpush1.xpose.msra.mxu1 %v1053_v55  ;;  %v2655_v48 = vrot.slane %v328_v30, %v17286_v19  ;;  %v682_v54 = vld [vmem:[%s17262_s24 + $0xab8] sm:$0xff]  ;;  %v688_v30 = vld [vmem:[%s17262_s24 + $0xae8] sm:$0xff] }
 0x2fe   : > { %v11267_v0 = vpop.f32.mrf.mxu0  ;;  %v11337_v1 = vpop.f32.mrf.mxu1  ;;  %14729 = vmatprep.subr.mxu0 %v668_v56  ;;  %14799 = vmatprep.subr.mxu1 %v670_v57  ;;  %v2664_v56 = vcombine.high %v2662_v49, %v2662_v49  ;;  %v2665_v57 = vcombine.high %v329_v50, %v329_v50 }
 0x2ff   : > { %v11336_v4 = vadd.f32 %v11335_v62, %v11266_v63  ;;  %14763 = vmatprep.mubr.f32.mxu0 %v2612_v58  ;;  %14833 = vmatprep.mubr.f32.mxu1 %v2613_v59  ;;  %v2663_v55 = vcombine.high %v2655_v48, %v2655_v48  ;;  %v679_v63 = vld [vmem:[%s17262_s24 + $0xaa0] sm:$0xff]  ;;  %v681_v0 = vld [vmem:[%s17262_s24 + $0xab0] sm:$0xff] }
 0x301   : > { %14730 = vmatpush1.xpose.msra.mxu0 %v667_v2  ;;  %14800 = vmatpush1.xpose.msra.mxu1 %v669_v3  ;;  %v1068_v2 = vld [vmem:[%s17262_s24 + $0x16c8] sm:$0x3]  ;;  %v1070_v3 = vld [vmem:[%s17262_s24 + $0x16d8] sm:$0x3] }
 0x302   : > { %14867 = vmatprep.subr.mxu0 %v1056_v5  ;;  %14937 = vmatprep.subr.mxu1 %v1058_v6  ;;  %v2679_v5 = vrot.slane %v2665_v57, %v17286_v19  ;;  %v330_v6 = vld [vmem:[%s17255_s29 + $0x2b8] sm:$0xff] }
 0x304   : > { %v11405_v17 = vpop.f32.mrf.mxu0  ;;  %14764 = vmatmul.mubr.f32.vlgmr.msra.gmra.mxu0 %v2604_v51  ;;  %v11475_v18 = vpop.f32.mrf.mxu1  ;;  %14834 = vmatmul.mubr.f32.vlgmr.msra.gmra.mxu1 %v2611_v52  ;;  %v1063_v51 = vld [vmem:[%s17262_s24 + $0x16a0] sm:$0x3]  ;;  %v1065_v52 = vld [vmem:[%s17262_s24 + $0x16b0] sm:$0x3] }
 0x305   : > { %v11406_v20 = vadd.f32 %v11405_v17, %v11336_v4  ;;  %14868 = vmatpush1.xpose.msra.mxu0 %v1055_v10  ;;  %14938 = vmatpush1.xpose.msra.mxu1 %v1057_v11  ;;  %v2672_v4 = vrot.slane %v329_v50, %v17286_v19  ;;  %v686_v10 = vld [vmem:[%s17262_s24 + $0xad8] sm:$0xff]  ;;  %v692_v50 = vld [vmem:[%s17262_s24 + $0xb08] sm:$0xff] }
 0x306   : > { %v11407_v21 = vpop.f32.mrf.mxu0  ;;  %v11477_v22 = vpop.f32.mrf.mxu1  ;;  %14869 = vmatprep.subr.mxu0 %v672_v12  ;;  %14939 = vmatprep.subr.mxu1 %v674_v13  ;;  %v2681_v12 = vcombine.high %v2679_v5, %v2679_v5  ;;  %v2682_v13 = vcombine.high %v330_v6, %v330_v6 }
 0x307   : > { %v11476_v25 = vadd.f32 %v11475_v18, %v11406_v20  ;;  %14903 = vmatprep.mubr.f32.mxu0 %v2629_v14  ;;  %14973 = vmatprep.mubr.f32.mxu1 %v2630_v15  ;;  %v2680_v11 = vcombine.high %v2672_v4, %v2672_v4  ;;  %v683_v20 = vld [vmem:[%s17262_s24 + $0xac0] sm:$0xff]  ;;  %v685_v21 = vld [vmem:[%s17262_s24 + $0xad0] sm:$0xff] }
 0x309   : > { %14870 = vmatpush1.xpose.msra.mxu0 %v671_v23  ;;  %14940 = vmatpush1.xpose.msra.mxu1 %v673_v24  ;;  %v1072_v23 = vld [vmem:[%s17262_s24 + $0x16e8] sm:$0x3]  ;;  %v1074_v24 = vld [vmem:[%s17262_s24 + $0x16f8] sm:$0x3] }
 0x30a   : > { %15007 = vmatprep.subr.mxu0 %v1060_v26  ;;  %15077 = vmatprep.subr.mxu1 %v1062_v27  ;;  %v2696_v26 = vrot.slane %v2682_v13, %v17286_v19  ;;  %v331_v27 = vld [vmem:[%s17255_s29 + $0x2c0] sm:$0xff] }
 0x30c   : > { %v11545_v38 = vpop.f32.mrf.mxu0  ;;  %14904 = vmatmul.mubr.f32.vlgmr.msra.gmra.mxu0 %v2621_v7  ;;  %v11615_v39 = vpop.f32.mrf.mxu1  ;;  %14974 = vmatmul.mubr.f32.vlgmr.msra.gmra.mxu1 %v2628_v8  ;;  %v1067_v7 = vld [vmem:[%s17262_s24 + $0x16c0] sm:$0x3]  ;;  %v1069_v8 = vld [vmem:[%s17262_s24 + $0x16d0] sm:$0x3] }
 0x30d   : > { %v11546_v40 = vadd.f32 %v11545_v38, %v11476_v25  ;;  %15008 = vmatpush1.xpose.msra.mxu0 %v1059_v31  ;;  %15078 = vmatpush1.xpose.msra.mxu1 %v1061_v32  ;;  %v2689_v25 = vrot.slane %v330_v6, %v17286_v19  ;;  %v690_v31 = vld [vmem:[%s17262_s24 + $0xaf8] sm:$0xff]  ;;  %v696_v6 = vld [vmem:[%s17262_s24 + $0xb28] sm:$0xff] }
 0x30e   : > { %v11547_v41 = vpop.f32.mrf.mxu0  ;;  %v11617_v42 = vpop.f32.mrf.mxu1  ;;  %15009 = vmatprep.subr.mxu0 %v676_v33  ;;  %15079 = vmatprep.subr.mxu1 %v678_v34  ;;  %v2698_v33 = vcombine.high %v2696_v26, %v2696_v26  ;;  %v2699_v34 = vcombine.high %v331_v27, %v331_v27 }
 0x30f   : > { %v11616_v45 = vadd.f32 %v11615_v39, %v11546_v40  ;;  %15043 = vmatprep.mubr.f32.mxu0 %v2646_v35  ;;  %15113 = vmatprep.mubr.f32.mxu1 %v2647_v36  ;;  %v2697_v32 = vcombine.high %v2689_v25, %v2689_v25  ;;  %v687_v40 = vld [vmem:[%s17262_s24 + $0xae0] sm:$0xff]  ;;  %v689_v41 = vld [vmem:[%s17262_s24 + $0xaf0] sm:$0xff] }
 0x311   : > { %15010 = vmatpush1.xpose.msra.mxu0 %v675_v43  ;;  %15080 = vmatpush1.xpose.msra.mxu1 %v677_v44  ;;  %v1076_v43 = vld [vmem:[%s17262_s24 + $0x1708] sm:$0x3]  ;;  %v1078_v44 = vld [vmem:[%s17262_s24 + $0x1718] sm:$0x3] }
 0x312   : > { %15147 = vmatprep.subr.mxu0 %v1064_v46  ;;  %15217 = vmatprep.subr.mxu1 %v1066_v47  ;;  %v2713_v46 = vrot.slane %v2699_v34, %v17286_v19  ;;  %v332_v47 = vld [vmem:[%s17255_s29 + $0x2c8] sm:$0xff] }
 0x314   : > { %v11685_v58 = vpop.f32.mrf.mxu0  ;;  %15044 = vmatmul.mubr.f32.vlgmr.msra.gmra.mxu0 %v2638_v28  ;;  %v11755_v59 = vpop.f32.mrf.mxu1  ;;  %15114 = vmatmul.mubr.f32.vlgmr.msra.gmra.mxu1 %v2645_v29  ;;  %v1071_v28 = vld [vmem:[%s17262_s24 + $0x16e0] sm:$0x3]  ;;  %v1073_v29 = vld [vmem:[%s17262_s24 + $0x16f0] sm:$0x3] }
 0x315   : > { %v11686_v60 = vadd.f32 %v11685_v58, %v11616_v45  ;;  %15148 = vmatpush1.xpose.msra.mxu0 %v1063_v51  ;;  %15218 = vmatpush1.xpose.msra.mxu1 %v1065_v52  ;;  %v2706_v45 = vrot.slane %v331_v27, %v17286_v19  ;;  %v694_v51 = vld [vmem:[%s17262_s24 + $0xb18] sm:$0xff]  ;;  %v700_v27 = vld [vmem:[%s17262_s24 + $0xb48] sm:$0xff] }
 0x316   : > { %v11687_v61 = vpop.f32.mrf.mxu0  ;;  %v11757_v62 = vpop.f32.mrf.mxu1  ;;  %15149 = vmatprep.subr.mxu0 %v680_v53  ;;  %15219 = vmatprep.subr.mxu1 %v682_v54  ;;  %v2715_v53 = vcombine.high %v2713_v46, %v2713_v46  ;;  %v2716_v54 = vcombine.high %v332_v47, %v332_v47 }
 0x317   : > { %v11756_v1 = vadd.f32 %v11755_v59, %v11686_v60  ;;  %15183 = vmatprep.mubr.f32.mxu0 %v2663_v55  ;;  %15253 = vmatprep.mubr.f32.mxu1 %v2664_v56  ;;  %v2714_v52 = vcombine.high %v2706_v45, %v2706_v45  ;;  %v691_v60 = vld [vmem:[%s17262_s24 + $0xb00] sm:$0xff]  ;;  %v693_v61 = vld [vmem:[%s17262_s24 + $0xb10] sm:$0xff] }
 0x319   : > { %15150 = vmatpush1.xpose.msra.mxu0 %v679_v63  ;;  %15220 = vmatpush1.xpose.msra.mxu1 %v681_v0  ;;  %v1080_v63 = vld [vmem:[%s17262_s24 + $0x1728] sm:$0x3]  ;;  %v1082_v0 = vld [vmem:[%s17262_s24 + $0x1738] sm:$0x3] }
 0x31a   : > { %15287 = vmatprep.subr.mxu0 %v1068_v2  ;;  %15357 = vmatprep.subr.mxu1 %v1070_v3  ;;  %v2730_v2 = vrot.slane %v2716_v54, %v17286_v19  ;;  %v333_v3 = vld [vmem:[%s17255_s29 + $0x2d0] sm:$0xff] }
 0x31c   : > { %v11825_v14 = vpop.f32.mrf.mxu0  ;;  %15184 = vmatmul.mubr.f32.vlgmr.msra.gmra.mxu0 %v2655_v48  ;;  %v11895_v15 = vpop.f32.mrf.mxu1  ;;  %15254 = vmatmul.mubr.f32.vlgmr.msra.gmra.mxu1 %v2662_v49  ;;  %v1075_v48 = vld [vmem:[%s17262_s24 + $0x1700] sm:$0x3]  ;;  %v1077_v49 = vld [vmem:[%s17262_s24 + $0x1710] sm:$0x3] }
 0x31d   : > { %v11826_v16 = vadd.f32 %v11825_v14, %v11756_v1  ;;  %15288 = vmatpush1.xpose.msra.mxu0 %v1067_v7  ;;  %15358 = vmatpush1.xpose.msra.mxu1 %v1069_v8  ;;  %v2723_v1 = vrot.slane %v332_v47, %v17286_v19  ;;  %v698_v7 = vld [vmem:[%s17262_s24 + $0xb38] sm:$0xff]  ;;  %v704_v47 = vld [vmem:[%s17262_s24 + $0xb68] sm:$0xff] }
 0x31e   : > { %v11827_v17 = vpop.f32.mrf.mxu0  ;;  %v11897_v18 = vpop.f32.mrf.mxu1  ;;  %15289 = vmatprep.subr.mxu0 %v684_v9  ;;  %15359 = vmatprep.subr.mxu1 %v686_v10  ;;  %v2732_v9 = vcombine.high %v2730_v2, %v2730_v2  ;;  %v2733_v10 = vcombine.high %v333_v3, %v333_v3 }
 0x31f   : > { %v11896_v22 = vadd.f32 %v11895_v15, %v11826_v16  ;;  %15323 = vmatprep.mubr.f32.mxu0 %v2680_v11  ;;  %15393 = vmatprep.mubr.f32.mxu1 %v2681_v12  ;;  %v2731_v8 = vcombine.high %v2723_v1, %v2723_v1  ;;  %v695_v16 = vld [vmem:[%s17262_s24 + $0xb20] sm:$0xff]  ;;  %v697_v17 = vld [vmem:[%s17262_s24 + $0xb30] sm:$0xff] }
 0x321   : > { %15290 = vmatpush1.xpose.msra.mxu0 %v683_v20  ;;  %15360 = vmatpush1.xpose.msra.mxu1 %v685_v21  ;;  %v1084_v20 = vld [vmem:[%s17262_s24 + $0x1748] sm:$0x3]  ;;  %v1086_v21 = vld [vmem:[%s17262_s24 + $0x1758] sm:$0x3] }
 0x322   : > { %15427 = vmatprep.subr.mxu0 %v1072_v23  ;;  %15497 = vmatprep.subr.mxu1 %v1074_v24  ;;  %v2747_v23 = vrot.slane %v2733_v10, %v17286_v19  ;;  %v334_v24 = vld [vmem:[%s17255_s29 + $0x2d8] sm:$0xff] }
 0x324   : > { %v11965_v35 = vpop.f32.mrf.mxu0  ;;  %15324 = vmatmul.mubr.f32.vlgmr.msra.gmra.mxu0 %v2672_v4  ;;  %v12035_v36 = vpop.f32.mrf.mxu1  ;;  %15394 = vmatmul.mubr.f32.vlgmr.msra.gmra.mxu1 %v2679_v5  ;;  %v1079_v4 = vld [vmem:[%s17262_s24 + $0x1720] sm:$0x3]  ;;  %v1081_v5 = vld [vmem:[%s17262_s24 + $0x1730] sm:$0x3] }
 0x325   : > { %v11966_v37 = vadd.f32 %v11965_v35, %v11896_v22  ;;  %15428 = vmatpush1.xpose.msra.mxu0 %v1071_v28  ;;  %15498 = vmatpush1.xpose.msra.mxu1 %v1073_v29  ;;  %v2740_v22 = vrot.slane %v333_v3, %v17286_v19  ;;  %v702_v28 = vld [vmem:[%s17262_s24 + $0xb58] sm:$0xff]  ;;  %v708_v3 = vld [vmem:[%s17262_s24 + $0xb88] sm:$0xff] }
 0x326   : > { %v11967_v38 = vpop.f32.mrf.mxu0  ;;  %v12037_v39 = vpop.f32.mrf.mxu1  ;;  %15429 = vmatprep.subr.mxu0 %v688_v30  ;;  %15499 = vmatprep.subr.mxu1 %v690_v31  ;;  %v2749_v30 = vcombine.high %v2747_v23, %v2747_v23  ;;  %v2750_v31 = vcombine.high %v334_v24, %v334_v24 }
 0x327   : > { %v12036_v42 = vadd.f32 %v12035_v36, %v11966_v37  ;;  %15463 = vmatprep.mubr.f32.mxu0 %v2697_v32  ;;  %15533 = vmatprep.mubr.f32.mxu1 %v2698_v33  ;;  %v2748_v29 = vcombine.high %v2740_v22, %v2740_v22  ;;  %v699_v37 = vld [vmem:[%s17262_s24 + $0xb40] sm:$0xff]  ;;  %v701_v38 = vld [vmem:[%s17262_s24 + $0xb50] sm:$0xff] }
 0x329   : > { %15430 = vmatpush1.xpose.msra.mxu0 %v687_v40  ;;  %15500 = vmatpush1.xpose.msra.mxu1 %v689_v41  ;;  %v1088_v40 = vld [vmem:[%s17262_s24 + $0x1768] sm:$0x3]  ;;  %v1090_v41 = vld [vmem:[%s17262_s24 + $0x1778] sm:$0x3] }
 0x32a   : > { %15567 = vmatprep.subr.mxu0 %v1076_v43  ;;  %15637 = vmatprep.subr.mxu1 %v1078_v44  ;;  %v2764_v43 = vrot.slane %v2750_v31, %v17286_v19  ;;  %v335_v44 = vld [vmem:[%s17255_s29 + $0x2e0] sm:$0xff] }
 0x32c   : > { %v12105_v55 = vpop.f32.mrf.mxu0  ;;  %15464 = vmatmul.mubr.f32.vlgmr.msra.gmra.mxu0 %v2689_v25  ;;  %v12175_v56 = vpop.f32.mrf.mxu1  ;;  %15534 = vmatmul.mubr.f32.vlgmr.msra.gmra.mxu1 %v2696_v26  ;;  %v1083_v25 = vld [vmem:[%s17262_s24 + $0x1740] sm:$0x3]  ;;  %v1085_v26 = vld [vmem:[%s17262_s24 + $0x1750] sm:$0x3] }
 0x32d   : > { %v12106_v57 = vadd.f32 %v12105_v55, %v12036_v42  ;;  %15568 = vmatpush1.xpose.msra.mxu0 %v1075_v48  ;;  %15638 = vmatpush1.xpose.msra.mxu1 %v1077_v49  ;;  %v2757_v42 = vrot.slane %v334_v24, %v17286_v19  ;;  %v706_v48 = vld [vmem:[%s17262_s24 + $0xb78] sm:$0xff]  ;;  %v712_v24 = vld [vmem:[%s17262_s24 + $0xba8] sm:$0xff] }
 0x32e   : > { %v12107_v58 = vpop.f32.mrf.mxu0  ;;  %v12177_v59 = vpop.f32.mrf.mxu1  ;;  %15569 = vmatprep.subr.mxu0 %v692_v50  ;;  %15639 = vmatprep.subr.mxu1 %v694_v51  ;;  %v2766_v50 = vcombine.high %v2764_v43, %v2764_v43  ;;  %v2767_v51 = vcombine.high %v335_v44, %v335_v44 }
 0x32f   : > { %v12176_v62 = vadd.f32 %v12175_v56, %v12106_v57  ;;  %15603 = vmatprep.mubr.f32.mxu0 %v2714_v52  ;;  %15673 = vmatprep.mubr.f32.mxu1 %v2715_v53  ;;  %v2765_v49 = vcombine.high %v2757_v42, %v2757_v42  ;;  %v703_v57 = vld [vmem:[%s17262_s24 + $0xb60] sm:$0xff]  ;;  %v705_v58 = vld [vmem:[%s17262_s24 + $0xb70] sm:$0xff] }
 0x331   : > { %15570 = vmatpush1.xpose.msra.mxu0 %v691_v60  ;;  %15640 = vmatpush1.xpose.msra.mxu1 %v693_v61  ;;  %v1092_v60 = vld [vmem:[%s17262_s24 + $0x1788] sm:$0x3]  ;;  %v1094_v61 = vld [vmem:[%s17262_s24 + $0x1798] sm:$0x3] }
 0x332   : > { %15707 = vmatprep.subr.mxu0 %v1080_v63  ;;  %15777 = vmatprep.subr.mxu1 %v1082_v0  ;;  %v2781_v63 = vrot.slane %v2767_v51, %v17286_v19  ;;  %v336_v0 = vld [vmem:[%s17255_s29 + $0x2e8] sm:$0xff] }
 0x334   : > { %v12245_v11 = vpop.f32.mrf.mxu0  ;;  %15604 = vmatmul.mubr.f32.vlgmr.msra.gmra.mxu0 %v2706_v45  ;;  %v12315_v12 = vpop.f32.mrf.mxu1  ;;  %15674 = vmatmul.mubr.f32.vlgmr.msra.gmra.mxu1 %v2713_v46  ;;  %v1087_v45 = vld [vmem:[%s17262_s24 + $0x1760] sm:$0x3]  ;;  %v1089_v46 = vld [vmem:[%s17262_s24 + $0x1770] sm:$0x3] }
 0x335   : > { %v12246_v13 = vadd.f32 %v12245_v11, %v12176_v62  ;;  %15708 = vmatpush1.xpose.msra.mxu0 %v1079_v4  ;;  %15778 = vmatpush1.xpose.msra.mxu1 %v1081_v5  ;;  %v2774_v62 = vrot.slane %v335_v44, %v17286_v19  ;;  %v710_v4 = vld [vmem:[%s17262_s24 + $0xb98] sm:$0xff]  ;;  %v716_v44 = vld [vmem:[%s17262_s24 + $0xbc8] sm:$0xff] }
 0x336   : > { %v12247_v14 = vpop.f32.mrf.mxu0  ;;  %v12317_v15 = vpop.f32.mrf.mxu1  ;;  %15709 = vmatprep.subr.mxu0 %v696_v6  ;;  %15779 = vmatprep.subr.mxu1 %v698_v7  ;;  %v2783_v6 = vcombine.high %v2781_v63, %v2781_v63  ;;  %v2784_v7 = vcombine.high %v336_v0, %v336_v0 }
 0x337   : > { %v12316_v18 = vadd.f32 %v12315_v12, %v12246_v13  ;;  %15743 = vmatprep.mubr.f32.mxu0 %v2731_v8  ;;  %15813 = vmatprep.mubr.f32.mxu1 %v2732_v9  ;;  %v2782_v5 = vcombine.high %v2774_v62, %v2774_v62  ;;  %v707_v13 = vld [vmem:[%s17262_s24 + $0xb80] sm:$0xff]  ;;  %v709_v14 = vld [vmem:[%s17262_s24 + $0xb90] sm:$0xff] }
 0x339   : > { %15710 = vmatpush1.xpose.msra.mxu0 %v695_v16  ;;  %15780 = vmatpush1.xpose.msra.mxu1 %v697_v17  ;;  %v1096_v16 = vld [vmem:[%s17262_s24 + $0x17a8] sm:$0x3]  ;;  %v1098_v17 = vld [vmem:[%s17262_s24 + $0x17b8] sm:$0x3] }
 0x33a   : > { %15847 = vmatprep.subr.mxu0 %v1084_v20  ;;  %15917 = vmatprep.subr.mxu1 %v1086_v21  ;;  %v2798_v20 = vrot.slane %v2784_v7, %v17286_v19  ;;  %v337_v21 = vld [vmem:[%s17255_s29 + $0x2f0] sm:$0xff]  ;;  %v719_v7 = vld [vmem:[%s17262_s24 + $0xbe0] sm:$0xff] }
 0x33c   : > { %v12385_v32 = vpop.f32.mrf.mxu0  ;;  %15744 = vmatmul.mubr.f32.vlgmr.msra.gmra.mxu0 %v2723_v1  ;;  %v12455_v33 = vpop.f32.mrf.mxu1  ;;  %15814 = vmatmul.mubr.f32.vlgmr.msra.gmra.mxu1 %v2730_v2  ;;  %v1091_v1 = vld [vmem:[%s17262_s24 + $0x1780] sm:$0x3]  ;;  %v1093_v2 = vld [vmem:[%s17262_s24 + $0x1790] sm:$0x3] }
 0x33d   : > { %v12386_v34 = vadd.f32 %v12385_v32, %v12316_v18  ;;  %15848 = vmatpush1.xpose.msra.mxu0 %v1083_v25  ;;  %15918 = vmatpush1.xpose.msra.mxu1 %v1085_v26  ;;  %v2791_v18 = vrot.slane %v336_v0, %v17286_v19  ;;  %v714_v25 = vld [vmem:[%s17262_s24 + $0xbb8] sm:$0xff] }
 0x33e   : > { %v12387_v35 = vpop.f32.mrf.mxu0  ;;  %v12457_v36 = vpop.f32.mrf.mxu1  ;;  %15849 = vmatprep.subr.mxu0 %v700_v27  ;;  %15919 = vmatprep.subr.mxu1 %v702_v28  ;;  %v2800_v27 = vcombine.high %v2798_v20, %v2798_v20  ;;  %v2801_v28 = vcombine.high %v337_v21, %v337_v21  ;;  %v722_v0 = vld [vmem:[%s17262_s24 + $0xbf8] sm:$0xff] }
 0x33f   : > { %v12456_v39 = vadd.f32 %v12455_v33, %v12386_v34  ;;  %15883 = vmatprep.mubr.f32.mxu0 %v2748_v29  ;;  %15953 = vmatprep.mubr.f32.mxu1 %v2749_v30  ;;  %v2799_v26 = vcombine.high %v2791_v18, %v2791_v18  ;;  %v711_v34 = vld [vmem:[%s17262_s24 + $0xba0] sm:$0xff]  ;;  %v713_v35 = vld [vmem:[%s17262_s24 + $0xbb0] sm:$0xff] }
 0x341   : > { %15850 = vmatpush1.xpose.msra.mxu0 %v699_v37  ;;  %15920 = vmatpush1.xpose.msra.mxu1 %v701_v38  ;;  %v1100_v37 = vld [vmem:[%s17262_s24 + $0x17c8] sm:$0x3]  ;;  %v1102_v38 = vld [vmem:[%s17262_s24 + $0x17d8] sm:$0x3] }
 0x342   : > { %15987 = vmatprep.subr.mxu0 %v1088_v40  ;;  %16057 = vmatprep.subr.mxu1 %v1090_v41  ;;  %v2815_v40 = vrot.slane %v2801_v28, %v17286_v19  ;;  %v338_v41 = vld [vmem:[%s17255_s29 + $0x2f8] sm:$0xff] }
 0x344   : > { %v12525_v52 = vpop.f32.mrf.mxu0  ;;  %15884 = vmatmul.mubr.f32.vlgmr.msra.gmra.mxu0 %v2740_v22  ;;  %v12595_v53 = vpop.f32.mrf.mxu1  ;;  %15954 = vmatmul.mubr.f32.vlgmr.msra.gmra.mxu1 %v2747_v23  ;;  %v1095_v22 = vld [vmem:[%s17262_s24 + $0x17a0] sm:$0x3]  ;;  %v1097_v23 = vld [vmem:[%s17262_s24 + $0x17b0] sm:$0x3] }
 0x345   : > { %v12526_v54 = vadd.f32 %v12525_v52, %v12456_v39  ;;  %15988 = vmatpush1.xpose.msra.mxu0 %v1087_v45  ;;  %16058 = vmatpush1.xpose.msra.mxu1 %v1089_v46  ;;  %v2808_v39 = vrot.slane %v337_v21, %v17286_v19  ;;  %v718_v45 = vld [vmem:[%s17262_s24 + $0xbd8] sm:$0xff] }
 0x346   : > { %v12527_v55 = vpop.f32.mrf.mxu0  ;;  %v12597_v56 = vpop.f32.mrf.mxu1  ;;  %15989 = vmatprep.subr.mxu0 %v704_v47  ;;  %16059 = vmatprep.subr.mxu1 %v706_v48  ;;  %v2817_v47 = vcombine.high %v2815_v40, %v2815_v40  ;;  %v2818_v48 = vcombine.high %v338_v41, %v338_v41 }
 0x347   : > { %v12596_v59 = vadd.f32 %v12595_v53, %v12526_v54  ;;  %16023 = vmatprep.mubr.f32.mxu0 %v2765_v49  ;;  %16093 = vmatprep.mubr.f32.mxu1 %v2766_v50  ;;  %v2816_v46 = vcombine.high %v2808_v39, %v2808_v39  ;;  %v715_v54 = vld [vmem:[%s17262_s24 + $0xbc0] sm:$0xff]  ;;  %v717_v55 = vld [vmem:[%s17262_s24 + $0xbd0] sm:$0xff] }
 0x349   : > { %15990 = vmatpush1.xpose.msra.mxu0 %v703_v57  ;;  %16060 = vmatpush1.xpose.msra.mxu1 %v705_v58  ;;  %v1104_v57 = vld [vmem:[%s17262_s24 + $0x17e8] sm:$0x3]  ;;  %v1106_v58 = vld [vmem:[%s17262_s24 + $0x17f8] sm:$0x3] }
 0x34a   : > { %16127 = vmatprep.subr.mxu0 %v1092_v60  ;;  %16197 = vmatprep.subr.mxu1 %v1094_v61  ;;  %v2832_v60 = vrot.slane %v2818_v48, %v17286_v19  ;;  %v1103_v61 = vld [vmem:[%s17262_s24 + $0x17e0] sm:$0x3] }
 0x34c   : > { %v12665_v8 = vpop.f32.mrf.mxu0  ;;  %16024 = vmatmul.mubr.f32.vlgmr.msra.gmra.mxu0 %v2757_v42  ;;  %v12735_v9 = vpop.f32.mrf.mxu1  ;;  %16094 = vmatmul.mubr.f32.vlgmr.msra.gmra.mxu1 %v2764_v43  ;;  %v1099_v42 = vld [vmem:[%s17262_s24 + $0x17c0] sm:$0x3]  ;;  %v1101_v43 = vld [vmem:[%s17262_s24 + $0x17d0] sm:$0x3] }
 0x34d   : > { %v12666_v10 = vadd.f32 %v12665_v8, %v12596_v59  ;;  %16128 = vmatpush1.xpose.msra.mxu0 %v1091_v1  ;;  %16198 = vmatpush1.xpose.msra.mxu1 %v1093_v2  ;;  %v2825_v59 = vrot.slane %v338_v41, %v17286_v19  ;;  %v2834_v2 = vcombine.high %v2832_v60, %v2832_v60  ;;  %v721_v8 = vld [vmem:[%s17262_s24 + $0xbf0] sm:$0xff] }
 0x34e   : > { %v12667_v11 = vpop.f32.mrf.mxu0  ;;  %v12737_v12 = vpop.f32.mrf.mxu1  ;;  %16129 = vmatprep.subr.mxu0 %v708_v3  ;;  %16199 = vmatprep.subr.mxu1 %v710_v4 }
 0x34f   : > { %v12736_v15 = vadd.f32 %v12735_v9, %v12666_v10  ;;  %16163 = vmatprep.mubr.f32.mxu0 %v2782_v5  ;;  %16233 = vmatprep.mubr.f32.mxu1 %v2783_v6  ;;  %v2833_v1 = vcombine.high %v2825_v59, %v2825_v59 }
 0x351   : > { %16130 = vmatpush1.xpose.msra.mxu0 %v707_v13  ;;  %16200 = vmatpush1.xpose.msra.mxu1 %v709_v14 }
 0x352   : > { %16267 = vmatprep.subr.mxu0 %v1096_v16  ;;  %16337 = vmatprep.subr.mxu1 %v1098_v17 }
 0x354   : > { %v12805_v29 = vpop.f32.mrf.mxu0  ;;  %16164 = vmatmul.mubr.f32.vlgmr.msra.gmra.mxu0 %v2774_v62  ;;  %v12875_v30 = vpop.f32.mrf.mxu1  ;;  %16234 = vmatmul.mubr.f32.vlgmr.msra.gmra.mxu1 %v2781_v63  ;;  %v1105_v62 = vld [vmem:[%s17262_s24 + $0x17f0] sm:$0x3]  ;;  %v720_v63 = vld [vmem:[%s17262_s24 + $0xbe8] sm:$0xff] }
 0x355   : > { %v12806_v31 = vadd.f32 %v12805_v29, %v12736_v15  ;;  %16268 = vmatpush1.xpose.msra.mxu0 %v1095_v22  ;;  %16338 = vmatpush1.xpose.msra.mxu1 %v1097_v23 }
 0x356   : > { %v12807_v32 = vpop.f32.mrf.mxu0  ;;  %v12877_v33 = vpop.f32.mrf.mxu1  ;;  %16269 = vmatprep.subr.mxu0 %v712_v24  ;;  %16339 = vmatprep.subr.mxu1 %v714_v25 }
 0x357   : > { %v12876_v36 = vadd.f32 %v12875_v30, %v12806_v31  ;;  %16303 = vmatprep.mubr.f32.mxu0 %v2799_v26  ;;  %16373 = vmatprep.mubr.f32.mxu1 %v2800_v27 }
 0x359   : > { %16270 = vmatpush1.xpose.msra.mxu0 %v711_v34  ;;  %16340 = vmatpush1.xpose.msra.mxu1 %v713_v35 }
 0x35a   : > { %16407 = vmatprep.subr.mxu0 %v1100_v37  ;;  %16477 = vmatprep.subr.mxu1 %v1102_v38 }
 0x35c   : > { %v12945_v49 = vpop.f32.mrf.mxu0  ;;  %16304 = vmatmul.mubr.f32.vlgmr.msra.gmra.mxu0 %v2791_v18  ;;  %v13015_v50 = vpop.f32.mrf.mxu1  ;;  %16374 = vmatmul.mubr.f32.vlgmr.msra.gmra.mxu1 %v2798_v20 }
 0x35d   : > { %v12946_v51 = vadd.f32 %v12945_v49, %v12876_v36  ;;  %16408 = vmatpush1.xpose.msra.mxu0 %v1099_v42  ;;  %16478 = vmatpush1.xpose.msra.mxu1 %v1101_v43 }
 0x35e   : > { %v12947_v52 = vpop.f32.mrf.mxu0  ;;  %v13017_v53 = vpop.f32.mrf.mxu1  ;;  %16409 = vmatprep.subr.mxu0 %v716_v44  ;;  %16479 = vmatprep.subr.mxu1 %v718_v45 }
 0x35f   : > { %v13016_v56 = vadd.f32 %v13015_v50, %v12946_v51  ;;  %16443 = vmatprep.mubr.f32.mxu0 %v2816_v46  ;;  %16513 = vmatprep.mubr.f32.mxu1 %v2817_v47 }
 0x361   : > { %16410 = vmatpush1.xpose.msra.mxu0 %v715_v54  ;;  %16480 = vmatpush1.xpose.msra.mxu1 %v717_v55 }
 0x362   : > { %16547 = vmatprep.subr.mxu0 %v1104_v57  ;;  %16617 = vmatprep.subr.mxu1 %v1106_v58 }
 0x364   : > { %v13085_v3 = vpop.f32.mrf.mxu0  ;;  %16444 = vmatmul.mubr.f32.vlgmr.msra.gmra.mxu0 %v2808_v39  ;;  %v13155_v4 = vpop.f32.mrf.mxu1  ;;  %16514 = vmatmul.mubr.f32.vlgmr.msra.gmra.mxu1 %v2815_v40 }
 0x365   : > { %v13086_v5 = vadd.f32 %v13085_v3, %v13016_v56  ;;  %16548 = vmatpush1.xpose.msra.mxu0 %v1103_v61  ;;  %16618 = vmatpush1.xpose.msra.mxu1 %v1105_v62 }
 0x366   : > { %v13087_v19 = vpop.f32.mrf.mxu0  ;;  %v13157_v6 = vpop.f32.mrf.mxu1  ;;  %16549 = vmatprep.subr.mxu0 %v720_v63  ;;  %16619 = vmatprep.subr.mxu1 %v722_v0 }
 0x367   : > { %v13156_v9 = vadd.f32 %v13155_v4, %v13086_v5  ;;  %16583 = vmatprep.mubr.f32.mxu0 %v2833_v1  ;;  %16653 = vmatprep.mubr.f32.mxu1 %v2834_v2 }
 0x369   : > { %16550 = vmatpush1.xpose.msra.mxu0 %v719_v7  ;;  %16620 = vmatpush1.xpose.msra.mxu1 %v721_v8 }
 0x36c   : > { %v13225_v10 = vpop.f32.mrf.mxu0  ;;  %16584 = vmatmul.mubr.f32.vlgmr.msra.gmra.mxu0 %v2825_v59  ;;  %16654 = vmatmul.mubr.f32.vlgmr.msra.gmra.mxu1 %v2832_v60  ;;  %v13295_v11 = vpop.f32.mrf.mxu1 }
 0x36d   : > { %v13226_v12 = vadd.f32 %v13225_v10, %v13156_v9 }
 0x36e   : > { %v13227_v13 = vpop.f32.mrf.mxu0  ;;  %v13297_v14 = vpop.f32.mrf.mxu1 }
 0x36f   : > { %v13296_v15 = vadd.f32 %v13295_v11, %v13226_v12 }
 0x374   : > { %v13365_v16 = vpop.f32.mrf.mxu0  ;;  %v13435_v17 = vpop.f32.mrf.mxu1 }
 0x375   : > { %v13366_v18 = vadd.f32 %v13365_v16, %v13296_v15 }
 0x376   : > { %v13367_v20 = vpop.f32.mrf.mxu0  ;;  %v13437_v21 = vpop.f32.mrf.mxu1 }
 0x377   : > { %v13436_v22 = vadd.f32 %v13435_v17, %v13366_v18 }
 0x37c   : > { %v13505_v23 = vpop.f32.mrf.mxu0  ;;  %v13575_v24 = vpop.f32.mrf.mxu1 }
 0x37d   : > { %v13506_v25 = vadd.f32 %v13505_v23, %v13436_v22 }
 0x37e   : > { %v13507_v26 = vpop.f32.mrf.mxu0  ;;  %v13577_v27 = vpop.f32.mrf.mxu1 }
 0x37f   : > { %v13576_v28 = vadd.f32 %v13575_v24, %v13506_v25 }
 0x384   : > { %v13645_v29 = vpop.f32.mrf.mxu0  ;;  %v13715_v30 = vpop.f32.mrf.mxu1 }
 0x385   : > { %v13646_v31 = vadd.f32 %v13645_v29, %v13576_v28 }
 0x386   : > { %v13647_v32 = vpop.f32.mrf.mxu0  ;;  %v13717_v33 = vpop.f32.mrf.mxu1 }
 0x387   : > { %v13716_v34 = vadd.f32 %v13715_v30, %v13646_v31 }
 0x38c   : > { %v13785_v35 = vpop.f32.mrf.mxu0  ;;  %v13855_v36 = vpop.f32.mrf.mxu1 }
 0x38d   : > { %v13786_v37 = vadd.f32 %v13785_v35, %v13716_v34 }
 0x38e   : > { %v13787_v38 = vpop.f32.mrf.mxu0  ;;  %v13857_v39 = vpop.f32.mrf.mxu1 }
 0x38f   : > { %v13856_v40 = vadd.f32 %v13855_v36, %v13786_v37 }
 0x394   : > { %v13925_v41 = vpop.f32.mrf.mxu0  ;;  %v13995_v42 = vpop.f32.mrf.mxu1 }
 0x395   : > { %v13926_v43 = vadd.f32 %v13925_v41, %v13856_v40 }
 0x396   : > { %v13927_v44 = vpop.f32.mrf.mxu0  ;;  %v13997_v45 = vpop.f32.mrf.mxu1 }
 0x397   : > { %v13996_v46 = vadd.f32 %v13995_v42, %v13926_v43 }
 0x39c   : > { %v14065_v47 = vpop.f32.mrf.mxu0  ;;  %v14135_v48 = vpop.f32.mrf.mxu1 }
 0x39d   : > { %v14066_v49 = vadd.f32 %v14065_v47, %v13996_v46 }
 0x39e   : > { %v14067_v50 = vpop.f32.mrf.mxu0  ;;  %v14137_v51 = vpop.f32.mrf.mxu1 }
 0x39f   : > { %v14136_v52 = vadd.f32 %v14135_v48, %v14066_v49 }
 0x3a4   : > { %v14205_v53 = vpop.f32.mrf.mxu0  ;;  %v14275_v54 = vpop.f32.mrf.mxu1 }
 0x3a5   : > { %v14206_v55 = vadd.f32 %v14205_v53, %v14136_v52 }
 0x3a6   : > { %v14207_v56 = vpop.f32.mrf.mxu0  ;;  %v14277_v57 = vpop.f32.mrf.mxu1 }
 0x3a7   : > { %v14276_v58 = vadd.f32 %v14275_v54, %v14206_v55 }
 0x3ac   : > { %v14345_v59 = vpop.f32.mrf.mxu0  ;;  %v14415_v60 = vpop.f32.mrf.mxu1 }
 0x3ad   : > { %v14346_v61 = vadd.f32 %v14345_v59, %v14276_v58 }
 0x3ae   : > { %v14347_v62 = vpop.f32.mrf.mxu0  ;;  %v14417_v63 = vpop.f32.mrf.mxu1 }
 0x3af   : > { %v14416_v0 = vadd.f32 %v14415_v60, %v14346_v61 }
 0x3b4   : > { %v14485_v1 = vpop.f32.mrf.mxu0  ;;  %v14555_v2 = vpop.f32.mrf.mxu1 }
 0x3b5   : > { %v14486_v16 = vadd.f32 %v14485_v1, %v14416_v0 }
 0x3b6   : > { %v14487_v3 = vpop.f32.mrf.mxu0  ;;  %v14557_v4 = vpop.f32.mrf.mxu1 }
 0x3b7   : > { %v14556_v22 = vadd.f32 %v14555_v2, %v14486_v16 }
 0x3bc   : > { %v14625_v5 = vpop.f32.mrf.mxu0  ;;  %v14695_v19 = vpop.f32.mrf.mxu1 }
 0x3bd   : > { %v14626_v23 = vadd.f32 %v14625_v5, %v14556_v22 }
 0x3be   : > { %v14627_v6 = vpop.f32.mrf.mxu0  ;;  %v14697_v7 = vpop.f32.mrf.mxu1 }
 0x3bf   : > { %v14696_v26 = vadd.f32 %v14695_v19, %v14626_v23 }
 0x3c4   : > { %v14765_v8 = vpop.f32.mrf.mxu0  ;;  %v14835_v9 = vpop.f32.mrf.mxu1 }
 0x3c5   : > { %v14766_v29 = vadd.f32 %v14765_v8, %v14696_v26 }
 0x3c6   : > { %v14767_v10 = vpop.f32.mrf.mxu0  ;;  %v14837_v11 = vpop.f32.mrf.mxu1 }
 0x3c7   : > { %v14836_v30 = vadd.f32 %v14835_v9, %v14766_v29 }
 0x3cc   : > { %v14905_v12 = vpop.f32.mrf.mxu0  ;;  %v14975_v13 = vpop.f32.mrf.mxu1 }
 0x3cd   : > { %v14906_v33 = vadd.f32 %v14905_v12, %v14836_v30  ;;  %v242_v30 = vld [vmem:[#allocation8] sm:$0x3] }
 0x3ce   : > { %v14907_v14 = vpop.f32.mrf.mxu0  ;;  %v14977_v15 = vpop.f32.mrf.mxu1 }
 0x3cf   : > { %v14976_v36 = vadd.f32 %v14975_v13, %v14906_v33 }
 0x3d4   : > { %v15045_v17 = vpop.f32.mrf.mxu0  ;;  %v15115_v18 = vpop.f32.mrf.mxu1 }
 0x3d5   : > { %v15046_v37 = vadd.f32 %v15045_v17, %v14976_v36 }
 0x3d6   : > { %v15047_v20 = vpop.f32.mrf.mxu0  ;;  %v15117_v21 = vpop.f32.mrf.mxu1 }
 0x3d7   : > { %v15116_v42 = vadd.f32 %v15115_v18, %v15046_v37 }
 0x3dc   : > { %v15185_v24 = vpop.f32.mrf.mxu0  ;;  %v15255_v25 = vpop.f32.mrf.mxu1 }
 0x3dd   : > { %v15186_v43 = vadd.f32 %v15185_v24, %v15116_v42 }
 0x3de   : > { %v15187_v27 = vpop.f32.mrf.mxu0  ;;  %v15257_v28 = vpop.f32.mrf.mxu1 }
 0x3df   : > { %v15256_v46 = vadd.f32 %v15255_v25, %v15186_v43 }
 0x3e4   : > { %v15325_v31 = vpop.f32.mrf.mxu0  ;;  %v15395_v32 = vpop.f32.mrf.mxu1 }
 0x3e5   : > { %v15326_v49 = vadd.f32 %v15325_v31, %v15256_v46 }
 0x3e6   : > { %v15327_v34 = vpop.f32.mrf.mxu0  ;;  %v15397_v35 = vpop.f32.mrf.mxu1 }
 0x3e7   : > { %v15396_v50 = vadd.f32 %v15395_v32, %v15326_v49 }
 0x3ec   : > { %v15465_v38 = vpop.f32.mrf.mxu0  ;;  %v15535_v39 = vpop.f32.mrf.mxu1 }
 0x3ed   : > { %v15466_v53 = vadd.f32 %v15465_v38, %v15396_v50 }
 0x3ee   : > { %v15467_v40 = vpop.f32.mrf.mxu0  ;;  %v15537_v41 = vpop.f32.mrf.mxu1 }
 0x3ef   : > { %v15536_v56 = vadd.f32 %v15535_v39, %v15466_v53 }
 0x3f4   : > { %v15605_v44 = vpop.f32.mrf.mxu0  ;;  %v15675_v45 = vpop.f32.mrf.mxu1 }
 0x3f5   : > { %v15606_v57 = vadd.f32 %v15605_v44, %v15536_v56 }
 0x3f6   : > { %v15607_v47 = vpop.f32.mrf.mxu0  ;;  %v15677_v48 = vpop.f32.mrf.mxu1 }
 0x3f7   : > { %v15676_v62 = vadd.f32 %v15675_v45, %v15606_v57 }
 0x3fc   : > { %v15745_v51 = vpop.f32.mrf.mxu0  ;;  %v15815_v52 = vpop.f32.mrf.mxu1 }
 0x3fd   : > { %v15746_v63 = vadd.f32 %v15745_v51, %v15676_v62 }
 0x3fe   : > { %v15747_v54 = vpop.f32.mrf.mxu0  ;;  %v15817_v55 = vpop.f32.mrf.mxu1 }
 0x3ff   : > { %v15816_v2 = vadd.f32 %v15815_v52, %v15746_v63 }
 0x404   : > { %v15885_v58 = vpop.f32.mrf.mxu0  ;;  %v15955_v59 = vpop.f32.mrf.mxu1 }
 0x405   : > { %v15886_v5 = vadd.f32 %v15885_v58, %v15816_v2 }
 0x406   : > { %v15887_v60 = vpop.f32.mrf.mxu0  ;;  %v15957_v61 = vpop.f32.mrf.mxu1 }
 0x407   : > { %v15956_v19 = vadd.f32 %v15955_v59, %v15886_v5 }
 0x40c   : > { %v16025_v0 = vpop.f32.mrf.mxu0  ;;  %v16095_v1 = vpop.f32.mrf.mxu1 }
 0x40d   : > { %v16026_v8 = vadd.f32 %v16025_v0, %v15956_v19 }
 0x40e   : > { %v16027_v3 = vpop.f32.mrf.mxu0  ;;  %v16097_v4 = vpop.f32.mrf.mxu1 }
 0x40f   : > { %v16096_v11 = vadd.f32 %v16095_v1, %v16026_v8 }
 0x414   : > { %v16165_v6 = vpop.f32.mrf.mxu0  ;;  %v16235_v7 = vpop.f32.mrf.mxu1 }
 0x415   : > { %v16166_v12 = vadd.f32 %v16165_v6, %v16096_v11 }
 0x416   : > { %v16167_v9 = vpop.f32.mrf.mxu0  ;;  %v16237_v10 = vpop.f32.mrf.mxu1 }
 0x417   : > { %v16236_v17 = vadd.f32 %v16235_v7, %v16166_v12 }
 0x41c   : > { %v16305_v13 = vpop.f32.mrf.mxu0  ;;  %v16375_v14 = vpop.f32.mrf.mxu1 }
 0x41d   : > { %v16306_v18 = vadd.f32 %v16305_v13, %v16236_v17 }
 0x41e   : > { %v16307_v15 = vpop.f32.mrf.mxu0  ;;  %v16377_v16 = vpop.f32.mrf.mxu1 }
 0x41f   : > { %v16376_v22 = vadd.f32 %v16375_v14, %v16306_v18 }
 0x424   : > { %v16445_v20 = vpop.f32.mrf.mxu0  ;;  %v16515_v21 = vpop.f32.mrf.mxu1 }
 0x425   : > { %v16446_v25 = vadd.f32 %v16445_v20, %v16376_v22 }
 0x426   : > { %v16447_v23 = vpop.f32.mrf.mxu0  ;;  %v16517_v24 = vpop.f32.mrf.mxu1 }
 0x427   : > { %v16516_v26 = vadd.f32 %v16515_v21, %v16446_v25 }
 0x42c   : > { %v16585_v27 = vpop.f32.mrf.mxu0  ;;  %v16655_v28 = vpop.f32.mrf.mxu1 }
 0x42d   : > { %v16586_v29 = vadd.f32 %v16585_v27, %v16516_v26 }
 0x42e   : > { %v16587_v31 = vpop.f32.mrf.mxu0  ;;  %v16657_v32 = vpop.f32.mrf.mxu1 }
 0x42f   : > { %v16656_v33 = vadd.f32 %v16655_v28, %v16586_v29 }
 0x431   : > { %v16659_v34 = vadd.f32 %v16656_v33, %v242_v30 }
 0x433   : > { %16661 = vst.msk [vmem:[#allocation8] sm:$0x3] %vm16660_vm1, %v16659_v34 }
 0x434   : > { %17028 = shalt.err (!%p17025_p4)
}
 0x435   : > { %16780 = dma.vmem_to_hbm [thread:$0]  (%p16797_p5), %s16670_s22, 32, %s18360_s3, [#allocation4]  }
 0x436   : > { %17068 = dma.done.wait (%p16797_p5), [#allocation4], 32  }
 0x437   : > { %17070 = vsyncadd (%p16797_p5), [#allocation4], 4294967264 }
 0x438 PF: > { %p17_p8 = scmp.ge.s32.totalorder %s17137_s17, 6   ;;  %s18373_s12 = smov %s17077_s13 }
 0x439   : > { %s18374_s13 = smov %s17081_s14  ;;  %s18375_s14 = smov %s17147_s20 }
 0x43a   : > { %s18376_s15 = smov %s17137_s17  ;;  %19 = sbr.rel (!%p17_p8) target bundleno = 6 (0x6), region = 90 }
 0x43f   :  { %16682 = vsyncpa [#allocation3], 1 }
 0x440   :  { %16684 = vsyncpa [#allocation3 + $0x1], 1 }
 0x441   :  { %16685 = vsyncpa [#allocation6], 1 }
 0x442   :  { %16687 = vsyncpa [#allocation6 + $0x1], 1 }
 0x443   :  { %16688 = vsyncpa [#allocation4], 1 }
 0x444   :  { %16690 = vsyncpa [#allocation4 + $0x1], 1 }

</bundles_post_ra>
